<compile_context>
chip_gen: v7x
topology: tpu7x:2x2x1
jax: 0.10.0
libtpu: 0.0.40
codegen_flags: <defaults>
</compile_context>

<pallas_src>
import functools
import math

import jax
import jax.numpy as jnp
from jax import lax
from jax.experimental import pallas as pl
from jax.experimental.pallas import tpu as pltpu


# ----------------------------------------------------------------------------
# In-kernel math helpers
# ----------------------------------------------------------------------------
def _gelu(x):
    # tanh-approx GELU (EUP slot instead of a long VALU erf polynomial).
    c = math.sqrt(2.0 / math.pi)
    return 0.5 * x * (1.0 + jnp.tanh(c * (x + 0.044715 * x * x * x)))


# ----------------------------------------------------------------------------
# The single fused kernel: Bb batch samples per grid step
# ----------------------------------------------------------------------------
def _transnet7_kernel(x_ref, m_ref,
                      cw1_ref, cb1_ref, cw2_ref, cb2_ref,
                      pw1_ref, pb1_ref, pw2_ref, pb2_ref,
                      lng_ref, lnb_ref, fw_ref, fb_ref,
                      o_ref, *, cnn_activation, ln_eps):
    Bb, S, D = x_ref.shape
    N = Bb * S

    # Hoisted sequence-position masks used to zero the rows that wrap across a sample
    # boundary after the circular roll (== per-sample zero padding of the k=3 conv).
    s_idx = lax.broadcasted_iota(jnp.int32, (1, S, 1), 1)
    not_first = s_idx != 0
    not_last = s_idx != (S - 1)

    def act(v):
        return jnp.maximum(v, 0.0) if cnn_activation == "relu" else _gelu(v)

    def conv1d_k3(h3d, w_ref, b_ref):
        """Conv1d(k=3, padding=1) over the sequence axis as three per-tap MXU dots.

        h3d:   [Bb, S, Din]  bf16
        w_ref: [3, Din, Dout] bf16, taps in order (prev, center, next),
               i.e. w_ref[t, c, o] == torch_conv.weight[o, c, t]
        b_ref: [1, Dout] f32

        The taps are combined in *output* space: z_t = h @ W_t reuses the same bf16
        LHS, and the shift is a pltpu.roll on the f32 result (XLU) + boundary mask,
        so neither an [N, 3D] slab nor shifted bf16 activation copies exist.
        """
        dout = w_ref.shape[-1]
        h2 = h3d.reshape(N, h3d.shape[-1])
        y = jnp.dot(h2, w_ref[1], preferred_element_type=jnp.float32).reshape(Bb, S, dout)
        z = jnp.dot(h2, w_ref[0], preferred_element_type=jnp.float32).reshape(Bb, S, dout)
        y = y + jnp.where(not_first, pltpu.roll(z, shift=1, axis=1), 0.0)
        z = jnp.dot(h2, w_ref[2], preferred_element_type=jnp.float32).reshape(Bb, S, dout)
        y = y + jnp.where(not_last, pltpu.roll(z, shift=S - 1, axis=1), 0.0)
        return y + b_ref[...]

    # ---- LightCNN1DModel: (Conv1d k=3 p=1 -> act) x 2 -------------------------------
    h = x_ref[...]                                                     # bf16 [Bb,S,D]
    h = act(conv1d_k3(h, cw1_ref, cb1_ref)).astype(jnp.bfloat16)
    h = act(conv1d_k3(h, cw2_ref, cb2_ref)).astype(jnp.bfloat16)       # bf16 [Bb,S,D]

    # ---- MeanPooling over valid tokens (torch.clamp(min=1e-9)) ----------------------
    # One block-diagonal [Bb, Bb*S] @ [Bb*S, D] masked-sum matmul for the whole block.
    m2 = m_ref[...].reshape(Bb, S)                                     # f32 [Bb, S]
    cnt = jnp.maximum(jnp.sum(m2, axis=1, keepdims=True), 1e-9)        # [Bb, 1]
    col = lax.broadcasted_iota(jnp.int32, (Bb, N), 1)
    lo = lax.broadcasted_iota(jnp.int32, (Bb, N), 0) * S
    sel = (col >= lo) & (col < lo + S)
    mdiag = jnp.where(sel, jnp.tile(m2, (1, Bb)), 0.0).astype(jnp.bfloat16)
    summed = jnp.dot(mdiag, h.reshape(N, D),
                     preferred_element_type=jnp.float32)               # [Bb, D]
    pooled = summed * pl.reciprocal(cnt, approx=True)                  # [Bb, D]

    # ---- ProjectionHead: Linear -> GELU -> Linear -> dropout(id) -> +res -> LN ------
    projected = jnp.dot(pooled.astype(jnp.bfloat16), pw1_ref[...],
                        preferred_element_type=jnp.float32) + pb1_ref[...]   # [Bb, P]
    y = jnp.dot(_gelu(projected).astype(jnp.bfloat16), pw2_ref[...],
                preferred_element_type=jnp.float32) + pb2_ref[...]           # [Bb, P]
    y = y + projected
    mu = jnp.mean(y, axis=-1, keepdims=True)
    var = jnp.mean(jnp.square(y - mu), axis=-1, keepdims=True)         # biased (torch)
    y = (y - mu) * lax.rsqrt(var + ln_eps) * lng_ref[...] + lnb_ref[...]

    # ---- final classifier (output dim already lane-padded to a multiple of 128) -----
    out = jnp.dot(y.astype(jnp.bfloat16), fw_ref[...],
                  preferred_element_type=jnp.float32) + fb_ref[...]          # [Bb, Cp]
    o_ref[...] = out.reshape(Bb, 1, -1).astype(o_ref.dtype)


# ----------------------------------------------------------------------------
# Wrapper helpers
# ----------------------------------------------------------------------------
def _vmem_capacity_bytes():
    try:
        return int(pltpu.get_tpu_info().vmem_capacity_bytes)
    except Exception:
        return 64 * 1024 * 1024   # conservative default (v7x per-core VMEM)


def _pick_batch_block(B, S, D, requested, act_budget_bytes):
    # ~14 bytes/element of live conv activations per sample (bf16 h + two f32 slabs
    # + double-buffered bf16 input block); keep the blocked working set in budget.
    per_sample = max(1, S * D * 14)
    cap = max(1, act_budget_bytes // per_sample)
    bb = max(1, min(requested, cap, B))
    while B % bb:
        bb -= 1
    if B // bb < 2 and bb > 1:
        # keep >= 2 grid steps so v7x's two TensorCores both get work
        bb = max(d for d in range(1, bb) if B % d == 0)
    return bb


def _const_index_map(ndim):
    return lambda b: (0,) * ndim


# ----------------------------------------------------------------------------
# Forward wrapper
# ----------------------------------------------------------------------------
def transnetwork7_forward(params, x, attention_mask, *,
                          cnn_activation="relu", ln_eps=1e-5, batch_block=8):
    """x: [B, S, D] float; attention_mask: [B, S] (0/1).  Returns logits [B, C]."""
    B, S, D = x.shape
    P = params["proj_w1"].shape[1]
    C = params["fc_w"].shape[1]
    Cp = max(128, ((C + 127) // 128) * 128)            # lane-dense classifier output

    fc_w, fc_b = params["fc_w"], params["fc_b"]
    if Cp != C:
        fc_w = jnp.pad(fc_w, ((0, 0), (0, Cp - C)))
        fc_b = jnp.pad(fc_b, ((0, 0), (0, Cp - C)))

    vmem_cap = _vmem_capacity_bytes()
    vmem_limit = int(vmem_cap * 7 // 8)                # ~56 MiB v7x, ~112 MiB v5e/v6e
    bb = _pick_batch_block(B, S, D, batch_block, vmem_cap // 3)

    x_bf16 = x.astype(jnp.bfloat16)                    # bf16 activations end to end
    mask3 = attention_mask.astype(jnp.float32).reshape(B, 1, S)

    weights = (params["conv_w1"], params["conv_b1"],
               params["conv_w2"], params["conv_b2"],
               params["proj_w1"], params["proj_b1"],
               params["proj_w2"], params["proj_b2"],
               params["ln_g"], params["ln_b"], fc_w, fc_b)

    flops = int(2 * 2 * B * S * 3 * D * D              # two 3-tap convs
                + 2 * B * bb * S * D                   # block-diagonal masked pooling
                + 2 * B * (D * P + P * P + P * Cp))    # head + classifier
    transcendentals = int(B * P + B)
    bytes_accessed = int(x_bf16.size * 2 + mask3.size * 4
                         + sum(int(w.size) * w.dtype.itemsize for w in weights)
                         + B * Cp * 4)

    def run(single_buffer_weights):
        w_specs = []
        for w in weights:
            if single_buffer_weights:
                w_specs.append(pl.BlockSpec(w.shape, _const_index_map(w.ndim),
                                            pipeline_mode=pl.Buffered(1)))
            else:
                w_specs.append(pl.BlockSpec(w.shape, _const_index_map(w.ndim)))
        in_specs = [
            pl.BlockSpec((bb, S, D), lambda b: (b, 0, 0)),   # x: bb samples / step
            pl.BlockSpec((bb, 1, S), lambda b: (b, 0, 0)),   # mask
        ] + w_specs
        out = pl.pallas_call(
            functools.partial(_transnet7_kernel,
                              cnn_activation=cnn_activation, ln_eps=ln_eps),
            out_shape=jax.ShapeDtypeStruct((B, 1, Cp), jnp.float32),
            grid=(B // bb,),
            in_specs=in_specs,
            out_specs=pl.BlockSpec((bb, 1, Cp), lambda b: (b, 0, 0)),
            compiler_params=pltpu.CompilerParams(
                dimension_semantics=("parallel",),
                vmem_limit_bytes=vmem_limit),
            cost_estimate=pl.CostEstimate(flops=flops,
                                          transcendentals=transcendentals,
                                          bytes_accessed=bytes_accessed),
        )(x_bf16, mask3, *weights)
        return jax.block_until_ready(out)

    try:
        out3 = run(single_buffer_weights=hasattr(pl, "Buffered"))
    except Exception:
        # Fallback: some runtimes may reject single-buffered (Buffered(1)) weight
        # specs; default double-buffering is semantically identical.
        out3 = run(single_buffer_weights=False)

    return out3.reshape(B, Cp)[:, :C]


# ----------------------------------------------------------------------------
# Deterministic synthetic parameters
# ----------------------------------------------------------------------------
def init_params(key, *, input_dim, proj_dim, num_classes):
    D, P, C = input_dim, proj_dim, num_classes
    ks = iter(jax.random.split(key, 12))

    def w(*shape):   # bf16 weights for the MXU fast path
        return (0.02 * jax.random.normal(next(ks), shape, jnp.float32)
                ).astype(jnp.bfloat16)

    def b(n):        # f32 biases
        return 0.02 * jax.random.normal(next(ks), (1, n), jnp.float32)

    return {
        # conv weights: [3, Din, Dout], taps (prev, center, next)
        "conv_w1": w(3, D, D), "conv_b1": b(D),
        "conv_w2": w(3, D, D), "conv_b2": b(D),
        "proj_w1": w(D, P), "proj_b1": b(P),
        "proj_w2": w(P, P), "proj_b2": b(P),
        "ln_g": jnp.ones((1, P), jnp.float32),
        "ln_b": jnp.zeros((1, P), jnp.float32),
        "fc_w": w(P, C), "fc_b": b(C),
    }


# ----------------------------------------------------------------------------
# Pure-JAX reference with the same precision policy (bf16 matmuls / f32 accumulate)
# ----------------------------------------------------------------------------
def reference_forward(params, x, attention_mask, *, cnn_activation="relu", ln_eps=1e-5):
    B, S, D = x.shape

    def conv(h, w, bias):
        zero = jnp.zeros((B, 1, D), h.dtype)
        h_prev = jnp.concatenate([zero, h[:, :-1]], axis=1)
        h_next = jnp.concatenate([h[:, 1:], zero], axis=1)
        y = jnp.einsum("bsc,cd->bsd", h_prev, w[0], preferred_element_type=jnp.float32)
        y += jnp.einsum("bsc,cd->bsd", h, w[1], preferred_element_type=jnp.float32)
        y += jnp.einsum("bsc,cd->bsd", h_next, w[2], preferred_element_type=jnp.float32)
        return y + bias

    act = (lambda v: jnp.maximum(v, 0.0)) if cnn_activation == "relu" else _gelu
    h = x.astype(jnp.bfloat16)
    h = act(conv(h, params["conv_w1"], params["conv_b1"])).astype(jnp.bfloat16)
    h = act(conv(h, params["conv_w2"], params["conv_b2"])).astype(jnp.bfloat16)

    m = attention_mask.astype(jnp.float32)
    summed = jnp.einsum("bs,bsd->bd", m.astype(jnp.bfloat16), h,
                        preferred_element_type=jnp.float32)
    cnt = jnp.maximum(jnp.sum(m, axis=-1, keepdims=True), 1e-9)
    pooled = summed / cnt

    projected = jnp.dot(pooled.astype(jnp.bfloat16), params["proj_w1"],
                        preferred_element_type=jnp.float32) + params["proj_b1"]
    y = jnp.dot(_gelu(projected).astype(jnp.bfloat16), params["proj_w2"],
                preferred_element_type=jnp.float32) + params["proj_b2"]
    y = y + projected
    mu = jnp.mean(y, axis=-1, keepdims=True)
    var = jnp.mean(jnp.square(y - mu), axis=-1, keepdims=True)
    y = (y - mu) * lax.rsqrt(var + ln_eps) * params["ln_g"] + params["ln_b"]
    return jnp.dot(y.astype(jnp.bfloat16), params["fc_w"],
                   preferred_element_type=jnp.float32) + params["fc_b"]


# ----------------------------------------------------------------------------
if __name__ == "__main__":
    # Small shapes for the self-test (production: D=768, P=512, S~1k, C=NUM_TAGS).
    B, S = 2, 16
    D, P, C = 128, 128, 10

    key = jax.random.PRNGKey(0)
    pkey, xkey = jax.random.split(key)
    params = init_params(pkey, input_dim=D, proj_dim=P, num_classes=C)

    x = jax.random.normal(xkey, (B, S, D), jnp.float32)
    attention_mask = jnp.array([[1] * 12 + [0] * 4,
                                [1] * 16], jnp.float32)

    outs = jax.block_until_ready(transnetwork7_forward(params, x, attention_mask))

    assert outs.shape == (B, C), outs.shape
    assert bool(jnp.all(jnp.isfinite(outs)))

    ref = reference_forward(params, x, attention_mask)
    err = float(jnp.max(jnp.abs(outs - ref)))
    assert bool(jnp.allclose(outs, ref, atol=2e-2, rtol=2e-2)), err

    print("KERNEL_OK")
</pallas_src>

<mosaic_0001>
module attributes {stable_mosaic.version = 11 : i64} {
  func.func @_transnet7_kernel(%arg0: i32, %arg1: memref<1x16x128xbf16, #tpu.memory_space<vmem>>, %arg2: memref<1x1x16xf32, #tpu.memory_space<vmem>>, %arg3: memref<3x128x128xbf16, #tpu.memory_space<vmem>>, %arg4: memref<1x128xf32, #tpu.memory_space<vmem>>, %arg5: memref<3x128x128xbf16, #tpu.memory_space<vmem>>, %arg6: memref<1x128xf32, #tpu.memory_space<vmem>>, %arg7: memref<128x128xbf16, #tpu.memory_space<vmem>>, %arg8: memref<1x128xf32, #tpu.memory_space<vmem>>, %arg9: memref<128x128xbf16, #tpu.memory_space<vmem>>, %arg10: memref<1x128xf32, #tpu.memory_space<vmem>>, %arg11: memref<1x128xf32, #tpu.memory_space<vmem>>, %arg12: memref<1x128xf32, #tpu.memory_space<vmem>>, %arg13: memref<128x128xbf16, #tpu.memory_space<vmem>>, %arg14: memref<1x128xf32, #tpu.memory_space<vmem>>, %arg15: memref<1x1x128xf32, #tpu.memory_space<vmem>>) attributes {dimension_semantics = [#tpu.dimension_semantics<parallel>], iteration_bounds = array<i64: 2>, scalar_prefetch = 0 : i64, scratch_operands = 0 : i64, tpu.core_type = #tpu.core_type<tc>, window_params = [{transform_indices = @transform_0, window_bounds = array<i64: 1, 16, 128>}, {transform_indices = @transform_1, window_bounds = array<i64: 1, 1, 16>}, {pipeline_mode = #tpu.pipeline_mode<synchronous>, transform_indices = @transform_2, window_bounds = array<i64: 3, 128, 128>}, {pipeline_mode = #tpu.pipeline_mode<synchronous>, transform_indices = @transform_3, window_bounds = array<i64: 1, 128>}, {pipeline_mode = #tpu.pipeline_mode<synchronous>, transform_indices = @transform_4, window_bounds = array<i64: 3, 128, 128>}, {pipeline_mode = #tpu.pipeline_mode<synchronous>, transform_indices = @transform_5, window_bounds = array<i64: 1, 128>}, {pipeline_mode = #tpu.pipeline_mode<synchronous>, transform_indices = @transform_6, window_bounds = array<i64: 128, 128>}, {pipeline_mode = #tpu.pipeline_mode<synchronous>, transform_indices = @transform_7, window_bounds = array<i64: 1, 128>}, {pipeline_mode = #tpu.pipeline_mode<synchronous>, transform_indices = @transform_8, window_bounds = array<i64: 128, 128>}, {pipeline_mode = #tpu.pipeline_mode<synchronous>, transform_indices = @transform_9, window_bounds = array<i64: 1, 128>}, {pipeline_mode = #tpu.pipeline_mode<synchronous>, transform_indices = @transform_10, window_bounds = array<i64: 1, 128>}, {pipeline_mode = #tpu.pipeline_mode<synchronous>, transform_indices = @transform_11, window_bounds = array<i64: 1, 128>}, {pipeline_mode = #tpu.pipeline_mode<synchronous>, transform_indices = @transform_12, window_bounds = array<i64: 128, 128>}, {pipeline_mode = #tpu.pipeline_mode<synchronous>, transform_indices = @transform_13, window_bounds = array<i64: 1, 128>}, {transform_indices = @transform_14, window_bounds = array<i64: 1, 1, 128>}]} {
    %0 = tpu.iota {dimensions = array<i32: 1>} : vector<1x16x1xi32>
    %c0_i32 = arith.constant 0 : i32
    %1 = vector.broadcast %c0_i32 : i32 to vector<1x16x1xi32>
    %2 = arith.cmpi ne, %0, %1 : vector<1x16x1xi32>
    %c15_i32 = arith.constant 15 : i32
    %3 = vector.broadcast %c15_i32 : i32 to vector<1x16x1xi32>
    %4 = arith.cmpi ne, %0, %3 : vector<1x16x1xi32>
    %c0 = arith.constant 0 : index
    %c0_0 = arith.constant 0 : index
    %c0_1 = arith.constant 0 : index
    %5 = vector.load %arg1[%c0, %c0_0, %c0_1] : memref<1x16x128xbf16, #tpu.memory_space<vmem>>, vector<1x16x128xbf16>
    %6 = vector.shape_cast %5 : vector<1x16x128xbf16> to vector<16x128xbf16>
    %c1 = arith.constant 1 : index
    %c0_2 = arith.constant 0 : index
    %c0_3 = arith.constant 0 : index
    %7 = vector.load %arg3[%c1, %c0_2, %c0_3] : memref<3x128x128xbf16, #tpu.memory_space<vmem>>, vector<1x128x128xbf16>
    %8 = vector.shape_cast %7 : vector<1x128x128xbf16> to vector<128x128xbf16>
    %cst = arith.constant dense<0.000000e+00> : vector<16x128xf32>
    %9 = tpu.matmul %6, %8, %cst {dimension_numbers = #tpu.dot_dimension_numbers<[1], [0], [0], [1], [0, 0, 1, 1], [], []>} : vector<16x128xbf16>, vector<128x128xbf16>, vector<16x128xf32> -> vector<16x128xf32>
    %10 = vector.shape_cast %9 : vector<16x128xf32> to vector<1x16x128xf32>
    %c0_4 = arith.constant 0 : index
    %c0_5 = arith.constant 0 : index
    %c0_6 = arith.constant 0 : index
    %11 = vector.load %arg3[%c0_4, %c0_5, %c0_6] : memref<3x128x128xbf16, #tpu.memory_space<vmem>>, vector<1x128x128xbf16>
    %12 = vector.shape_cast %11 : vector<1x128x128xbf16> to vector<128x128xbf16>
    %cst_7 = arith.constant dense<0.000000e+00> : vector<16x128xf32>
    %13 = tpu.matmul %6, %12, %cst_7 {dimension_numbers = #tpu.dot_dimension_numbers<[1], [0], [0], [1], [0, 0, 1, 1], [], []>} : vector<16x128xbf16>, vector<128x128xbf16>, vector<16x128xf32> -> vector<16x128xf32>
    %14 = vector.shape_cast %13 : vector<16x128xf32> to vector<1x16x128xf32>
    %c1_i32 = arith.constant 1 : i32
    %15 = tpu.dynamic_rotate %14 by %c1_i32 dim 1 : vector<1x16x128xf32>, i32 -> vector<1x16x128xf32>
    %cst_8 = arith.constant 0.000000e+00 : f32
    %16 = vector.shape_cast %2 : vector<1x16x1xi1> to vector<1x16x1xi1>
    %17 = vector.broadcast %16 : vector<1x16x1xi1> to vector<1x16x128xi1>
    %18 = vector.broadcast %cst_8 : f32 to vector<1x16x128xf32>
    %19 = arith.select %17, %15, %18 : vector<1x16x128xi1>, vector<1x16x128xf32>
    %20 = arith.addf %10, %19 : vector<1x16x128xf32>
    %c2 = arith.constant 2 : index
    %c0_9 = arith.constant 0 : index
    %c0_10 = arith.constant 0 : index
    %21 = vector.load %arg3[%c2, %c0_9, %c0_10] : memref<3x128x128xbf16, #tpu.memory_space<vmem>>, vector<1x128x128xbf16>
    %22 = vector.shape_cast %21 : vector<1x128x128xbf16> to vector<128x128xbf16>
    %cst_11 = arith.constant dense<0.000000e+00> : vector<16x128xf32>
    %23 = tpu.matmul %6, %22, %cst_11 {dimension_numbers = #tpu.dot_dimension_numbers<[1], [0], [0], [1], [0, 0, 1, 1], [], []>} : vector<16x128xbf16>, vector<128x128xbf16>, vector<16x128xf32> -> vector<16x128xf32>
    %24 = vector.shape_cast %23 : vector<16x128xf32> to vector<1x16x128xf32>
    %c15_i32_12 = arith.constant 15 : i32
    %25 = tpu.dynamic_rotate %24 by %c15_i32_12 dim 1 : vector<1x16x128xf32>, i32 -> vector<1x16x128xf32>
    %cst_13 = arith.constant 0.000000e+00 : f32
    %26 = vector.shape_cast %4 : vector<1x16x1xi1> to vector<1x16x1xi1>
    %27 = vector.broadcast %26 : vector<1x16x1xi1> to vector<1x16x128xi1>
    %28 = vector.broadcast %cst_13 : f32 to vector<1x16x128xf32>
    %29 = arith.select %27, %25, %28 : vector<1x16x128xi1>, vector<1x16x128xf32>
    %30 = arith.addf %20, %29 : vector<1x16x128xf32>
    %c0_14 = arith.constant 0 : index
    %c0_15 = arith.constant 0 : index
    %31 = vector.load %arg4[%c0_14, %c0_15] : memref<1x128xf32, #tpu.memory_space<vmem>>, vector<1x128xf32>
    %32 = vector.shape_cast %31 : vector<1x128xf32> to vector<1x1x128xf32>
    %33 = vector.broadcast %32 : vector<1x1x128xf32> to vector<1x16x128xf32>
    %34 = arith.addf %30, %33 : vector<1x16x128xf32>
    %cst_16 = arith.constant 0.000000e+00 : f32
    %35 = vector.broadcast %cst_16 : f32 to vector<1x16x128xf32>
    %36 = arith.maximumf %34, %35 : vector<1x16x128xf32>
    %37 = arith.truncf %36 : vector<1x16x128xf32> to vector<1x16x128xbf16>
    %38 = vector.shape_cast %37 : vector<1x16x128xbf16> to vector<16x128xbf16>
    %c1_17 = arith.constant 1 : index
    %c0_18 = arith.constant 0 : index
    %c0_19 = arith.constant 0 : index
    %39 = vector.load %arg5[%c1_17, %c0_18, %c0_19] : memref<3x128x128xbf16, #tpu.memory_space<vmem>>, vector<1x128x128xbf16>
    %40 = vector.shape_cast %39 : vector<1x128x128xbf16> to vector<128x128xbf16>
    %cst_20 = arith.constant dense<0.000000e+00> : vector<16x128xf32>
    %41 = tpu.matmul %38, %40, %cst_20 {dimension_numbers = #tpu.dot_dimension_numbers<[1], [0], [0], [1], [0, 0, 1, 1], [], []>} : vector<16x128xbf16>, vector<128x128xbf16>, vector<16x128xf32> -> vector<16x128xf32>
    %42 = vector.shape_cast %41 : vector<16x128xf32> to vector<1x16x128xf32>
    %c0_21 = arith.constant 0 : index
    %c0_22 = arith.constant 0 : index
    %c0_23 = arith.constant 0 : index
    %43 = vector.load %arg5[%c0_21, %c0_22, %c0_23] : memref<3x128x128xbf16, #tpu.memory_space<vmem>>, vector<1x128x128xbf16>
    %44 = vector.shape_cast %43 : vector<1x128x128xbf16> to vector<128x128xbf16>
    %cst_24 = arith.constant dense<0.000000e+00> : vector<16x128xf32>
    %45 = tpu.matmul %38, %44, %cst_24 {dimension_numbers = #tpu.dot_dimension_numbers<[1], [0], [0], [1], [0, 0, 1, 1], [], []>} : vector<16x128xbf16>, vector<128x128xbf16>, vector<16x128xf32> -> vector<16x128xf32>
    %46 = vector.shape_cast %45 : vector<16x128xf32> to vector<1x16x128xf32>
    %c1_i32_25 = arith.constant 1 : i32
    %47 = tpu.dynamic_rotate %46 by %c1_i32_25 dim 1 : vector<1x16x128xf32>, i32 -> vector<1x16x128xf32>
    %cst_26 = arith.constant 0.000000e+00 : f32
    %48 = vector.shape_cast %2 : vector<1x16x1xi1> to vector<1x16x1xi1>
    %49 = vector.broadcast %48 : vector<1x16x1xi1> to vector<1x16x128xi1>
    %50 = vector.broadcast %cst_26 : f32 to vector<1x16x128xf32>
    %51 = arith.select %49, %47, %50 : vector<1x16x128xi1>, vector<1x16x128xf32>
    %52 = arith.addf %42, %51 : vector<1x16x128xf32>
    %c2_27 = arith.constant 2 : index
    %c0_28 = arith.constant 0 : index
    %c0_29 = arith.constant 0 : index
    %53 = vector.load %arg5[%c2_27, %c0_28, %c0_29] : memref<3x128x128xbf16, #tpu.memory_space<vmem>>, vector<1x128x128xbf16>
    %54 = vector.shape_cast %53 : vector<1x128x128xbf16> to vector<128x128xbf16>
    %cst_30 = arith.constant dense<0.000000e+00> : vector<16x128xf32>
    %55 = tpu.matmul %38, %54, %cst_30 {dimension_numbers = #tpu.dot_dimension_numbers<[1], [0], [0], [1], [0, 0, 1, 1], [], []>} : vector<16x128xbf16>, vector<128x128xbf16>, vector<16x128xf32> -> vector<16x128xf32>
    %56 = vector.shape_cast %55 : vector<16x128xf32> to vector<1x16x128xf32>
    %c15_i32_31 = arith.constant 15 : i32
    %57 = tpu.dynamic_rotate %56 by %c15_i32_31 dim 1 : vector<1x16x128xf32>, i32 -> vector<1x16x128xf32>
    %cst_32 = arith.constant 0.000000e+00 : f32
    %58 = vector.shape_cast %4 : vector<1x16x1xi1> to vector<1x16x1xi1>
    %59 = vector.broadcast %58 : vector<1x16x1xi1> to vector<1x16x128xi1>
    %60 = vector.broadcast %cst_32 : f32 to vector<1x16x128xf32>
    %61 = arith.select %59, %57, %60 : vector<1x16x128xi1>, vector<1x16x128xf32>
    %62 = arith.addf %52, %61 : vector<1x16x128xf32>
    %c0_33 = arith.constant 0 : index
    %c0_34 = arith.constant 0 : index
    %63 = vector.load %arg6[%c0_33, %c0_34] : memref<1x128xf32, #tpu.memory_space<vmem>>, vector<1x128xf32>
    %64 = vector.shape_cast %63 : vector<1x128xf32> to vector<1x1x128xf32>
    %65 = vector.broadcast %64 : vector<1x1x128xf32> to vector<1x16x128xf32>
    %66 = arith.addf %62, %65 : vector<1x16x128xf32>
    %cst_35 = arith.constant 0.000000e+00 : f32
    %67 = vector.broadcast %cst_35 : f32 to vector<1x16x128xf32>
    %68 = arith.maximumf %66, %67 : vector<1x16x128xf32>
    %69 = arith.truncf %68 : vector<1x16x128xf32> to vector<1x16x128xbf16>
    %c0_36 = arith.constant 0 : index
    %c0_37 = arith.constant 0 : index
    %c0_38 = arith.constant 0 : index
    %70 = vector.load %arg2[%c0_36, %c0_37, %c0_38] : memref<1x1x16xf32, #tpu.memory_space<vmem>>, vector<1x1x16xf32>
    %71 = vector.shape_cast %70 : vector<1x1x16xf32> to vector<1x16xf32>
    %cst_39 = arith.constant dense<0.000000e+00> : vector<1xf32>
    %72 = vector.multi_reduction <add>, %71, %cst_39 [1] : vector<1x16xf32> to vector<1xf32>
    %73 = vector.shape_cast %72 : vector<1xf32> to vector<1x1xf32>
    %cst_40 = arith.constant 9.99999971E-10 : f32
    %74 = vector.broadcast %cst_40 : f32 to vector<1x1xf32>
    %75 = arith.maximumf %73, %74 : vector<1x1xf32>
    %76 = tpu.iota {dimensions = array<i32: 1>} : vector<1x16xi32>
    %77 = tpu.iota {dimensions = array<i32: 0>} : vector<1x16xi32>
    %c16_i32 = arith.constant 16 : i32
    %78 = vector.broadcast %c16_i32 : i32 to vector<1x16xi32>
    %79 = arith.muli %77, %78 : vector<1x16xi32>
    %80 = arith.cmpi sge, %76, %79 : vector<1x16xi32>
    %c16_i32_41 = arith.constant 16 : i32
    %81 = vector.broadcast %c16_i32_41 : i32 to vector<1x16xi32>
    %82 = arith.addi %79, %81 : vector<1x16xi32>
    %83 = arith.cmpi slt, %76, %82 : vector<1x16xi32>
    %84 = arith.andi %80, %83 : vector<1x16xi1>
    %cst_42 = arith.constant 0.000000e+00 : f32
    %85 = vector.broadcast %cst_42 : f32 to vector<1x16xf32>
    %86 = arith.select %84, %71, %85 : vector<1x16xi1>, vector<1x16xf32>
    %87 = arith.truncf %86 : vector<1x16xf32> to vector<1x16xbf16>
    %88 = vector.shape_cast %69 : vector<1x16x128xbf16> to vector<16x128xbf16>
    %cst_43 = arith.constant dense<0.000000e+00> : vector<1x128xf32>
    %89 = tpu.matmul %87, %88, %cst_43 {dimension_numbers = #tpu.dot_dimension_numbers<[1], [0], [0], [1], [0, 0, 1, 1], [], []>} : vector<1x16xbf16>, vector<16x128xbf16>, vector<1x128xf32> -> vector<1x128xf32>
    %90 = tpu.reciprocal %75 {approx = true} : vector<1x1xf32> -> vector<1x1xf32>
    %91 = vector.broadcast %90 : vector<1x1xf32> to vector<1x128xf32>
    %92 = arith.mulf %89, %91 : vector<1x128xf32>
    %93 = arith.truncf %92 : vector<1x128xf32> to vector<1x128xbf16>
    %c0_44 = arith.constant 0 : index
    %c0_45 = arith.constant 0 : index
    %94 = vector.load %arg7[%c0_44, %c0_45] : memref<128x128xbf16, #tpu.memory_space<vmem>>, vector<128x128xbf16>
    %cst_46 = arith.constant dense<0.000000e+00> : vector<1x128xf32>
    %95 = tpu.matmul %93, %94, %cst_46 {dimension_numbers = #tpu.dot_dimension_numbers<[1], [0], [0], [1], [0, 0, 1, 1], [], []>} : vector<1x128xbf16>, vector<128x128xbf16>, vector<1x128xf32> -> vector<1x128xf32>
    %c0_47 = arith.constant 0 : index
    %c0_48 = arith.constant 0 : index
    %96 = vector.load %arg8[%c0_47, %c0_48] : memref<1x128xf32, #tpu.memory_space<vmem>>, vector<1x128xf32>
    %97 = arith.addf %95, %96 : vector<1x128xf32>
    %cst_49 = arith.constant 5.000000e-01 : f32
    %98 = vector.broadcast %cst_49 : f32 to vector<1x128xf32>
    %99 = arith.mulf %98, %97 : vector<1x128xf32>
    %cst_50 = arith.constant 4.471500e-02 : f32
    %100 = vector.broadcast %cst_50 : f32 to vector<1x128xf32>
    %101 = arith.mulf %100, %97 : vector<1x128xf32>
    %102 = arith.mulf %101, %97 : vector<1x128xf32>
    %103 = arith.mulf %102, %97 : vector<1x128xf32>
    %104 = arith.addf %97, %103 : vector<1x128xf32>
    %cst_51 = arith.constant 0.797884583 : f32
    %105 = vector.broadcast %cst_51 : f32 to vector<1x128xf32>
    %106 = arith.mulf %105, %104 : vector<1x128xf32>
    %107 = math.tanh %106 : vector<1x128xf32>
    %cst_52 = arith.constant 1.000000e+00 : f32
    %108 = vector.broadcast %cst_52 : f32 to vector<1x128xf32>
    %109 = arith.addf %108, %107 : vector<1x128xf32>
    %110 = arith.mulf %99, %109 : vector<1x128xf32>
    %111 = arith.truncf %110 : vector<1x128xf32> to vector<1x128xbf16>
    %c0_53 = arith.constant 0 : index
    %c0_54 = arith.constant 0 : index
    %112 = vector.load %arg9[%c0_53, %c0_54] : memref<128x128xbf16, #tpu.memory_space<vmem>>, vector<128x128xbf16>
    %cst_55 = arith.constant dense<0.000000e+00> : vector<1x128xf32>
    %113 = tpu.matmul %111, %112, %cst_55 {dimension_numbers = #tpu.dot_dimension_numbers<[1], [0], [0], [1], [0, 0, 1, 1], [], []>} : vector<1x128xbf16>, vector<128x128xbf16>, vector<1x128xf32> -> vector<1x128xf32>
    %c0_56 = arith.constant 0 : index
    %c0_57 = arith.constant 0 : index
    %114 = vector.load %arg10[%c0_56, %c0_57] : memref<1x128xf32, #tpu.memory_space<vmem>>, vector<1x128xf32>
    %115 = arith.addf %113, %114 : vector<1x128xf32>
    %116 = arith.addf %115, %97 : vector<1x128xf32>
    %cst_58 = arith.constant dense<0.000000e+00> : vector<1xf32>
    %117 = vector.multi_reduction <add>, %116, %cst_58 [1] : vector<1x128xf32> to vector<1xf32>
    %118 = vector.shape_cast %117 : vector<1xf32> to vector<1x1xf32>
    %cst_59 = arith.constant 1.280000e+02 : f32
    %119 = vector.broadcast %cst_59 : f32 to vector<1x1xf32>
    %120 = arith.divf %118, %119 : vector<1x1xf32>
    %121 = vector.broadcast %120 : vector<1x1xf32> to vector<1x128xf32>
    %122 = arith.subf %116, %121 : vector<1x128xf32>
    %123 = arith.mulf %122, %122 : vector<1x128xf32>
    %cst_60 = arith.constant dense<0.000000e+00> : vector<1xf32>
    %124 = vector.multi_reduction <add>, %123, %cst_60 [1] : vector<1x128xf32> to vector<1xf32>
    %125 = vector.shape_cast %124 : vector<1xf32> to vector<1x1xf32>
    %cst_61 = arith.constant 1.280000e+02 : f32
    %126 = vector.broadcast %cst_61 : f32 to vector<1x1xf32>
    %127 = arith.divf %125, %126 : vector<1x1xf32>
    %128 = vector.broadcast %120 : vector<1x1xf32> to vector<1x128xf32>
    %129 = arith.subf %116, %128 : vector<1x128xf32>
    %cst_62 = arith.constant 9.99999974E-6 : f32
    %130 = vector.broadcast %cst_62 : f32 to vector<1x1xf32>
    %131 = arith.addf %127, %130 : vector<1x1xf32>
    %132 = math.rsqrt %131 : vector<1x1xf32>
    %133 = vector.broadcast %132 : vector<1x1xf32> to vector<1x128xf32>
    %134 = arith.mulf %129, %133 : vector<1x128xf32>
    %c0_63 = arith.constant 0 : index
    %c0_64 = arith.constant 0 : index
    %135 = vector.load %arg11[%c0_63, %c0_64] : memref<1x128xf32, #tpu.memory_space<vmem>>, vector<1x128xf32>
    %136 = arith.mulf %134, %135 : vector<1x128xf32>
    %c0_65 = arith.constant 0 : index
    %c0_66 = arith.constant 0 : index
    %137 = vector.load %arg12[%c0_65, %c0_66] : memref<1x128xf32, #tpu.memory_space<vmem>>, vector<1x128xf32>
    %138 = arith.addf %136, %137 : vector<1x128xf32>
    %139 = arith.truncf %138 : vector<1x128xf32> to vector<1x128xbf16>
    %c0_67 = arith.constant 0 : index
    %c0_68 = arith.constant 0 : index
    %140 = vector.load %arg13[%c0_67, %c0_68] : memref<128x128xbf16, #tpu.memory_space<vmem>>, vector<128x128xbf16>
    %cst_69 = arith.constant dense<0.000000e+00> : vector<1x128xf32>
    %141 = tpu.matmul %139, %140, %cst_69 {dimension_numbers = #tpu.dot_dimension_numbers<[1], [0], [0], [1], [0, 0, 1, 1], [], []>} : vector<1x128xbf16>, vector<128x128xbf16>, vector<1x128xf32> -> vector<1x128xf32>
    %c0_70 = arith.constant 0 : index
    %c0_71 = arith.constant 0 : index
    %142 = vector.load %arg14[%c0_70, %c0_71] : memref<1x128xf32, #tpu.memory_space<vmem>>, vector<1x128xf32>
    %143 = arith.addf %141, %142 : vector<1x128xf32>
    %144 = vector.shape_cast %143 : vector<1x128xf32> to vector<1x1x128xf32>
    %c0_72 = arith.constant 0 : index
    %c0_73 = arith.constant 0 : index
    %c0_74 = arith.constant 0 : index
    %145 = vector.load %arg15[%c0_72, %c0_73, %c0_74] : memref<1x1x128xf32, #tpu.memory_space<vmem>>, vector<1x1x128xf32>
    tpu.vector_store %arg15[%c0_72, %c0_73, %c0_74], %144 {strides = array<i32>} : memref<1x1x128xf32, #tpu.memory_space<vmem>>, vector<1x1x128xf32>,
    return
  }
  func.func @transform_0(%arg0: i32) -> (i32, i32, i32) {
    %c0_i32 = arith.constant 0 : i32
    %c0_i32_0 = arith.constant 0 : i32
    %c0_i32_1 = arith.constant 0 : i32
    return %arg0, %c0_i32, %c0_i32_0 : i32, i32, i32
  }
  func.func @transform_1(%arg0: i32) -> (i32, i32, i32) {
    %c0_i32 = arith.constant 0 : i32
    %c0_i32_0 = arith.constant 0 : i32
    %c0_i32_1 = arith.constant 0 : i32
    return %arg0, %c0_i32, %c0_i32_0 : i32, i32, i32
  }
  func.func @transform_2(%arg0: i32) -> (i32, i32, i32) {
    %c0_i32 = arith.constant 0 : i32
    %c0_i32_0 = arith.constant 0 : i32
    %c0_i32_1 = arith.constant 0 : i32
    %c0_i32_2 = arith.constant 0 : i32
    return %c0_i32, %c0_i32_0, %c0_i32_1 : i32, i32, i32
  }
  func.func @transform_3(%arg0: i32) -> (i32, i32) {
    %c0_i32 = arith.constant 0 : i32
    %c0_i32_0 = arith.constant 0 : i32
    %c0_i32_1 = arith.constant 0 : i32
    return %c0_i32, %c0_i32_0 : i32, i32
  }
  func.func @transform_4(%arg0: i32) -> (i32, i32, i32) {
    %c0_i32 = arith.constant 0 : i32
    %c0_i32_0 = arith.constant 0 : i32
    %c0_i32_1 = arith.constant 0 : i32
    %c0_i32_2 = arith.constant 0 : i32
    return %c0_i32, %c0_i32_0, %c0_i32_1 : i32, i32, i32
  }
  func.func @transform_5(%arg0: i32) -> (i32, i32) {
    %c0_i32 = arith.constant 0 : i32
    %c0_i32_0 = arith.constant 0 : i32
    %c0_i32_1 = arith.constant 0 : i32
    return %c0_i32, %c0_i32_0 : i32, i32
  }
  func.func @transform_6(%arg0: i32) -> (i32, i32) {
    %c0_i32 = arith.constant 0 : i32
    %c0_i32_0 = arith.constant 0 : i32
    %c0_i32_1 = arith.constant 0 : i32
    return %c0_i32, %c0_i32_0 : i32, i32
  }
  func.func @transform_7(%arg0: i32) -> (i32, i32) {
    %c0_i32 = arith.constant 0 : i32
    %c0_i32_0 = arith.constant 0 : i32
    %c0_i32_1 = arith.constant 0 : i32
    return %c0_i32, %c0_i32_0 : i32, i32
  }
  func.func @transform_8(%arg0: i32) -> (i32, i32) {
    %c0_i32 = arith.constant 0 : i32
    %c0_i32_0 = arith.constant 0 : i32
    %c0_i32_1 = arith.constant 0 : i32
    return %c0_i32, %c0_i32_0 : i32, i32
  }
  func.func @transform_9(%arg0: i32) -> (i32, i32) {
    %c0_i32 = arith.constant 0 : i32
    %c0_i32_0 = arith.constant 0 : i32
    %c0_i32_1 = arith.constant 0 : i32
    return %c0_i32, %c0_i32_0 : i32, i32
  }
  func.func @transform_10(%arg0: i32) -> (i32, i32) {
    %c0_i32 = arith.constant 0 : i32
    %c0_i32_0 = arith.constant 0 : i32
    %c0_i32_1 = arith.constant 0 : i32
    return %c0_i32, %c0_i32_0 : i32, i32
  }
  func.func @transform_11(%arg0: i32) -> (i32, i32) {
    %c0_i32 = arith.constant 0 : i32
    %c0_i32_0 = arith.constant 0 : i32
    %c0_i32_1 = arith.constant 0 : i32
    return %c0_i32, %c0_i32_0 : i32, i32
  }
  func.func @transform_12(%arg0: i32) -> (i32, i32) {
    %c0_i32 = arith.constant 0 : i32
    %c0_i32_0 = arith.constant 0 : i32
    %c0_i32_1 = arith.constant 0 : i32
    return %c0_i32, %c0_i32_0 : i32, i32
  }
  func.func @transform_13(%arg0: i32) -> (i32, i32) {
    %c0_i32 = arith.constant 0 : i32
    %c0_i32_0 = arith.constant 0 : i32
    %c0_i32_1 = arith.constant 0 : i32
    return %c0_i32, %c0_i32_0 : i32, i32
  }
  func.func @transform_14(%arg0: i32) -> (i32, i32, i32) {
    %c0_i32 = arith.constant 0 : i32
    %c0_i32_0 = arith.constant 0 : i32
    %c0_i32_1 = arith.constant 0 : i32
    return %arg0, %c0_i32, %c0_i32_0 : i32, i32, i32
  }
}

module attributes {stable_mosaic.version = 11 : i64} {
  func.func @_transnet7_kernel(%arg0: i32, %arg1: memref<1x16x128xbf16, #tpu.memory_space<vmem>>, %arg2: memref<1x1x16xf32, #tpu.memory_space<vmem>>, %arg3: memref<3x128x128xbf16, #tpu.memory_space<vmem>>, %arg4: memref<1x128xf32, #tpu.memory_space<vmem>>, %arg5: memref<3x128x128xbf16, #tpu.memory_space<vmem>>, %arg6: memref<1x128xf32, #tpu.memory_space<vmem>>, %arg7: memref<128x128xbf16, #tpu.memory_space<vmem>>, %arg8: memref<1x128xf32, #tpu.memory_space<vmem>>, %arg9: memref<128x128xbf16, #tpu.memory_space<vmem>>, %arg10: memref<1x128xf32, #tpu.memory_space<vmem>>, %arg11: memref<1x128xf32, #tpu.memory_space<vmem>>, %arg12: memref<1x128xf32, #tpu.memory_space<vmem>>, %arg13: memref<128x128xbf16, #tpu.memory_space<vmem>>, %arg14: memref<1x128xf32, #tpu.memory_space<vmem>>, %arg15: memref<1x1x128xf32, #tpu.memory_space<vmem>>) attributes {dimension_semantics = [#tpu.dimension_semantics<parallel>], iteration_bounds = array<i64: 2>, scalar_prefetch = 0 : i64, scratch_operands = 0 : i64, tpu.core_type = #tpu.core_type<tc>, window_params = [{transform_indices = @transform_0, window_bounds = array<i64: 1, 16, 128>}, {transform_indices = @transform_1, window_bounds = array<i64: 1, 1, 16>}, {pipeline_mode = #tpu.pipeline_mode<synchronous>, transform_indices = @transform_2, window_bounds = array<i64: 3, 128, 128>}, {pipeline_mode = #tpu.pipeline_mode<synchronous>, transform_indices = @transform_3, window_bounds = array<i64: 1, 128>}, {pipeline_mode = #tpu.pipeline_mode<synchronous>, transform_indices = @transform_4, window_bounds = array<i64: 3, 128, 128>}, {pipeline_mode = #tpu.pipeline_mode<synchronous>, transform_indices = @transform_5, window_bounds = array<i64: 1, 128>}, {pipeline_mode = #tpu.pipeline_mode<synchronous>, transform_indices = @transform_6, window_bounds = array<i64: 128, 128>}, {pipeline_mode = #tpu.pipeline_mode<synchronous>, transform_indices = @transform_7, window_bounds = array<i64: 1, 128>}, {pipeline_mode = #tpu.pipeline_mode<synchronous>, transform_indices = @transform_8, window_bounds = array<i64: 128, 128>}, {pipeline_mode = #tpu.pipeline_mode<synchronous>, transform_indices = @transform_9, window_bounds = array<i64: 1, 128>}, {pipeline_mode = #tpu.pipeline_mode<synchronous>, transform_indices = @transform_10, window_bounds = array<i64: 1, 128>}, {pipeline_mode = #tpu.pipeline_mode<synchronous>, transform_indices = @transform_11, window_bounds = array<i64: 1, 128>}, {pipeline_mode = #tpu.pipeline_mode<synchronous>, transform_indices = @transform_12, window_bounds = array<i64: 128, 128>}, {pipeline_mode = #tpu.pipeline_mode<synchronous>, transform_indices = @transform_13, window_bounds = array<i64: 1, 128>}, {transform_indices = @transform_14, window_bounds = array<i64: 1, 1, 128>}]} {
    %0 = tpu.iota {dimensions = array<i32: 1>} : vector<1x16x1xi32>
    %c0_i32 = arith.constant 0 : i32
    %1 = vector.broadcast %c0_i32 : i32 to vector<1x16x1xi32>
    %2 = arith.cmpi ne, %0, %1 : vector<1x16x1xi32>
    %c15_i32 = arith.constant 15 : i32
    %3 = vector.broadcast %c15_i32 : i32 to vector<1x16x1xi32>
    %4 = arith.cmpi ne, %0, %3 : vector<1x16x1xi32>
    %c0 = arith.constant 0 : index
    %c0_0 = arith.constant 0 : index
    %c0_1 = arith.constant 0 : index
    %5 = vector.load %arg1[%c0, %c0_0, %c0_1] : memref<1x16x128xbf16, #tpu.memory_space<vmem>>, vector<1x16x128xbf16>
    %6 = vector.shape_cast %5 : vector<1x16x128xbf16> to vector<16x128xbf16>
    %c1 = arith.constant 1 : index
    %c0_2 = arith.constant 0 : index
    %c0_3 = arith.constant 0 : index
    %7 = vector.load %arg3[%c1, %c0_2, %c0_3] : memref<3x128x128xbf16, #tpu.memory_space<vmem>>, vector<1x128x128xbf16>
    %8 = vector.shape_cast %7 : vector<1x128x128xbf16> to vector<128x128xbf16>
    %cst = arith.constant dense<0.000000e+00> : vector<16x128xf32>
    %9 = tpu.matmul %6, %8, %cst {dimension_numbers = #tpu.dot_dimension_numbers<[1], [0], [0], [1], [0, 0, 1, 1], [], []>} : vector<16x128xbf16>, vector<128x128xbf16>, vector<16x128xf32> -> vector<16x128xf32>
    %10 = vector.shape_cast %9 : vector<16x128xf32> to vector<1x16x128xf32>
    %c0_4 = arith.constant 0 : index
    %c0_5 = arith.constant 0 : index
    %c0_6 = arith.constant 0 : index
    %11 = vector.load %arg3[%c0_4, %c0_5, %c0_6] : memref<3x128x128xbf16, #tpu.memory_space<vmem>>, vector<1x128x128xbf16>
    %12 = vector.shape_cast %11 : vector<1x128x128xbf16> to vector<128x128xbf16>
    %cst_7 = arith.constant dense<0.000000e+00> : vector<16x128xf32>
    %13 = tpu.matmul %6, %12, %cst_7 {dimension_numbers = #tpu.dot_dimension_numbers<[1], [0], [0], [1], [0, 0, 1, 1], [], []>} : vector<16x128xbf16>, vector<128x128xbf16>, vector<16x128xf32> -> vector<16x128xf32>
    %14 = vector.shape_cast %13 : vector<16x128xf32> to vector<1x16x128xf32>
    %c1_i32 = arith.constant 1 : i32
    %15 = tpu.dynamic_rotate %14 by %c1_i32 dim 1 : vector<1x16x128xf32>, i32 -> vector<1x16x128xf32>
    %cst_8 = arith.constant 0.000000e+00 : f32
    %16 = vector.shape_cast %2 : vector<1x16x1xi1> to vector<1x16x1xi1>
    %17 = vector.broadcast %16 : vector<1x16x1xi1> to vector<1x16x128xi1>
    %18 = vector.broadcast %cst_8 : f32 to vector<1x16x128xf32>
    %19 = arith.select %17, %15, %18 : vector<1x16x128xi1>, vector<1x16x128xf32>
    %20 = arith.addf %10, %19 : vector<1x16x128xf32>
    %c2 = arith.constant 2 : index
    %c0_9 = arith.constant 0 : index
    %c0_10 = arith.constant 0 : index
    %21 = vector.load %arg3[%c2, %c0_9, %c0_10] : memref<3x128x128xbf16, #tpu.memory_space<vmem>>, vector<1x128x128xbf16>
    %22 = vector.shape_cast %21 : vector<1x128x128xbf16> to vector<128x128xbf16>
    %cst_11 = arith.constant dense<0.000000e+00> : vector<16x128xf32>
    %23 = tpu.matmul %6, %22, %cst_11 {dimension_numbers = #tpu.dot_dimension_numbers<[1], [0], [0], [1], [0, 0, 1, 1], [], []>} : vector<16x128xbf16>, vector<128x128xbf16>, vector<16x128xf32> -> vector<16x128xf32>
    %24 = vector.shape_cast %23 : vector<16x128xf32> to vector<1x16x128xf32>
    %c15_i32_12 = arith.constant 15 : i32
    %25 = tpu.dynamic_rotate %24 by %c15_i32_12 dim 1 : vector<1x16x128xf32>, i32 -> vector<1x16x128xf32>
    %cst_13 = arith.constant 0.000000e+00 : f32
    %26 = vector.shape_cast %4 : vector<1x16x1xi1> to vector<1x16x1xi1>
    %27 = vector.broadcast %26 : vector<1x16x1xi1> to vector<1x16x128xi1>
    %28 = vector.broadcast %cst_13 : f32 to vector<1x16x128xf32>
    %29 = arith.select %27, %25, %28 : vector<1x16x128xi1>, vector<1x16x128xf32>
    %30 = arith.addf %20, %29 : vector<1x16x128xf32>
    %c0_14 = arith.constant 0 : index
    %c0_15 = arith.constant 0 : index
    %31 = vector.load %arg4[%c0_14, %c0_15] : memref<1x128xf32, #tpu.memory_space<vmem>>, vector<1x128xf32>
    %32 = vector.shape_cast %31 : vector<1x128xf32> to vector<1x1x128xf32>
    %33 = vector.broadcast %32 : vector<1x1x128xf32> to vector<1x16x128xf32>
    %34 = arith.addf %30, %33 : vector<1x16x128xf32>
    %cst_16 = arith.constant 0.000000e+00 : f32
    %35 = vector.broadcast %cst_16 : f32 to vector<1x16x128xf32>
    %36 = arith.maximumf %34, %35 : vector<1x16x128xf32>
    %37 = arith.truncf %36 : vector<1x16x128xf32> to vector<1x16x128xbf16>
    %38 = vector.shape_cast %37 : vector<1x16x128xbf16> to vector<16x128xbf16>
    %c1_17 = arith.constant 1 : index
    %c0_18 = arith.constant 0 : index
    %c0_19 = arith.constant 0 : index
    %39 = vector.load %arg5[%c1_17, %c0_18, %c0_19] : memref<3x128x128xbf16, #tpu.memory_space<vmem>>, vector<1x128x128xbf16>
    %40 = vector.shape_cast %39 : vector<1x128x128xbf16> to vector<128x128xbf16>
    %cst_20 = arith.constant dense<0.000000e+00> : vector<16x128xf32>
    %41 = tpu.matmul %38, %40, %cst_20 {dimension_numbers = #tpu.dot_dimension_numbers<[1], [0], [0], [1], [0, 0, 1, 1], [], []>} : vector<16x128xbf16>, vector<128x128xbf16>, vector<16x128xf32> -> vector<16x128xf32>
    %42 = vector.shape_cast %41 : vector<16x128xf32> to vector<1x16x128xf32>
    %c0_21 = arith.constant 0 : index
    %c0_22 = arith.constant 0 : index
    %c0_23 = arith.constant 0 : index
    %43 = vector.load %arg5[%c0_21, %c0_22, %c0_23] : memref<3x128x128xbf16, #tpu.memory_space<vmem>>, vector<1x128x128xbf16>
    %44 = vector.shape_cast %43 : vector<1x128x128xbf16> to vector<128x128xbf16>
    %cst_24 = arith.constant dense<0.000000e+00> : vector<16x128xf32>
    %45 = tpu.matmul %38, %44, %cst_24 {dimension_numbers = #tpu.dot_dimension_numbers<[1], [0], [0], [1], [0, 0, 1, 1], [], []>} : vector<16x128xbf16>, vector<128x128xbf16>, vector<16x128xf32> -> vector<16x128xf32>
    %46 = vector.shape_cast %45 : vector<16x128xf32> to vector<1x16x128xf32>
    %c1_i32_25 = arith.constant 1 : i32
    %47 = tpu.dynamic_rotate %46 by %c1_i32_25 dim 1 : vector<1x16x128xf32>, i32 -> vector<1x16x128xf32>
    %cst_26 = arith.constant 0.000000e+00 : f32
    %48 = vector.shape_cast %2 : vector<1x16x1xi1> to vector<1x16x1xi1>
    %49 = vector.broadcast %48 : vector<1x16x1xi1> to vector<1x16x128xi1>
    %50 = vector.broadcast %cst_26 : f32 to vector<1x16x128xf32>
    %51 = arith.select %49, %47, %50 : vector<1x16x128xi1>, vector<1x16x128xf32>
    %52 = arith.addf %42, %51 : vector<1x16x128xf32>
    %c2_27 = arith.constant 2 : index
    %c0_28 = arith.constant 0 : index
    %c0_29 = arith.constant 0 : index
    %53 = vector.load %arg5[%c2_27, %c0_28, %c0_29] : memref<3x128x128xbf16, #tpu.memory_space<vmem>>, vector<1x128x128xbf16>
    %54 = vector.shape_cast %53 : vector<1x128x128xbf16> to vector<128x128xbf16>
    %cst_30 = arith.constant dense<0.000000e+00> : vector<16x128xf32>
    %55 = tpu.matmul %38, %54, %cst_30 {dimension_numbers = #tpu.dot_dimension_numbers<[1], [0], [0], [1], [0, 0, 1, 1], [], []>} : vector<16x128xbf16>, vector<128x128xbf16>, vector<16x128xf32> -> vector<16x128xf32>
    %56 = vector.shape_cast %55 : vector<16x128xf32> to vector<1x16x128xf32>
    %c15_i32_31 = arith.constant 15 : i32
    %57 = tpu.dynamic_rotate %56 by %c15_i32_31 dim 1 : vector<1x16x128xf32>, i32 -> vector<1x16x128xf32>
    %cst_32 = arith.constant 0.000000e+00 : f32
    %58 = vector.shape_cast %4 : vector<1x16x1xi1> to vector<1x16x1xi1>
    %59 = vector.broadcast %58 : vector<1x16x1xi1> to vector<1x16x128xi1>
    %60 = vector.broadcast %cst_32 : f32 to vector<1x16x128xf32>
    %61 = arith.select %59, %57, %60 : vector<1x16x128xi1>, vector<1x16x128xf32>
    %62 = arith.addf %52, %61 : vector<1x16x128xf32>
    %c0_33 = arith.constant 0 : index
    %c0_34 = arith.constant 0 : index
    %63 = vector.load %arg6[%c0_33, %c0_34] : memref<1x128xf32, #tpu.memory_space<vmem>>, vector<1x128xf32>
    %64 = vector.shape_cast %63 : vector<1x128xf32> to vector<1x1x128xf32>
    %65 = vector.broadcast %64 : vector<1x1x128xf32> to vector<1x16x128xf32>
    %66 = arith.addf %62, %65 : vector<1x16x128xf32>
    %cst_35 = arith.constant 0.000000e+00 : f32
    %67 = vector.broadcast %cst_35 : f32 to vector<1x16x128xf32>
    %68 = arith.maximumf %66, %67 : vector<1x16x128xf32>
    %69 = arith.truncf %68 : vector<1x16x128xf32> to vector<1x16x128xbf16>
    %c0_36 = arith.constant 0 : index
    %c0_37 = arith.constant 0 : index
    %c0_38 = arith.constant 0 : index
    %70 = vector.load %arg2[%c0_36, %c0_37, %c0_38] : memref<1x1x16xf32, #tpu.memory_space<vmem>>, vector<1x1x16xf32>
    %71 = vector.shape_cast %70 : vector<1x1x16xf32> to vector<1x16xf32>
    %cst_39 = arith.constant dense<0.000000e+00> : vector<1xf32>
    %72 = vector.multi_reduction <add>, %71, %cst_39 [1] : vector<1x16xf32> to vector<1xf32>
    %73 = vector.shape_cast %72 : vector<1xf32> to vector<1x1xf32>
    %cst_40 = arith.constant 9.99999971E-10 : f32
    %74 = vector.broadcast %cst_40 : f32 to vector<1x1xf32>
    %75 = arith.maximumf %73, %74 : vector<1x1xf32>
    %76 = tpu.iota {dimensions = array<i32: 1>} : vector<1x16xi32>
    %77 = tpu.iota {dimensions = array<i32: 0>} : vector<1x16xi32>
    %c16_i32 = arith.constant 16 : i32
    %78 = vector.broadcast %c16_i32 : i32 to vector<1x16xi32>
    %79 = arith.muli %77, %78 : vector<1x16xi32>
    %80 = arith.cmpi sge, %76, %79 : vector<1x16xi32>
    %c16_i32_41 = arith.constant 16 : i32
    %81 = vector.broadcast %c16_i32_41 : i32 to vector<1x16xi32>
    %82 = arith.addi %79, %81 : vector<1x16xi32>
    %83 = arith.cmpi slt, %76, %82 : vector<1x16xi32>
    %84 = arith.andi %80, %83 : vector<1x16xi1>
    %cst_42 = arith.constant 0.000000e+00 : f32
    %85 = vector.broadcast %cst_42 : f32 to vector<1x16xf32>
    %86 = arith.select %84, %71, %85 : vector<1x16xi1>, vector<1x16xf32>
    %87 = arith.truncf %86 : vector<1x16xf32> to vector<1x16xbf16>
    %88 = vector.shape_cast %69 : vector<1x16x128xbf16> to vector<16x128xbf16>
    %cst_43 = arith.constant dense<0.000000e+00> : vector<1x128xf32>
    %89 = tpu.matmul %87, %88, %cst_43 {dimension_numbers = #tpu.dot_dimension_numbers<[1], [0], [0], [1], [0, 0, 1, 1], [], []>} : vector<1x16xbf16>, vector<16x128xbf16>, vector<1x128xf32> -> vector<1x128xf32>
    %90 = tpu.reciprocal %75 {approx = true} : vector<1x1xf32> -> vector<1x1xf32>
    %91 = vector.broadcast %90 : vector<1x1xf32> to vector<1x128xf32>
    %92 = arith.mulf %89, %91 : vector<1x128xf32>
    %93 = arith.truncf %92 : vector<1x128xf32> to vector<1x128xbf16>
    %c0_44 = arith.constant 0 : index
    %c0_45 = arith.constant 0 : index
    %94 = vector.load %arg7[%c0_44, %c0_45] : memref<128x128xbf16, #tpu.memory_space<vmem>>, vector<128x128xbf16>
    %cst_46 = arith.constant dense<0.000000e+00> : vector<1x128xf32>
    %95 = tpu.matmul %93, %94, %cst_46 {dimension_numbers = #tpu.dot_dimension_numbers<[1], [0], [0], [1], [0, 0, 1, 1], [], []>} : vector<1x128xbf16>, vector<128x128xbf16>, vector<1x128xf32> -> vector<1x128xf32>
    %c0_47 = arith.constant 0 : index
    %c0_48 = arith.constant 0 : index
    %96 = vector.load %arg8[%c0_47, %c0_48] : memref<1x128xf32, #tpu.memory_space<vmem>>, vector<1x128xf32>
    %97 = arith.addf %95, %96 : vector<1x128xf32>
    %cst_49 = arith.constant 5.000000e-01 : f32
    %98 = vector.broadcast %cst_49 : f32 to vector<1x128xf32>
    %99 = arith.mulf %98, %97 : vector<1x128xf32>
    %cst_50 = arith.constant 4.471500e-02 : f32
    %100 = vector.broadcast %cst_50 : f32 to vector<1x128xf32>
    %101 = arith.mulf %100, %97 : vector<1x128xf32>
    %102 = arith.mulf %101, %97 : vector<1x128xf32>
    %103 = arith.mulf %102, %97 : vector<1x128xf32>
    %104 = arith.addf %97, %103 : vector<1x128xf32>
    %cst_51 = arith.constant 0.797884583 : f32
    %105 = vector.broadcast %cst_51 : f32 to vector<1x128xf32>
    %106 = arith.mulf %105, %104 : vector<1x128xf32>
    %107 = math.tanh %106 : vector<1x128xf32>
    %cst_52 = arith.constant 1.000000e+00 : f32
    %108 = vector.broadcast %cst_52 : f32 to vector<1x128xf32>
    %109 = arith.addf %108, %107 : vector<1x128xf32>
    %110 = arith.mulf %99, %109 : vector<1x128xf32>
    %111 = arith.truncf %110 : vector<1x128xf32> to vector<1x128xbf16>
    %c0_53 = arith.constant 0 : index
    %c0_54 = arith.constant 0 : index
    %112 = vector.load %arg9[%c0_53, %c0_54] : memref<128x128xbf16, #tpu.memory_space<vmem>>, vector<128x128xbf16>
    %cst_55 = arith.constant dense<0.000000e+00> : vector<1x128xf32>
    %113 = tpu.matmul %111, %112, %cst_55 {dimension_numbers = #tpu.dot_dimension_numbers<[1], [0], [0], [1], [0, 0, 1, 1], [], []>} : vector<1x128xbf16>, vector<128x128xbf16>, vector<1x128xf32> -> vector<1x128xf32>
    %c0_56 = arith.constant 0 : index
    %c0_57 = arith.constant 0 : index
    %114 = vector.load %arg10[%c0_56, %c0_57] : memref<1x128xf32, #tpu.memory_space<vmem>>, vector<1x128xf32>
    %115 = arith.addf %113, %114 : vector<1x128xf32>
    %116 = arith.addf %115, %97 : vector<1x128xf32>
    %cst_58 = arith.constant dense<0.000000e+00> : vector<1xf32>
    %117 = vector.multi_reduction <add>, %116, %cst_58 [1] : vector<1x128xf32> to vector<1xf32>
    %118 = vector.shape_cast %117 : vector<1xf32> to vector<1x1xf32>
    %cst_59 = arith.constant 1.280000e+02 : f32
    %119 = vector.broadcast %cst_59 : f32 to vector<1x1xf32>
    %120 = arith.divf %118, %119 : vector<1x1xf32>
    %121 = vector.broadcast %120 : vector<1x1xf32> to vector<1x128xf32>
    %122 = arith.subf %116, %121 : vector<1x128xf32>
    %123 = arith.mulf %122, %122 : vector<1x128xf32>
    %cst_60 = arith.constant dense<0.000000e+00> : vector<1xf32>
    %124 = vector.multi_reduction <add>, %123, %cst_60 [1] : vector<1x128xf32> to vector<1xf32>
    %125 = vector.shape_cast %124 : vector<1xf32> to vector<1x1xf32>
    %cst_61 = arith.constant 1.280000e+02 : f32
    %126 = vector.broadcast %cst_61 : f32 to vector<1x1xf32>
    %127 = arith.divf %125, %126 : vector<1x1xf32>
    %128 = vector.broadcast %120 : vector<1x1xf32> to vector<1x128xf32>
    %129 = arith.subf %116, %128 : vector<1x128xf32>
    %cst_62 = arith.constant 9.99999974E-6 : f32
    %130 = vector.broadcast %cst_62 : f32 to vector<1x1xf32>
    %131 = arith.addf %127, %130 : vector<1x1xf32>
    %132 = math.rsqrt %131 : vector<1x1xf32>
    %133 = vector.broadcast %132 : vector<1x1xf32> to vector<1x128xf32>
    %134 = arith.mulf %129, %133 : vector<1x128xf32>
    %c0_63 = arith.constant 0 : index
    %c0_64 = arith.constant 0 : index
    %135 = vector.load %arg11[%c0_63, %c0_64] : memref<1x128xf32, #tpu.memory_space<vmem>>, vector<1x128xf32>
    %136 = arith.mulf %134, %135 : vector<1x128xf32>
    %c0_65 = arith.constant 0 : index
    %c0_66 = arith.constant 0 : index
    %137 = vector.load %arg12[%c0_65, %c0_66] : memref<1x128xf32, #tpu.memory_space<vmem>>, vector<1x128xf32>
    %138 = arith.addf %136, %137 : vector<1x128xf32>
    %139 = arith.truncf %138 : vector<1x128xf32> to vector<1x128xbf16>
    %c0_67 = arith.constant 0 : index
    %c0_68 = arith.constant 0 : index
    %140 = vector.load %arg13[%c0_67, %c0_68] : memref<128x128xbf16, #tpu.memory_space<vmem>>, vector<128x128xbf16>
    %cst_69 = arith.constant dense<0.000000e+00> : vector<1x128xf32>
    %141 = tpu.matmul %139, %140, %cst_69 {dimension_numbers = #tpu.dot_dimension_numbers<[1], [0], [0], [1], [0, 0, 1, 1], [], []>} : vector<1x128xbf16>, vector<128x128xbf16>, vector<1x128xf32> -> vector<1x128xf32>
    %c0_70 = arith.constant 0 : index
    %c0_71 = arith.constant 0 : index
    %142 = vector.load %arg14[%c0_70, %c0_71] : memref<1x128xf32, #tpu.memory_space<vmem>>, vector<1x128xf32>
    %143 = arith.addf %141, %142 : vector<1x128xf32>
    %144 = vector.shape_cast %143 : vector<1x128xf32> to vector<1x1x128xf32>
    %c0_72 = arith.constant 0 : index
    %c0_73 = arith.constant 0 : index
    %c0_74 = arith.constant 0 : index
    %145 = vector.load %arg15[%c0_72, %c0_73, %c0_74] : memref<1x1x128xf32, #tpu.memory_space<vmem>>, vector<1x1x128xf32>
    tpu.vector_store %arg15[%c0_72, %c0_73, %c0_74], %144 {strides = array<i32>} : memref<1x1x128xf32, #tpu.memory_space<vmem>>, vector<1x1x128xf32>,
    return
  }
  func.func @transform_0(%arg0: i32) -> (i32, i32, i32) {
    %c0_i32 = arith.constant 0 : i32
    %c0_i32_0 = arith.constant 0 : i32
    %c0_i32_1 = arith.constant 0 : i32
    return %arg0, %c0_i32, %c0_i32_0 : i32, i32, i32
  }
  func.func @transform_1(%arg0: i32) -> (i32, i32, i32) {
    %c0_i32 = arith.constant 0 : i32
    %c0_i32_0 = arith.constant 0 : i32
    %c0_i32_1 = arith.constant 0 : i32
    return %arg0, %c0_i32, %c0_i32_0 : i32, i32, i32
  }
  func.func @transform_2(%arg0: i32) -> (i32, i32, i32) {
    %c0_i32 = arith.constant 0 : i32
    %c0_i32_0 = arith.constant 0 : i32
    %c0_i32_1 = arith.constant 0 : i32
    %c0_i32_2 = arith.constant 0 : i32
    return %c0_i32, %c0_i32_0, %c0_i32_1 : i32, i32, i32
  }
  func.func @transform_3(%arg0: i32) -> (i32, i32) {
    %c0_i32 = arith.constant 0 : i32
    %c0_i32_0 = arith.constant 0 : i32
    %c0_i32_1 = arith.constant 0 : i32
    return %c0_i32, %c0_i32_0 : i32, i32
  }
  func.func @transform_4(%arg0: i32) -> (i32, i32, i32) {
    %c0_i32 = arith.constant 0 : i32
    %c0_i32_0 = arith.constant 0 : i32
    %c0_i32_1 = arith.constant 0 : i32
    %c0_i32_2 = arith.constant 0 : i32
    return %c0_i32, %c0_i32_0, %c0_i32_1 : i32, i32, i32
  }
  func.func @transform_5(%arg0: i32) -> (i32, i32) {
    %c0_i32 = arith.constant 0 : i32
    %c0_i32_0 = arith.constant 0 : i32
    %c0_i32_1 = arith.constant 0 : i32
    return %c0_i32, %c0_i32_0 : i32, i32
  }
  func.func @transform_6(%arg0: i32) -> (i32, i32) {
    %c0_i32 = arith.constant 0 : i32
    %c0_i32_0 = arith.constant 0 : i32
    %c0_i32_1 = arith.constant 0 : i32
    return %c0_i32, %c0_i32_0 : i32, i32
  }
  func.func @transform_7(%arg0: i32) -> (i32, i32) {
    %c0_i32 = arith.constant 0 : i32
    %c0_i32_0 = arith.constant 0 : i32
    %c0_i32_1 = arith.constant 0 : i32
    return %c0_i32, %c0_i32_0 : i32, i32
  }
  func.func @transform_8(%arg0: i32) -> (i32, i32) {
    %c0_i32 = arith.constant 0 : i32
    %c0_i32_0 = arith.constant 0 : i32
    %c0_i32_1 = arith.constant 0 : i32
    return %c0_i32, %c0_i32_0 : i32, i32
  }
  func.func @transform_9(%arg0: i32) -> (i32, i32) {
    %c0_i32 = arith.constant 0 : i32
    %c0_i32_0 = arith.constant 0 : i32
    %c0_i32_1 = arith.constant 0 : i32
    return %c0_i32, %c0_i32_0 : i32, i32
  }
  func.func @transform_10(%arg0: i32) -> (i32, i32) {
    %c0_i32 = arith.constant 0 : i32
    %c0_i32_0 = arith.constant 0 : i32
    %c0_i32_1 = arith.constant 0 : i32
    return %c0_i32, %c0_i32_0 : i32, i32
  }
  func.func @transform_11(%arg0: i32) -> (i32, i32) {
    %c0_i32 = arith.constant 0 : i32
    %c0_i32_0 = arith.constant 0 : i32
    %c0_i32_1 = arith.constant 0 : i32
    return %c0_i32, %c0_i32_0 : i32, i32
  }
  func.func @transform_12(%arg0: i32) -> (i32, i32) {
    %c0_i32 = arith.constant 0 : i32
    %c0_i32_0 = arith.constant 0 : i32
    %c0_i32_1 = arith.constant 0 : i32
    return %c0_i32, %c0_i32_0 : i32, i32
  }
  func.func @transform_13(%arg0: i32) -> (i32, i32) {
    %c0_i32 = arith.constant 0 : i32
    %c0_i32_0 = arith.constant 0 : i32
    %c0_i32_1 = arith.constant 0 : i32
    return %c0_i32, %c0_i32_0 : i32, i32
  }
  func.func @transform_14(%arg0: i32) -> (i32, i32, i32) {
    %c0_i32 = arith.constant 0 : i32
    %c0_i32_0 = arith.constant 0 : i32
    %c0_i32_1 = arith.constant 0 : i32
    return %arg0, %c0_i32, %c0_i32_0 : i32, i32, i32
  }
}

</mosaic_0001>

<bundles_post_ra>
// kernel: tpu_custom_call.1
= control target key start
LH: loop header
LB: loop body
LE: loop exit
PB: predicated region body
PF: predicated region fallthrough
CT: control target
= control target key end

     0   :  { %s3192_s0 = inlined_call_operand.hbm [shape: bf16[2,16,128], index: 0, kind: input, shape index: {}]   ;;  %s3193_s1 = inlined_call_operand.vmem [shape: f32[2,1,16], index: 1, kind: input, shape index: {}]   ;;  %s3194_s2 = inlined_call_operand.hbm [shape: bf16[3,128,128], index: 2, kind: input, shape index: {}]   ;;  %s3195_s3 = inlined_call_operand.vmem [shape: f32[1,128], index: 3, kind: input, shape index: {}]   ;;  %s3196_s4 = inlined_call_operand.hbm [shape: bf16[3,128,128], index: 4, kind: input, shape index: {}]   ;;  %s3197_s5 = inlined_call_operand.vmem [shape: f32[1,128], index: 5, kind: input, shape index: {}]   ;;  %s3198_s6 = inlined_call_operand.hbm [shape: bf16[128,128], index: 6, kind: input, shape index: {}]   ;;  %s3199_s7 = inlined_call_operand.vmem [shape: f32[1,128], index: 7, kind: input, shape index: {}]   ;;  %s3200_s8 = inlined_call_operand.hbm [shape: bf16[128,128], index: 8, kind: input, shape index: {}]   ;;  %s3201_s9 = inlined_call_operand.vmem [shape: f32[1,128], index: 9, kind: input, shape index: {}]   ;;  %s3202_s10 = inlined_call_operand.vmem [shape: f32[1,128], index: 10, kind: input, shape index: {}]   ;;  %s3203_s11 = inlined_call_operand.vmem [shape: f32[1,128], index: 11, kind: input, shape index: {}]   ;;  %s3204_s12 = inlined_call_operand.hbm [shape: bf16[128,128], index: 12, kind: input, shape index: {}]   ;;  %s3205_s13 = inlined_call_operand.vmem [shape: f32[1,128], index: 13, kind: input, shape index: {}]   ;;  %s3206_s14 = inlined_call_operand.hbm [shape: f32[2,1,128], index: 14, kind: output, shape index: {}]  }
   0x1   :  { %3212 = sst [smem:[#allocation19_spill]] %s3194_s2 }
   0x2   :  { %3213 = sst [smem:[#allocation20_spill]] %s3199_s7 }
   0x3   :  { %3214 = sst [smem:[#allocation21_spill]] %s3201_s9 }
   0x4   :  { %3215 = sst [smem:[#allocation22_spill]] %s3202_s10 }
   0x5   :  { %3216 = sst [smem:[#allocation23_spill]] %s3203_s11 }
   0x6   :  { %3217 = sst [smem:[#allocation24_spill]] %s3205_s13 }
   0x7   :  { %3218 = sst [smem:[#allocation25_spill]] %s3206_s14 }
   0x8   :  { %19 = vsyncpa [#allocation3], 0 }
   0x9   :  { %21 = vsyncpa [#allocation3 + $0x1], 0 }
   0xa   :  { %22 = vsyncpa [#allocation6], 0 }
   0xb   :  { %23 = vsyncpa [#allocation9], 0 }
   0xc   :  { %24 = vsyncpa [#allocation12], 0 }
   0xd   :  { %25 = vsyncpa [#allocation4], 0 }
   0xe   :  { %27 = vsyncpa [#allocation4 + $0x1], 0  ;;  %s2716_s29 = smov 0   ;;  %s2718_s30 = smov 0  }
   0xf   :  { %s2720_s15 = smov 0   ;;  %s2722_s16 = smov 0  }
  0x10 LB: > { %s2630_s17 = smov [#allocation5]   ;;  %s2737_s19 = sadd.s32 4294967295, %s2628_s16   ;;  %s2628_s16 = sphi %s2722_s16, %s3248_s16   ;;  %s2624_s15 = sphi %s2720_s15, %s3247_s15   ;;  %s2620_s30 = sphi %s2718_s30, %s3246_s30   ;;  %s2616_s29 = sphi %s2716_s29, %s3245_s29  }
  0x11   : > { %s380_s18 = sshll.u32 %s2630_s17, 4  ;;  %p1834_p0 = scmp.ge.s32.totalorder %s2628_s16, 1  ;;  %s2742_s18 = int_to_ptr.vmem [resolvable:$true] %s380_s18 }
  0x12   : > { %p3208_p1 = scmp.eq.s32.totalorder %s2737_s19, 0  ;;  %p368_p2 = scmp.lt.s32.totalorder %s2628_s16, 3 }
  0x13   : > { %s2631_s21 = smov [#allocation8]   ;;  %s2632_s24 = smov [#allocation7]  }
  0x14   : > { %p2744_p3 = pnand %p1834_p0, %p368_p2  ;;  %s412_s22 = sshll.u32 %s2631_s21, 4  ;;  %s2757_s22 = int_to_ptr.vmem [resolvable:$true] %s412_s22 }
  0x15   : > { %s396_s25 = sshll.u32 %s2632_s24, 4  ;;  %s3221_s2 = sld [smem:[#allocation19_spill]]  ;;  %s2759_s25 = int_to_ptr.vmem [resolvable:$true] %s396_s25 }
  0x16   : > { %s3219_s20 = scalar_select %p2744_p3, 1, 0 }
  0x17   : > { %p2224_p5 = pneg %p2744_p3 }
  0x19   : > { %p2753_p6 = pnand %p2224_p5, %p3208_p1 }
  0x1b   : > { %s2380_s28 = scalar_lea.hbm %s3221_s2, 3072  ;;  %p2769_p8 = pneg %p2753_p6 }
  0x1c   : > { %p2381_p7 = scmp.ne.s32.totalorder %s3221_s2, %s2380_s28  ;;  %p2387_p11 = scmp.lt.u32.totalorder %s2380_s28, %s3221_s2 }
  0x1e   : > { %p2383_p9 = pnand %p2769_p8, %p2381_p7 }
  0x20   : > { %p2384_p10 = pneg %p2383_p9 }
  0x22   : > { %p2389_p12 = pnand %p2387_p11, %p2384_p10 }
  0x24   : > { %2392 = shalt.err (!%p2389_p12)
}
  0x25   : > { %s2393_s14 = scalar_lea.vmem %s2742_s18, 3072  ;;  %p2401_p5 = scmp.lt.s32.totalorder %s2742_s18, %s2742_s18 }
  0x26   : > { %p2394_p13 = scmp.ne.s32.totalorder %s2742_s18, %s2393_s14  ;;  %p2402_p4 = scmp.lt.s32.totalorder %s2393_s14, %s2393_s14 }
  0x28   : > { %p2396_p0 = pnand %p2394_p13, %p2769_p8  ;;  %p2403_p7 = por %p2402_p4, %p2401_p5 }
  0x2a   : > { %p2397_p2 = pneg %p2396_p0 }
  0x2c   : > { %p2404_p9 = pnand %p2403_p7, %p2397_p2 }
  0x2e   : > { %2407 = shalt.err (!%p2404_p9)
}
  0x2f   : > { %s3210_s26 = smov 64   ;;  %s2634_s13 = smov 4  }
  0x30   : > { %2227 = dma.hbm_to_vmem [thread:$0]  (!%p2753_p6), %s3221_s2, 3072, %s2742_s18, [#allocation6], %s3210_s26, %s3210_s26, %s2634_s13  }
  0x31   : > { %s2408_s14 = scalar_lea.hbm %s3198_s6, 1024 }
  0x32   : > { %p2409_p4 = scmp.ne.s32.totalorder %s3198_s6, %s2408_s14  ;;  %p2415_p12 = scmp.lt.u32.totalorder %s2408_s14, %s3198_s6 }
  0x34   : > { %p2411_p10 = pnand %p2409_p4, %p2769_p8 }
  0x36   : > { %p2412_p11 = pneg %p2411_p10 }
  0x38   : > { %p2417_p13 = pnand %p2415_p12, %p2412_p11 }
  0x3a   : > { %2420 = shalt.err (!%p2417_p13)
}
  0x3b   : > { %s2421_s18 = scalar_lea.vmem %s2757_s22, 1024  ;;  %p2429_p7 = scmp.lt.s32.totalorder %s2757_s22, %s2757_s22 }
  0x3c   : > { %p2422_p0 = scmp.ne.s32.totalorder %s2757_s22, %s2421_s18  ;;  %p2430_p9 = scmp.lt.s32.totalorder %s2421_s18, %s2421_s18 }
  0x3e   : > { %p2424_p2 = pnand %p2422_p0, %p2769_p8  ;;  %p2431_p4 = por %p2430_p9, %p2429_p7 }
  0x40   : > { %p2425_p5 = pneg %p2424_p2 }
  0x42   : > { %p2432_p10 = pnand %p2431_p4, %p2425_p5 }
  0x44   : > { %2435 = shalt.err (!%p2432_p10)
}
  0x45   : > { %2233 = dma.hbm_to_vmem [thread:$0]  (!%p2753_p6), %s3198_s6, 1024, %s2757_s22, [#allocation9], %s3210_s26, %s3210_s26, %s2634_s13  }
  0x46   : > { %s2436_s27 = scalar_lea.hbm %s3196_s4, 3072 }
  0x47   : > { %p2437_p11 = scmp.ne.s32.totalorder %s3196_s4, %s2436_s27  ;;  %p2443_p0 = scmp.lt.u32.totalorder %s2436_s27, %s3196_s4 }
  0x49   : > { %p2439_p12 = pnand %p2437_p11, %p2769_p8 }
  0x4b   : > { %p2440_p13 = pneg %p2439_p12 }
  0x4d   : > { %p2445_p2 = pnand %p2443_p0, %p2440_p13 }
  0x4f   : > { %2448 = shalt.err (!%p2445_p2)
}
  0x50   : > { %s2449_s22 = scalar_lea.vmem %s2759_s25, 3072  ;;  %p2457_p4 = scmp.lt.s32.totalorder %s2759_s25, %s2759_s25 }
  0x51   : > { %p2450_p5 = scmp.ne.s32.totalorder %s2759_s25, %s2449_s22  ;;  %p2458_p10 = scmp.lt.s32.totalorder %s2449_s22, %s2449_s22 }
  0x53   : > { %p2452_p7 = pnand %p2450_p5, %p2769_p8  ;;  %p2459_p11 = por %p2458_p10, %p2457_p4 }
  0x55   : > { %p2453_p9 = pneg %p2452_p7 }
  0x57   : > { %p2460_p12 = pnand %p2459_p11, %p2453_p9 }
  0x59   : > { %2463 = shalt.err (!%p2460_p12)
}
  0x5a   : > { %2230 = dma.hbm_to_vmem [thread:$0]  (!%p2753_p6), %s3196_s4, 3072, %s2759_s25, [#allocation6], %s3210_s26, %s3210_s26, %s2634_s13  }
  0x5b   : > { %s2635_s9 = smov [#allocation10]   ;;  %s2636_s11 = smov [#allocation11]  }
  0x5c   : > { %s428_s10 = sshll.u32 %s2635_s9, 4  ;;  %s450_s27 = sshll.u32 %s2636_s11, 4  ;;  %s429_s10 = int_to_ptr.vmem [resolvable:$true] %s428_s10  ;;  %s451_s27 = int_to_ptr.vmem [resolvable:$true] %s450_s27 }
  0x5d   : > { %s2464_s24 = scalar_lea.hbm %s3200_s8, 1024 }
  0x5e   : > { %p2465_p13 = scmp.ne.s32.totalorder %s3200_s8, %s2464_s24  ;;  %p2471_p5 = scmp.lt.u32.totalorder %s2464_s24, %s3200_s8 }
  0x60   : > { %p2467_p0 = pnand %p2465_p13, %p2769_p8 }
  0x62   : > { %p2468_p2 = pneg %p2467_p0 }
  0x64   : > { %p2473_p7 = pnand %p2471_p5, %p2468_p2 }
  0x66   : > { %2476 = shalt.err (!%p2473_p7)
}
  0x67   : > { %s2477_s25 = scalar_lea.vmem %s429_s10, 1024  ;;  %p2485_p11 = scmp.lt.s32.totalorder %s429_s10, %s429_s10 }
  0x68   : > { %p2478_p9 = scmp.ne.s32.totalorder %s429_s10, %s2477_s25  ;;  %p2486_p12 = scmp.lt.s32.totalorder %s2477_s25, %s2477_s25 }
  0x6a   : > { %p2480_p4 = pnand %p2478_p9, %p2769_p8  ;;  %p2487_p1 = por %p2486_p12, %p2485_p11 }
  0x6c   : > { %p2481_p10 = pneg %p2480_p4 }
  0x6e   : > { %p2488_p3 = pnand %p2487_p1, %p2481_p10 }
  0x70   : > { %2491 = shalt.err (!%p2488_p3)
}
  0x71   : > { %2236 = dma.hbm_to_vmem [thread:$0]  (!%p2753_p6), %s3200_s8, 1024, %s429_s10, [#allocation9], %s3210_s26, %s3210_s26, %s2634_s13  }
  0x72   : > { %s2492_s28 = scalar_lea.hbm %s3204_s12, 1024 }
  0x73   : > { %p2493_p1 = scmp.ne.s32.totalorder %s3204_s12, %s2492_s28  ;;  %p2499_p0 = scmp.lt.u32.totalorder %s2492_s28, %s3204_s12 }
  0x75   : > { %p2495_p3 = pnand %p2493_p1, %p2769_p8 }
  0x77   : > { %p2496_p13 = pneg %p2495_p3 }
  0x79   : > { %p2501_p2 = pnand %p2499_p0, %p2496_p13 }
  0x7b   : > { %2504 = shalt.err (!%p2501_p2)
}
  0x7c   : > { %s2505_s18 = scalar_lea.vmem %s451_s27, 1024  ;;  %p2513_p4 = scmp.lt.s32.totalorder %s451_s27, %s451_s27 }
  0x7d   : > { %p2506_p5 = scmp.ne.s32.totalorder %s451_s27, %s2505_s18  ;;  %p2514_p10 = scmp.lt.s32.totalorder %s2505_s18, %s2505_s18 }
  0x7f   : > { %p2508_p7 = pnand %p2506_p5, %p2769_p8  ;;  %p2515_p11 = por %p2514_p10, %p2513_p4 }
  0x81   : > { %p2509_p9 = pneg %p2508_p7 }
  0x83   : > { %p2516_p12 = pnand %p2515_p11, %p2509_p9 }
  0x85   : > { %2519 = shalt.err (!%p2516_p12)
}
  0x86   : > { %2239 = dma.hbm_to_vmem [thread:$0]  (!%p2753_p6), %s3204_s12, 1024, %s451_s27, [#allocation12], %s3210_s26, %s3210_s26, %s2634_s13  }
  0x87   : > { %s1833_s23 = sadd.s32 4294967294, %s2628_s16   ;;  %s2889_s21 = sadd.s32 1, %s2628_s16  }
  0x88   : > { %s40_s2 = sadd.s32 1, %s2624_s15  ;;  %s37_s7 = ssub.s32 %s2628_s16, %s2889_s21 }
  0x89   : > { %p47_p8 = scmp.ne.s32.totalorder %s2624_s15, %s2620_s30  ;;  %p38_p1 = scmp.eq.s32.totalorder %s37_s7, 0 }
  0x8a   : > { %p48_p3 = scmp.eq.s32.totalorder %s2628_s16, 0  ;;  %p53_p13 = scmp.ne.s32.totalorder %s2620_s30, %s2616_s29 }
  0x8b   : > { %p355_p0 = scmp.eq.s32.totalorder %s2737_s19, 1  ;;  %p3223_p5 = scmp.eq.s32.totalorder %s2737_s19, 0 }
  0x8c   : > { %s2901_s9 = scalar_select %p38_p1, %s2624_s15, %s40_s2  }
  0x8d   : > { %p49_p2 = por %p48_p3, %p47_p8  ;;  %p2905_p7 = por %p3223_p5, %p53_p13 }
  0x8e   : > { %p2909_p6 = por %p355_p0, %p47_p8  ;;  %p361_p9 = scmp.eq.s32.totalorder %s1833_s23, 1 }
  0x8f   : > { %p2253_p4 = scmp.lt.s32.totalorder %s2628_s16, 2  ;;  %s467_s28 = sand.u32 1, %s2624_s15  }
  0x90   : > { %s3225_s27 = scalar_select %p2909_p6, 1, 0 }
  0x91   : > { %p2915_p10 = por %p361_p9, %p53_p13  ;;  %s1841_s24 = sshll.u32 %s467_s28, 3 }
  0x92   : > { %s1930_s14 = sshll.u32 %s2628_s16, 7  ;;  %s471_s25 = scalar_lea.vmem [#allocation2], %s1841_s24 }
  0x93   : > { %s3226_s17 = scalar_select %p2915_p10, 1, 0 }
  0x94   : > { %s2923_s10 = scalar_lea.hbm %s3192_s0, %s1930_s14  ;;  %s478_s2 = sshll.u32 %s471_s25, 4  ;;  %s2929_s2 = int_to_ptr.vmem [resolvable:$true] %s478_s2 }
  0x95   : > { %p2925_p11 = pnand %p2253_p4, %p49_p2  ;;  %s2931_s7 = scalar_lea.sflag [#allocation3], %s467_s28 }
  0x96   : > { %s2520_s26 = scalar_lea.hbm %s2923_s10, 128  ;;  %s2525_s22 = scalar_lea.hbm %s3192_s0, 256 }
  0x97   : > { %p2521_p12 = scmp.ne.s32.totalorder %s2923_s10, %s2520_s26  ;;  %p2522_p8 = pneg %p2925_p11 }
  0x98   : > { %p2526_p13 = scmp.lt.u32.totalorder %s2923_s10, %s3192_s0  ;;  %p2527_p0 = scmp.lt.u32.totalorder %s2525_s22, %s2520_s26 }
  0x99   : > { %p2523_p1 = pnand %p2522_p8, %p2521_p12  ;;  %p2529_p5 = scmp.lt.u32.totalorder %s2520_s26, %s2923_s10 }
  0x9a   : > { %p2528_p2 = por %p2527_p0, %p2526_p13 }
  0x9b   : > { %p2524_p3 = pneg %p2523_p1 }
  0x9c   : > { %p2530_p9 = por %p2529_p5, %p2528_p2 }
  0x9e   : > { %p2531_p4 = pnand %p2530_p9, %p2524_p3 }
  0xa0   : > { %2534 = shalt.err (!%p2531_p4)
}
  0xa1   : > { %s2535_s28 = scalar_lea.vmem %s2929_s2, 128  ;;  %s2637_s24 = smov [#allocation2]  }
  0xa2   : > { %p2536_p12 = scmp.ne.s32.totalorder %s2929_s2, %s2535_s28  ;;  %s2540_s14 = sshll.u32 %s2637_s24, 4  ;;  %s2541_s14 = int_to_ptr.vmem [resolvable:$false] %s2540_s14 }
  0xa3   : > { %s2542_s18 = scalar_lea.vmem %s2541_s14, 256  ;;  %p2543_p6 = scmp.lt.s32.totalorder %s2929_s2, %s2541_s14 }
  0xa4   : > { %p2538_p1 = pnand %p2536_p12, %p2522_p8  ;;  %p2544_p13 = scmp.lt.s32.totalorder %s2542_s18, %s2535_s28 }
  0xa6   : > { %p2539_p10 = pneg %p2538_p1  ;;  %p2545_p0 = por %p2544_p13, %p2543_p6 }
  0xa8   : > { %p2546_p2 = pnand %p2545_p0, %p2539_p10 }
  0xaa   : > { %2549 = shalt.err (!%p2546_p2)
}
  0xab   : > { %s3228_s26 = smov 64   ;;  %p3229_p8 = scmp.ne.s32.totalorder %s3219_s20, 0 }
  0xac   : > { %2243 = dma.hbm_to_vmem [thread:$0]  (!%p2925_p11), %s2923_s10, 128, %s2929_s2, %s2931_s7, %s3228_s26, %s3228_s26, %s2634_s13  }
  0xad   : > { %496 = sbr.rel (%p3229_p8) target bundleno = 1960 (0x7a8), region = 76  ;;  %s2965_s22 = sand.u32 (!%p3229_p8), 1, %s2620_s30  }
  0xae   : > { %s1845_s25 = sshll.u32 (!%p3229_p8), %s2965_s22, 3  ;;  %s499_s28 = scalar_lea.sflag (!%p3229_p8), [#allocation3], %s2965_s22 }
  0xaf   : > { %s2969_s24 = scalar_lea.vmem (!%p3229_p8), [#allocation2], %s1845_s25 }
  0xb4   : > { %2595 = dma.done.wait (%p2905_p7), %s499_s28, 128  }
  0xb5   : > { %2597 = vsyncadd (%p2905_p7), %s499_s28, 4294967168  ;;  %p3230_p6 = scmp.eq.s32.totalorder %s2737_s19, 0 }
  0xb7   : > { %2599 = dma.done.wait (%p3230_p6), [#allocation6], 6144   ;;  %p3231_p10 = pmov %p3230_p6 }
  0xb8   : > { %p3232_p11 = pmov %p3230_p6 }
  0xb9   : > { %2601 = vsyncadd (%p3231_p10), [#allocation6], 4294961152 }
  0xba   : > { %2603 = dma.done.wait (%p3232_p11), [#allocation9], 2048   ;;  %p3233_p3 = pmov %p3230_p6 }
  0xbc   : > { %2605 = vsyncadd (%p3233_p3), [#allocation9], 4294965248  ;;  %p3234_p5 = pmov %p3233_p3 }
  0xbd   : > { %p3235_p9 = pmov %p3233_p3 }
  0xbe   : > { %2607 = dma.done.wait (%p3234_p5), [#allocation12], 1024  }
  0xbf   : > { %2609 = vsyncadd (%p3235_p9), [#allocation12], 4294966272  ;;  %v2638_v0 = vmov 0.0   ;;  %vm2639_vm0 = vmmov 0   ;;  %v2301_v1 = vld [vmem:[#allocation5 + $0x40] sm:$0xff]   ;;  %v2303_v3 = vld [vmem:[#allocation5 + $0x48] sm:$0xff]   ;;  %v573_v42 = vlaneseq }
  0xc0   : > { %2014 = vmatprep.subr.bf16.mxu0 %v2638_v0  ;;  %2034 = vmatprep.subr.bf16.mxu1 %v2638_v0  ;;  %v2302_v2 = vld [vmem:[#allocation5] sm:$0xff]   ;;  %v2304_v4 = vld [vmem:[#allocation5 + $0x8] sm:$0xff]   ;;  %v2305_v5 = vld [vmem:[#allocation5 + $0x50] sm:$0xff]   ;;  %p569_p7 = scmp.lt.s32.totalorder %s2737_s19, 1  ;;  %vm1289_vm5 = vcmask 122880   ;;  %vm1303_vm9 = vcmask 130048  }
  0xc1   : > { %2030 = vmatprep.mubr.msk.bf16.mxu0 %vm2639_vm0, %v2638_v0  ;;  %2050 = vmatprep.mubr.msk.bf16.mxu1 %vm2639_vm0, %v2638_v0  ;;  %v2306_v6 = vld [vmem:[#allocation5 + $0x10] sm:$0xff]   ;;  %v2307_v7 = vld [vmem:[#allocation5 + $0x58] sm:$0xff]   ;;  %v2309_v9 = vld [vmem:[#allocation5 + $0x60] sm:$0xff]   ;;  %v3041_v43 = vshrl.u32 %v573_v42, 7  ;;  %s3236_s25 = sld [smem:[#allocation20_spill]]  ;;  %s3237_s20 = sld [smem:[#allocation21_spill]] }
  0xc2   : > { %2015 = vmatpush3.bf16.msra.mxu0 %v2301_v1  ;;  %2035 = vmatpush3.bf16.msra.mxu1 %v2302_v2  ;;  %v2308_v8 = vld [vmem:[#allocation5 + $0x18] sm:$0xff]   ;;  %v2310_v10 = vld [vmem:[#allocation5 + $0x20] sm:$0xff]   ;;  %v2311_v11 = vld [vmem:[#allocation5 + $0x68] sm:$0xff]   ;;  %s570_s11 = scalar_select %p569_p7, %s2737_s19, 1  ;;  %vm1571_vm10 = vcmask 1040384  }
  0xc3   : > { %2016 = vmatprep.subr.bf16.mxu0 %v2638_v0  ;;  %2036 = vmatprep.subr.bf16.mxu1 %v2638_v0  ;;  %v2312_v12 = vld [vmem:[#allocation5 + $0x28] sm:$0xff]   ;;  %v2313_v13 = vld [vmem:[#allocation5 + $0x70] sm:$0xff]   ;;  %v2315_v15 = vld [vmem:[#allocation5 + $0x78] sm:$0xff]   ;;  %vm801_vm1 = vcmp.lt.s32.totalorder %v3041_v43, 1  ;;  %vm576_vm2 = vcmp.ne.s32.totalorder %v3041_v43, 0  ;;  %v3052_v59 = vadd.s32 8, %v3041_v43 }
  0xc4   : > { %v2314_v14 = vld [vmem:[#allocation5 + $0x30] sm:$0xff]   ;;  %v2316_v16 = vld [vmem:[#allocation5 + $0x38] sm:$0xff]   ;;  %v2318_v18 = vld [vmem:[#allocation5 + $0x80] sm:$0xff]   ;;  %vm920_vm3 = vcmp.lt.s32.totalorder %v3041_v43, 7  ;;  %s571_s23 = scalar_lea.vmem %s3193_s1, %s570_s11  ;;  %s3238_s10 = sld [smem:[#allocation22_spill]] }
  0xc5   : > { %v2317_v17 = vld [vmem:[%s2969_s24] sm:$0xff]   ;;  %v2319_v19 = vld [vmem:[#allocation5 + $0x88] sm:$0xff]   ;;  %v2322_v22 = vld [vmem:[#allocation5 + $0xa0] sm:$0xff]   ;;  %vm579_vm4 = vcmp.ne.s32.totalorder %v3052_v59, 15  ;;  %s3239_s7 = sld [smem:[#allocation23_spill]]  ;;  %s3240_s26 = sld [smem:[#allocation24_spill]] }
  0xc6   : > { %2017 = vmatpush3.bf16.msra.mxu0 %v2303_v3  ;;  %2037 = vmatpush3.bf16.msra.mxu1 %v2304_v4  ;;  %v2320_v20 = vld [vmem:[#allocation5 + $0x90] sm:$0xff]   ;;  %v2321_v21 = vld [vmem:[#allocation5 + $0x98] sm:$0xff]   ;;  %v2323_v23 = vld [vmem:[#allocation5 + $0xa8] sm:$0xff]   ;;  %s568_s28 = scalar_lea.vmem [#allocation13], %s2965_s22  ;;  %s3241_s11 = sld [smem:[#allocation25_spill]] }
  0xc7   : > { %2018 = vmatprep.subr.bf16.mxu0 %v2638_v0  ;;  %2038 = vmatprep.subr.bf16.mxu1 %v2638_v0  ;;  %v2324_v24 = vld [vmem:[#allocation5 + $0xb0] sm:$0xff]   ;;  %v2325_v25 = vld [vmem:[#allocation5 + $0xb8] sm:$0xff]   ;;  %v2326_v26 = vld [vmem:[#allocation7 + $0x40] sm:$0xff]   ;;  %s1710_s24 = sshll.u32 %s568_s28, 4  ;;  %s1698_s2 = scalar_lea.sflag [#allocation4], %s2965_s22  ;;  %s3150_s24 = int_to_ptr.vmem [resolvable:$true] %s1710_s24 }
  0xc8   : > { %v2327_v27 = vld [vmem:[#allocation7] sm:$0xff]   ;;  %v2328_v28 = vld [vmem:[#allocation7 + $0x48] sm:$0xff]   ;;  %v2330_v30 = vld [vmem:[#allocation7 + $0x50] sm:$0xff]   ;;  %p3242_p12 = scmp.ne.s32.totalorder %s3225_s27, 0 }
  0xc9   : > { %v2329_v29 = vld [vmem:[#allocation7 + $0x8] sm:$0xff]   ;;  %v2331_v31 = vld [vmem:[#allocation7 + $0x10] sm:$0xff]   ;;  %v2332_v32 = vld [vmem:[#allocation7 + $0x58] sm:$0xff]  }
  0xca   : > { %2019 = vmatpush3.bf16.msra.mxu0 %v2305_v5  ;;  %2039 = vmatpush3.bf16.msra.mxu1 %v2306_v6  ;;  %v2333_v33 = vld [vmem:[#allocation7 + $0x18] sm:$0xff]   ;;  %v2334_v34 = vld [vmem:[#allocation7 + $0x60] sm:$0xff]   ;;  %v2336_v36 = vld [vmem:[#allocation7 + $0x68] sm:$0xff]  }
  0xcb   : > { %2020 = vmatprep.subr.bf16.mxu0 %v2638_v0  ;;  %2040 = vmatprep.subr.bf16.mxu1 %v2638_v0  ;;  %v2335_v35 = vld [vmem:[#allocation7 + $0x20] sm:$0xff]   ;;  %v2337_v37 = vld [vmem:[#allocation7 + $0x28] sm:$0xff]   ;;  %v2338_v38 = vld [vmem:[#allocation7 + $0x70] sm:$0xff]  }
  0xcc   : > { %v2339_v39 = vld [vmem:[#allocation7 + $0x30] sm:$0xff]   ;;  %v2340_v40 = vld [vmem:[#allocation7 + $0x78] sm:$0xff]  }
  0xcd   : > { %v2341_v41 = vld [vmem:[#allocation7 + $0x38] sm:$0xff]   ;;  %v1876_v5 = vld [vmem:[%s3195_s3] ss:$0 sm:$0xff] }
  0xce   : > { %2021 = vmatpush3.bf16.msra.mxu0 %v2307_v7  ;;  %2041 = vmatpush3.bf16.msra.mxu1 %v2308_v8  ;;  %v2357_v59 = vld [vmem:[#allocation8 + $0x38] sm:$0xff]  }
  0xcf   : > { %2022 = vmatprep.subr.bf16.mxu0 %v2638_v0  ;;  %2042 = vmatprep.subr.bf16.mxu1 %v2638_v0 }
  0xd2   : > { %2023 = vmatpush3.bf16.msra.mxu0 %v2309_v9  ;;  %2043 = vmatpush3.bf16.msra.mxu1 %v2310_v10 }
  0xd3   : > { %2024 = vmatprep.subr.bf16.mxu0 %v2638_v0  ;;  %2044 = vmatprep.subr.bf16.mxu1 %v2638_v0 }
  0xd6   : > { %2025 = vmatpush3.bf16.msra.mxu0 %v2311_v11  ;;  %2045 = vmatpush3.bf16.msra.mxu1 %v2312_v12 }
  0xd7   : > { %2026 = vmatprep.subr.bf16.mxu0 %v2638_v0  ;;  %2046 = vmatprep.subr.bf16.mxu1 %v2638_v0 }
  0xda   : > { %2027 = vmatpush3.bf16.msra.mxu0 %v2313_v13  ;;  %2047 = vmatpush3.bf16.msra.mxu1 %v2314_v14  ;;  %v2342_v13 = vld [vmem:[#allocation7 + $0x80] sm:$0xff]  }
  0xdb   : > { %2028 = vmatprep.subr.bf16.mxu0 %v2638_v0  ;;  %2048 = vmatprep.subr.bf16.mxu1 %v2638_v0 }
  0xde   : > { %2029 = vmatpush3.bf16.msra.mxu0 %v2315_v15  ;;  %2049 = vmatpush3.bf16.msra.mxu1 %v2316_v16  ;;  %v2343_v15 = vld [vmem:[#allocation7 + $0x88] sm:$0xff]   ;;  %v2344_v16 = vld [vmem:[#allocation7 + $0x90] sm:$0xff]  }
  0xdf   : > { %2054 = vmatprep.subr.bf16.mxu0 %v2638_v0  ;;  %2074 = vmatprep.subr.bf16.mxu1 %v2638_v0 }
  0xe1   : > { %2031 = vmatmul.mubr.bf16.vlgmr.msra.gmra.mrb[0].mxu0 %v2317_v17  ;;  %2051 = vmatmul.mubr.bf16.vlgmr.msra.gmra.mrb[0].mxu1 %v2317_v17 }
  0xe2   : > { %2055 = vmatpush3.bf16.msra.mxu0 %v2318_v18  ;;  %2070 = vmatprep.mubr.msk.bf16.mxu0 %vm2639_vm0, %v2638_v0  ;;  %v2346_v18 = vld [vmem:[#allocation7 + $0xa0] sm:$0xff]  }
  0xe3   : > { %2056 = vmatprep.subr.bf16.mxu0 %v2638_v0  ;;  %2090 = vmatprep.mubr.msk.bf16.mxu1 %vm2639_vm0, %v2638_v0 }
  0xe4   : > { %2075 = vmatpush3.bf16.msra.mxu1 %v2326_v26  ;;  %v2352_v26 = vld [vmem:[#allocation8 + $0x10] sm:$0xff]  }
  0xe5   : > { %2076 = vmatprep.subr.bf16.mxu1 %v2638_v0 }
  0xe6   : > { %2057 = vmatpush3.bf16.msra.mxu0 %v2319_v19  ;;  %v2347_v19 = vld [vmem:[#allocation7 + $0xa8] sm:$0xff]  }
  0xe7   : > { %2058 = vmatprep.subr.bf16.mxu0 %v2638_v0 }
  0xe8   : > { %2077 = vmatpush3.bf16.msra.mxu1 %v2328_v28  ;;  %v2354_v28 = vld [vmem:[#allocation8 + $0x20] sm:$0xff]  }
  0xe9   : > { %2078 = vmatprep.subr.bf16.mxu1 %v2638_v0 }
  0xea   : > { %2059 = vmatpush3.bf16.msra.mxu0 %v2320_v20  ;;  %v2348_v20 = vld [vmem:[#allocation7 + $0xb0] sm:$0xff]  }
  0xeb   : > { %2060 = vmatprep.subr.bf16.mxu0 %v2638_v0 }
  0xec   : > { %2079 = vmatpush3.bf16.msra.mxu1 %v2330_v30  ;;  %v2356_v30 = vld [vmem:[#allocation8 + $0x30] sm:$0xff]  }
  0xed   : > { %2080 = vmatprep.subr.bf16.mxu1 %v2638_v0 }
  0xee   : > { %2061 = vmatpush3.bf16.msra.mxu0 %v2321_v21  ;;  %v2349_v21 = vld [vmem:[#allocation7 + $0xb8] sm:$0xff]  }
  0xef   : > { %2062 = vmatprep.subr.bf16.mxu0 %v2638_v0 }
  0xf0   : > { %2081 = vmatpush3.bf16.msra.mxu1 %v2332_v32 }
  0xf1   : > { %2082 = vmatprep.subr.bf16.mxu1 %v2638_v0 }
  0xf2   : > { %2063 = vmatpush3.bf16.msra.mxu0 %v2322_v22  ;;  %v1288_v22 = vld [vmem:[%s571_s23] sm:$0x1]  ;;  %s2640_s23 = smov [#allocation13]  }
  0xf3   : > { %2064 = vmatprep.subr.bf16.mxu0 %v2638_v0 }
  0xf4   : > { %2083 = vmatpush3.bf16.msra.mxu1 %v2334_v34 }
  0xf5   : > { %2084 = vmatprep.subr.bf16.mxu1 %v2638_v0 }
  0xf6   : > { %2065 = vmatpush3.bf16.msra.mxu0 %v2323_v23  ;;  %v2350_v23 = vld [vmem:[#allocation8] sm:$0xff]  }
  0xf7   : > { %2066 = vmatprep.subr.bf16.mxu0 %v2638_v0 }
  0xf8   : > { %2085 = vmatpush3.bf16.msra.mxu1 %v2336_v36 }
  0xf9   : > { %2086 = vmatprep.subr.bf16.mxu1 %v2638_v0 }
  0xfa   : > { %2067 = vmatpush3.bf16.msra.mxu0 %v2324_v24  ;;  %v1290_v24 = vsel %vm1289_vm5, %v1288_v22, 0.0 }
  0xfb   : > { %2068 = vmatprep.subr.bf16.mxu0 %v2638_v0  ;;  %1291 = vadd.xlane.f32.xlu0 %v1290_v24 }
  0xfc   : > { %2087 = vmatpush3.bf16.msra.mxu1 %v2338_v38 }
  0xfd   : > { %2088 = vmatprep.subr.bf16.mxu1 %v2638_v0 }
  0xfe   : > { %2069 = vmatpush3.bf16.msra.mxu0 %v2325_v25  ;;  %v2351_v25 = vld [vmem:[#allocation8 + $0x8] sm:$0xff]  }
  0xff   : > { %2094 = vmatprep.subr.bf16.mxu0 %v2638_v0 }
 0x100   : > { %2089 = vmatpush3.bf16.msra.mxu1 %v2340_v40 }
 0x101   : > { %2071 = vmatmul.mubr.bf16.vlgmr.msra.gmra.mrb[4].mxu0 %v2317_v17  ;;  %2114 = vmatprep.subr.bf16.mxu1 %v2638_v0  ;;  %v2345_v17 = vld [vmem:[#allocation7 + $0x98] sm:$0xff]  }
 0x102   : > { %2110 = vmatprep.mubr.msk.bf16.mxu0 %vm2639_vm0, %v2638_v0  ;;  %2095 = vmatpush3.bf16.msra.mxu0 %v2327_v27  ;;  %v2353_v27 = vld [vmem:[#allocation8 + $0x18] sm:$0xff]  }
 0x103   : > { %2096 = vmatprep.subr.bf16.mxu0 %v2638_v0 }
 0x106   : > { %2097 = vmatpush3.bf16.msra.mxu0 %v2329_v29  ;;  %v2355_v29 = vld [vmem:[#allocation8 + $0x28] sm:$0xff]  }
 0x107   : > { %2098 = vmatprep.subr.bf16.mxu0 %v2638_v0 }
 0x10a   : > { %2099 = vmatpush3.bf16.msra.mxu0 %v2331_v31 }
 0x10b   : > { %2100 = vmatprep.subr.bf16.mxu0 %v2638_v0 }
 0x10e   : > { %2101 = vmatpush3.bf16.msra.mxu0 %v2333_v33 }
 0x10f   : > { %2102 = vmatprep.subr.bf16.mxu0 %v2638_v0 }
 0x112   : > { %2103 = vmatpush3.bf16.msra.mxu0 %v2335_v35 }
 0x113   : > { %2104 = vmatprep.subr.bf16.mxu0 %v2638_v0 }
 0x116   : > { %2105 = vmatpush3.bf16.msra.mxu0 %v2337_v37 }
 0x117   : > { %2106 = vmatprep.subr.bf16.mxu0 %v2638_v0 }
 0x11a   : > { %2107 = vmatpush3.bf16.msra.mxu0 %v2339_v39 }
 0x11b   : > { %2108 = vmatprep.subr.bf16.mxu0 %v2638_v0 }
 0x11e   : > { %2109 = vmatpush3.bf16.msra.mxu0 %v2341_v41 }
 0x11f   : > { %2134 = vmatprep.subr.bf16.mxu0 %v2638_v0 }
 0x1b4   : > { %v687_v44 = vpop.f32.mrb[0].mxu0  ;;  %v792_v45 = vpop.f32.mrb[0].mxu1 }
 0x1b5   : > { %v2032_v46 = vpop.f32.mrb[1].mxu0  ;;  %v799_v47 = vrot.slane %v792_v45, 7  ;;  %v2052_v48 = vpop.f32.mrb[1].mxu1 }
 0x1b6   : > { %v690_v49 = vpop.f32.mrb[2].mxu0  ;;  %v795_v50 = vpop.f32.mrb[2].mxu1  ;;  %v1296_v48 = vmul.u32 16, %v3041_v43 }
 0x1b7   : > { %v2033_v51 = vpop.f32.mrb[3].mxu0  ;;  %v800_v52 = vrot.slane %v795_v50, 7  ;;  %v2053_v53 = vpop.f32.mrb[3].mxu1 }
 0x1b8   : > { %v1295_v51 = vand.u32 127, %v573_v42 }
 0x1b9   : > { %v802_v54 = vsel %vm801_vm1, %v799_v47, %v800_v52  ;;  %v803_v55 = vsel %vm801_vm1, %v800_v52, %v799_v47  ;;  %v1298_v52 = vadd.s32 16, %v1296_v48 }
 0x1ba   : > { %v808_v56 = vsel %vm576_vm2, %v803_v55, 0.0  ;;  %v811_v57 = vadd.f32 %v802_v54, %v690_v49  ;;  %vm1297_vm6 = vcmp.ge.s32.totalorder %v1295_v51, %v1296_v48 }
 0x1bb   : > { %v810_v58 = vadd.f32 %v808_v56, %v687_v44  ;;  %vm1299_vm7 = vcmp.lt.s32.totalorder %v1295_v51, %v1298_v52 }
 0x1bc   : > { %vm1300_vm8 = vmand %vm1297_vm6, %vm1299_vm7 }
 0x1d4   : > { %v911_v60 = vpop.f32.mrb[4].mxu0 }
 0x1d5   : > { %v2072_v61 = vpop.f32.mrb[5].mxu0  ;;  %v918_v63 = vrot.slane %v911_v60, 1  ;;  %v1901_v60 = vld [vmem:[%s3197_s5] ss:$0 sm:$0xff] }
 0x1d6   : > { %v914_v62 = vpop.f32.mrb[6].mxu0 }
 0x1d7   : > { %v919_v1 = vrot.slane %v914_v62, 1  ;;  %v2073_v2 = vpop.f32.mrb[7].mxu0 }
 0x1d9   : > { %v921_v3 = vsel %vm920_vm3, %v918_v63, %v919_v1  ;;  %v922_v4 = vsel %vm920_vm3, %v919_v1, %v918_v63 }
 0x1da   : > { %v928_v6 = vsel %vm579_vm4, %v922_v4, 0.0  ;;  %v929_v7 = vadd.f32 %v921_v3, %v810_v58  ;;  %v1301_v4 = vsel %vm1300_vm8, %v1288_v22, 0.0  ;;  %v2365_v22 = vld [vmem:[#allocation10 + $0x38] sm:$0xff]  }
 0x1db   : > { %v930_v8 = vadd.f32 %v928_v6, %v811_v57  ;;  %v1302_v43 = vpack.c.bf16 %v1301_v4, %v1301_v4  ;;  %v2358_v6 = vld [vmem:[#allocation10] sm:$0xff]  }
 0x1dc   : > { %v938_v9 = vadd.f32 %v1876_v5, %v929_v7  ;;  %v1292_v7 = vpop.xlane.xlu0 %1291 }
 0x1dd   : > { %v939_v10 = vadd.f32 %v1876_v5, %v930_v8  ;;  %v1293_v8 = vmax.f32 %v1292_v7, 1e-09 }
 0x1de   : > { %v940_v11 = vmax.f32 %v938_v9, 0.0 }
 0x1df   : > { %v941_v12 = vmax.f32 %v939_v10, 0.0  ;;  %2374 = vrcp.f32 %v1293_v8 }
 0x1e1   : > { %v942_v14 = vpack.c.bf16 %v941_v12, %v940_v11 }
 0x1e3   : > { %2091 = vmatmul.mubr.bf16.vlgmr.msra.gmra.mrb[4].mxu1 %v942_v14  ;;  %2111 = vmatmul.mubr.bf16.vlgmr.msra.gmra.mrb[8].mxu0 %v942_v14 }
 0x1e4   : > { %2115 = vmatpush3.bf16.msra.mxu1 %v2342_v13  ;;  %2130 = vmatprep.mubr.msk.bf16.mxu1 %vm2639_vm0, %v2638_v0 }
 0x1e5   : > { %2116 = vmatprep.subr.bf16.mxu1 %v2638_v0  ;;  %2136 = vmatprep.mubr.msk.bf16.mxu0 %vm2639_vm0, %v2638_v0 }
 0x1e8   : > { %2117 = vmatpush3.bf16.msra.mxu1 %v2343_v15 }
 0x1e9   : > { %2118 = vmatprep.subr.bf16.mxu1 %v2638_v0  ;;  %v2375_v9 = vpop.eup %2374 }
 0x1ec   : > { %2119 = vmatpush3.bf16.msra.mxu1 %v2344_v16  ;;  %v2359_v16 = vld [vmem:[#allocation10 + $0x8] sm:$0xff]  }
 0x1ed   : > { %2120 = vmatprep.subr.bf16.mxu1 %v2638_v0 }
 0x1f0   : > { %2121 = vmatpush3.bf16.msra.mxu1 %v2345_v17  ;;  %v2360_v17 = vld [vmem:[#allocation10 + $0x10] sm:$0xff]  }
 0x1f1   : > { %2122 = vmatprep.subr.bf16.mxu1 %v2638_v0 }
 0x1f4   : > { %2123 = vmatpush3.bf16.msra.mxu1 %v2346_v18  ;;  %v2361_v18 = vld [vmem:[#allocation10 + $0x18] sm:$0xff]  }
 0x1f5   : > { %2124 = vmatprep.subr.bf16.mxu1 %v2638_v0 }
 0x1f8   : > { %2125 = vmatpush3.bf16.msra.mxu1 %v2347_v19  ;;  %v2362_v19 = vld [vmem:[#allocation10 + $0x20] sm:$0xff]  }
 0x1f9   : > { %2126 = vmatprep.subr.bf16.mxu1 %v2638_v0 }
 0x1fc   : > { %2127 = vmatpush3.bf16.msra.mxu1 %v2348_v20  ;;  %v2363_v20 = vld [vmem:[#allocation10 + $0x28] sm:$0xff]  }
 0x1fd   : > { %2128 = vmatprep.subr.bf16.mxu1 %v2638_v0 }
 0x200   : > { %2129 = vmatpush3.bf16.msra.mxu1 %v2349_v21  ;;  %v2364_v21 = vld [vmem:[#allocation10 + $0x30] sm:$0xff]  }
 0x201   : > { %2140 = vmatprep.subr.bf16.mxu1 %v2638_v0 }
 0x203   : > { %2131 = vmatmul.mubr.bf16.vlgmr.msra.gmra.mrb[8].mxu1 %v942_v14 }
 0x204   : > { %2156 = vmatprep.mubr.msk.bf16.mxu1 %vm2639_vm0, %v2638_v0  ;;  %2141 = vmatpush3.bf16.msra.mxu1 %v2350_v23  ;;  %v1366_v23 = vld [vmem:[%s3236_s25] sm:$0x1]  ;;  %s1927_s25 = sshll.u32 %s2737_s19, 4  ;;  %s2550_s19 = scalar_lea.vmem %s3150_s24, 16 }
 0x205   : > { %2142 = vmatprep.subr.bf16.mxu1 %v2638_v0  ;;  %p2551_p4 = scmp.ne.s32.totalorder %s3150_s24, %s2550_s19 }
 0x207   : > { %p2552_p1 = pnand %p2551_p4, %p3242_p12 }
 0x208   : > { %2143 = vmatpush3.bf16.msra.mxu1 %v2351_v25 }
 0x209   : > { %2144 = vmatprep.subr.bf16.mxu1 %v2638_v0  ;;  %p2553_p13 = pneg %p2552_p1 }
 0x20c   : > { %2145 = vmatpush3.bf16.msra.mxu1 %v2352_v26 }
 0x20d   : > { %2146 = vmatprep.subr.bf16.mxu1 %v2638_v0 }
 0x210   : > { %2147 = vmatpush3.bf16.msra.mxu1 %v2353_v27 }
 0x211   : > { %2148 = vmatprep.subr.bf16.mxu1 %v2638_v0 }
 0x214   : > { %2149 = vmatpush3.bf16.msra.mxu1 %v2354_v28 }
 0x215   : > { %2150 = vmatprep.subr.bf16.mxu1 %v2638_v0 }
 0x218   : > { %2151 = vmatpush3.bf16.msra.mxu1 %v2355_v29 }
 0x219   : > { %2152 = vmatprep.subr.bf16.mxu1 %v2638_v0 }
 0x21c   : > { %2153 = vmatpush3.bf16.msra.mxu1 %v2356_v30 }
 0x21d   : > { %2154 = vmatprep.subr.bf16.mxu1 %v2638_v0 }
 0x220   : > { %2155 = vmatpush3.bf16.msra.mxu1 %v2357_v59 }
 0x221   : > { %2180 = vmatprep.subr.bf16.mxu1 %v2638_v0 }
 0x2b6   : > { %v1042_v31 = vpop.f32.mrb[4].mxu1  ;;  %v1147_v32 = vpop.f32.mrb[8].mxu0 }
 0x2b7   : > { %v2092_v33 = vpop.f32.mrb[5].mxu1  ;;  %v2112_v34 = vpop.f32.mrb[9].mxu0  ;;  %v1154_v37 = vrot.slane %v1147_v32, 7 }
 0x2b8   : > { %v1045_v35 = vpop.f32.mrb[6].mxu1  ;;  %v1150_v36 = vpop.f32.mrb[10].mxu0 }
 0x2b9   : > { %v1155_v38 = vrot.slane %v1150_v36, 7  ;;  %v2093_v39 = vpop.f32.mrb[7].mxu1  ;;  %v2113_v40 = vpop.f32.mrb[11].mxu0 }
 0x2ba   : > { %v1481_v39 = vld [vmem:[%s3237_s20] sm:$0x1] }
 0x2bb   : > { %v1156_v41 = vsel %vm801_vm1, %v1154_v37, %v1155_v38  ;;  %v1157_v44 = vsel %vm801_vm1, %v1155_v38, %v1154_v37 }
 0x2bc   : > { %v1158_v45 = vsel %vm576_vm2, %v1157_v44, 0.0  ;;  %v1161_v46 = vadd.f32 %v1156_v41, %v1045_v35 }
 0x2bd   : > { %v1160_v47 = vadd.f32 %v1158_v45, %v1042_v31 }
 0x2d6   : > { %v1261_v49 = vpop.f32.mrb[8].mxu1 }
 0x2d7   : > { %v2132_v50 = vpop.f32.mrb[9].mxu1  ;;  %v1268_v54 = vrot.slane %v1261_v49, 1  ;;  %v2366_v49 = vld [vmem:[#allocation11] sm:$0xff]  }
 0x2d8   : > { %v1264_v53 = vpop.f32.mrb[10].mxu1  ;;  %v2367_v50 = vld [vmem:[#allocation11 + $0x8] sm:$0xff]  }
 0x2d9   : > { %v1269_v55 = vrot.slane %v1264_v53, 1  ;;  %v2133_v56 = vpop.f32.mrb[11].mxu1 }
 0x2da   : > { %v2368_v56 = vld [vmem:[#allocation11 + $0x10] sm:$0xff]  }
 0x2db   : > { %v1270_v57 = vsel %vm920_vm3, %v1268_v54, %v1269_v55  ;;  %v1271_v58 = vsel %vm920_vm3, %v1269_v55, %v1268_v54 }
 0x2dc   : > { %v1273_v42 = vsel %vm579_vm4, %v1271_v58, 0.0  ;;  %v1274_v61 = vadd.f32 %v1270_v57, %v1160_v47  ;;  %v2369_v57 = vld [vmem:[#allocation11 + $0x18] sm:$0xff]   ;;  %v2370_v58 = vld [vmem:[#allocation11 + $0x20] sm:$0xff]  }
 0x2dd   : > { %v1275_v62 = vadd.f32 %v1273_v42, %v1161_v46  ;;  %v2372_v42 = vld [vmem:[#allocation11 + $0x30] sm:$0xff]  }
 0x2de   : > { %v1283_v63 = vadd.f32 %v1901_v60, %v1274_v61  ;;  %v2373_v61 = vld [vmem:[#allocation11 + $0x38] sm:$0xff]  }
 0x2df   : > { %v1284_v1 = vadd.f32 %v1901_v60, %v1275_v62  ;;  %v2371_v60 = vld [vmem:[#allocation11 + $0x28] sm:$0xff]  }
 0x2e0   : > { %v1285_v2 = vmax.f32 %v1283_v63, 0.0 }
 0x2e1   : > { %v1286_v3 = vmax.f32 %v1284_v1, 0.0 }
 0x2e3   : > { %v1287_v5 = vpack.c.bf16 %v1286_v3, %v1285_v2  ;;  %v1586_v3 = vld [vmem:[%s3238_s10] sm:$0x1]  ;;  %s3148_s10 = scalar_lea.hbm %s3241_s11, %s1927_s25 }
 0x2e5   : > { %2135 = vmatpush3.bf16.msra.mxu0 %v1287_v5  ;;  %v1588_v5 = vld [vmem:[%s3239_s7] sm:$0x1]  ;;  %s2554_s7 = sshll.u32 %s2640_s23, 4  ;;  %s2555_s7 = int_to_ptr.vmem [resolvable:$false] %s2554_s7 }
 0x2e6   : > { %2160 = vmatprep.subr.bf16.mxu0 %v2638_v0  ;;  %s2556_s14 = scalar_lea.vmem %s2555_s7, 32  ;;  %p2557_p0 = scmp.lt.s32.totalorder %s3150_s24, %s2555_s7 }
 0x2e7   : > { %p2558_p2 = scmp.lt.s32.totalorder %s2556_s14, %s2550_s19 }
 0x2e8   : > { %2137 = vmatmul.mubr.msk.bf16.vlgmr.msra.gmra.mrb[12].mxu0 %vm1303_vm9, %v1302_v43 }
 0x2e9   : > { %2176 = vmatprep.mubr.msk.bf16.mxu0 %vm2639_vm0, %v2638_v0  ;;  %2161 = vmatpush3.bf16.msra.mxu0 %v2358_v6  ;;  %v1607_v6 = vld [vmem:[%s3240_s26] sm:$0x1]  ;;  %p2559_p8 = por %p2558_p2, %p2557_p0 }
 0x2ea   : > { %2162 = vmatprep.subr.bf16.mxu0 %v2638_v0 }
 0x2eb   : > { %p2560_p6 = pnand %p2559_p8, %p2553_p13 }
 0x2ed   : > { %2163 = vmatpush3.bf16.msra.mxu0 %v2359_v16 }
 0x2ee   : > { %2164 = vmatprep.subr.bf16.mxu0 %v2638_v0 }
 0x2f1   : > { %2165 = vmatpush3.bf16.msra.mxu0 %v2360_v17 }
 0x2f2   : > { %2166 = vmatprep.subr.bf16.mxu0 %v2638_v0 }
 0x2f5   : > { %2167 = vmatpush3.bf16.msra.mxu0 %v2361_v18 }
 0x2f6   : > { %2168 = vmatprep.subr.bf16.mxu0 %v2638_v0 }
 0x2f9   : > { %2169 = vmatpush3.bf16.msra.mxu0 %v2362_v19 }
 0x2fa   : > { %2170 = vmatprep.subr.bf16.mxu0 %v2638_v0 }
 0x2fd   : > { %2171 = vmatpush3.bf16.msra.mxu0 %v2363_v20 }
 0x2fe   : > { %2172 = vmatprep.subr.bf16.mxu0 %v2638_v0 }
 0x301   : > { %2173 = vmatpush3.bf16.msra.mxu0 %v2364_v21 }
 0x302   : > { %2174 = vmatprep.subr.bf16.mxu0 %v2638_v0 }
 0x305   : > { %2175 = vmatpush3.bf16.msra.mxu0 %v2365_v22 }
 0x3bb   : > { %v1341_v10 = vpop.f32.mrb[12].mxu0 }
 0x3bc   : > { %v1348_v11 = vmul.f32 %v2375_v9, %v1341_v10  ;;  %v2138_v12 = vpop.f32.mrb[13].mxu0 }
 0x3bd   : > { %v1344_v13 = vpop.f32.mrb[14].mxu0 }
 0x3be   : > { %v1349_v14 = vpack.c.bf16 %v1348_v11, %v1348_v11  ;;  %v2139_v15 = vpop.f32.mrb[15].mxu0 }
 0x3c0   : > { %2157 = vmatmul.mubr.bf16.vlgmr.msra.gmra.mrb[12].mxu1 %v1349_v14 }
 0x3c1   : > { %2196 = vmatprep.mubr.msk.bf16.mxu1 %vm2639_vm0, %v2638_v0  ;;  %2181 = vmatpush3.bf16.msra.mxu1 %v2366_v49 }
 0x3c2   : > { %2182 = vmatprep.subr.bf16.mxu1 %v2638_v0 }
 0x3c5   : > { %2183 = vmatpush3.bf16.msra.mxu1 %v2367_v50 }
 0x3c6   : > { %2184 = vmatprep.subr.bf16.mxu1 %v2638_v0 }
 0x3c9   : > { %2185 = vmatpush3.bf16.msra.mxu1 %v2368_v56 }
 0x3ca   : > { %2186 = vmatprep.subr.bf16.mxu1 %v2638_v0 }
 0x3cd   : > { %2187 = vmatpush3.bf16.msra.mxu1 %v2369_v57 }
 0x3ce   : > { %2188 = vmatprep.subr.bf16.mxu1 %v2638_v0 }
 0x3d1   : > { %2189 = vmatpush3.bf16.msra.mxu1 %v2370_v58 }
 0x3d2   : > { %2190 = vmatprep.subr.bf16.mxu1 %v2638_v0 }
 0x3d5   : > { %2191 = vmatpush3.bf16.msra.mxu1 %v2371_v60 }
 0x3d6   : > { %2192 = vmatprep.subr.bf16.mxu1 %v2638_v0 }
 0x3d9   : > { %2193 = vmatpush3.bf16.msra.mxu1 %v2372_v42 }
 0x3da   : > { %2194 = vmatprep.subr.bf16.mxu1 %v2638_v0 }
 0x3dd   : > { %2195 = vmatpush3.bf16.msra.mxu1 %v2373_v61 }
 0x493   : > { %v1449_v24 = vpop.f32.mrb[12].mxu1 }
 0x494   : > { %v1450_v25 = vadd.f32 %v1449_v24, %v1366_v23  ;;  %v2158_v26 = vpop.f32.mrb[13].mxu1 }
 0x495   : > { %v1452_v27 = vpop.f32.mrb[14].mxu1 }
 0x496   : > { %v1456_v28 = vmul.f32 0.044715, %v1450_v25  ;;  %v2159_v29 = vpop.f32.mrb[15].mxu1  ;;  %v1455_v35 = vmul.f32 0.5, %v1450_v25 }
 0x498   : > { %v1457_v30 = vmul.f32 %v1456_v28, %v1450_v25 }
 0x49a   : > { %v1458_v31 = vmul.f32 %v1457_v30, %v1450_v25 }
 0x49c   : > { %v1459_v32 = vadd.f32 %v1458_v31, %v1450_v25 }
 0x49e   : > { %v1460_v33 = vmul.f32 0.7978846, %v1459_v32 }
 0x4a0   : > { %2376 = vtanh.f32 %v1460_v33 }
 0x4aa   : > { %v2377_v34 = vpop.eup %2376 }
 0x4ab   : > { %v1462_v36 = vadd.f32 1.0, %v2377_v34 }
 0x4ad   : > { %v1463_v37 = vmul.f32 %v1462_v36, %v1455_v35 }
 0x4af   : > { %v1464_v38 = vpack.c.bf16 %v1463_v37, %v1463_v37 }
 0x4b1   : > { %2177 = vmatmul.mubr.bf16.vlgmr.msra.gmra.mrb[16].mxu0 %v1464_v38 }
 0x584   : > { %v1564_v40 = vpop.f32.mrb[16].mxu0 }
 0x585   : > { %v1565_v41 = vadd.f32 %v1564_v40, %v1481_v39  ;;  %v2178_v44 = vpop.f32.mrb[17].mxu0 }
 0x586   : > { %v1567_v45 = vpop.f32.mrb[18].mxu0 }
 0x587   : > { %v2179_v46 = vpop.f32.mrb[19].mxu0  ;;  %v1570_v47 = vadd.f32 %v1565_v41, %v1450_v25 }
 0x589   : > { %v1572_v48 = vsel %vm1571_vm10, %v1570_v47, 0.0 }
 0x58a   : > { %1573 = vadd.xlane.f32.xlu0 %v1572_v48 }
 0x617   : > { %v1574_v51 = vpop.xlane.xlu0 %1573 }
 0x618   : > { %v1576_v52 = vmul.f32 0.0078125, %v1574_v51 }
 0x61a   : > { %v1577_v53 = vsub.f32 %v1570_v47, %v1576_v52 }
 0x61c   : > { %v1578_v54 = vmul.f32 %v1577_v53, %v1577_v53 }
 0x61e   : > { %v1579_v55 = vsel %vm1571_vm10, %v1578_v54, 0.0 }
 0x61f   : > { %1580 = vadd.xlane.f32.xlu1 %v1579_v55 }
 0x6ac   : > { %v1581_v62 = vpop.xlane.xlu1 %1580 }
 0x6ad   : > { %v1582_v63 = vmul.f32 0.0078125, %v1581_v62 }
 0x6af   : > { %v1583_v1 = vadd.f32 1e-05, %v1582_v63 }
 0x6b1   : > { %2378 = vrsqrt.f32 %v1583_v1 }
 0x6bb   : > { %v2379_v2 = vpop.eup %2378 }
 0x6bc   : > { %v1585_v4 = vmul.f32 %v2379_v2, %v1577_v53 }
 0x6be   : > { %v1587_v43 = vmul.f32 %v1586_v3, %v1585_v4 }
 0x6c0   : > { %v1589_v59 = vadd.f32 %v1588_v5, %v1587_v43 }
 0x6c2   : > { %v1590_v0 = vpack.c.bf16 %v1589_v59, %v1589_v59 }
 0x6c4   : > { %2197 = vmatmul.mubr.bf16.vlgmr.msra.gmra.mrb[16].mxu1 %v1590_v0 }
 0x797   : > { %v1690_v7 = vpop.f32.mrb[16].mxu1 }
 0x798   : > { %v1691_v8 = vadd.f32 %v1690_v7, %v1607_v6  ;;  %v2198_v9 = vpop.f32.mrb[17].mxu1 }
 0x799   : > { %v1693_v10 = vpop.f32.mrb[18].mxu1 }
 0x79a   : > { %1696 = vst [vmem:[%s568_s28] sm:$0x1] %v1691_v8  ;;  %v2199_v11 = vpop.f32.mrb[19].mxu1 }
 0x79b   : > { %2563 = shalt.err (!%p2560_p6)
}
 0x79c   : > { %s2564_s22 = scalar_lea.hbm %s3148_s10, 16  ;;  %s2568_s25 = scalar_lea.hbm %s3241_s11, 32 }
 0x79d   : > { %p2565_p10 = scmp.ne.s32.totalorder %s3148_s10, %s2564_s22  ;;  %p2569_p5 = scmp.lt.u32.totalorder %s3148_s10, %s3241_s11 }
 0x79e   : > { %p2570_p9 = scmp.lt.u32.totalorder %s2568_s25, %s2564_s22  ;;  %p2572_p4 = scmp.lt.u32.totalorder %s2564_s22, %s3148_s10 }
 0x79f   : > { %p2566_p11 = pnand %p2565_p10, %p3242_p12 }
 0x7a0   : > { %p2571_p7 = por %p2570_p9, %p2569_p5 }
 0x7a1   : > { %p2567_p3 = pneg %p2566_p11 }
 0x7a2   : > { %p2573_p1 = por %p2572_p4, %p2571_p7 }
 0x7a4   : > { %p2574_p13 = pnand %p2573_p1, %p2567_p3 }
 0x7a6   : > { %2577 = shalt.err (!%p2574_p13)
}
 0x7a7   : > { %2222 = dma.vmem_to_hbm [thread:$0]  (%p3242_p12), %s3150_s24, 16, %s3148_s10, %s1698_s2  }
 0x7a8 PF: > { %s1722_s13 = sand.u32 1, %s2616_s29   ;;  %p3243_p0 = scmp.ne.s32.totalorder %s3226_s17, 0 }
 0x7a9   : > { %p3244_p2 = scmp.ge.s32.totalorder %s2628_s16, 2  ;;  %s1723_s19 = scalar_lea.sflag [#allocation4], %s1722_s13 }
 0x7ab   : > { %p2245_p8 = pnand %p3244_p2, %p3243_p0 }
 0x7ad   : > { %2611 = dma.done.wait (!%p2245_p8), %s1723_s19, 16  }
 0x7ae   : > { %2613 = vsyncadd (!%p2245_p8), %s1723_s19, 4294967280  ;;  %p30_p6 = scmp.ge.s32.totalorder %s2889_s21, 4   ;;  %s3245_s29 = smov %s2620_s30 }
 0x7af   : > { %s3246_s30 = smov %s2624_s15  ;;  %s3247_s15 = smov %s2901_s9 }
 0x7b0   : > { %s3248_s16 = smov %s2889_s21  ;;  %32 = sbr.rel (!%p30_p6) target bundleno = 16 (0x10), region = 148 }
 0x7b7   :  { %1727 = vsyncpa [#allocation3], 1 }
 0x7b8   :  { %1729 = vsyncpa [#allocation3 + $0x1], 1 }
 0x7b9   :  { %1730 = vsyncpa [#allocation6], 1 }
 0x7ba   :  { %1731 = vsyncpa [#allocation9], 1 }
 0x7bb   :  { %1732 = vsyncpa [#allocation12], 1 }
 0x7bc   :  { %1733 = vsyncpa [#allocation4], 1 }
 0x7bd   :  { %1735 = vsyncpa [#allocation4 + $0x1], 1 }

// kernel: tpu_custom_call.1
= control target key start
LH: loop header
LB: loop body
LE: loop exit
PB: predicated region body
PF: predicated region fallthrough
CT: control target
= control target key end

     0   :  { %s3192_s0 = inlined_call_operand.hbm [shape: bf16[2,16,128], index: 0, kind: input, shape index: {}]   ;;  %s3193_s1 = inlined_call_operand.vmem [shape: f32[2,1,16], index: 1, kind: input, shape index: {}]   ;;  %s3194_s2 = inlined_call_operand.hbm [shape: bf16[3,128,128], index: 2, kind: input, shape index: {}]   ;;  %s3195_s3 = inlined_call_operand.vmem [shape: f32[1,128], index: 3, kind: input, shape index: {}]   ;;  %s3196_s4 = inlined_call_operand.hbm [shape: bf16[3,128,128], index: 4, kind: input, shape index: {}]   ;;  %s3197_s5 = inlined_call_operand.vmem [shape: f32[1,128], index: 5, kind: input, shape index: {}]   ;;  %s3198_s6 = inlined_call_operand.hbm [shape: bf16[128,128], index: 6, kind: input, shape index: {}]   ;;  %s3199_s7 = inlined_call_operand.vmem [shape: f32[1,128], index: 7, kind: input, shape index: {}]   ;;  %s3200_s8 = inlined_call_operand.hbm [shape: bf16[128,128], index: 8, kind: input, shape index: {}]   ;;  %s3201_s9 = inlined_call_operand.vmem [shape: f32[1,128], index: 9, kind: input, shape index: {}]   ;;  %s3202_s10 = inlined_call_operand.vmem [shape: f32[1,128], index: 10, kind: input, shape index: {}]   ;;  %s3203_s11 = inlined_call_operand.vmem [shape: f32[1,128], index: 11, kind: input, shape index: {}]   ;;  %s3204_s12 = inlined_call_operand.hbm [shape: bf16[128,128], index: 12, kind: input, shape index: {}]   ;;  %s3205_s13 = inlined_call_operand.vmem [shape: f32[1,128], index: 13, kind: input, shape index: {}]   ;;  %s3206_s14 = inlined_call_operand.hbm [shape: f32[2,1,128], index: 14, kind: output, shape index: {}]  }
   0x1   :  { %3212 = sst [smem:[#allocation19_spill]] %s3194_s2 }
   0x2   :  { %3213 = sst [smem:[#allocation20_spill]] %s3199_s7 }
   0x3   :  { %3214 = sst [smem:[#allocation21_spill]] %s3201_s9 }
   0x4   :  { %3215 = sst [smem:[#allocation22_spill]] %s3202_s10 }
   0x5   :  { %3216 = sst [smem:[#allocation23_spill]] %s3203_s11 }
   0x6   :  { %3217 = sst [smem:[#allocation24_spill]] %s3205_s13 }
   0x7   :  { %3218 = sst [smem:[#allocation25_spill]] %s3206_s14 }
   0x8   :  { %19 = vsyncpa [#allocation3], 0 }
   0x9   :  { %21 = vsyncpa [#allocation3 + $0x1], 0 }
   0xa   :  { %22 = vsyncpa [#allocation6], 0 }
   0xb   :  { %23 = vsyncpa [#allocation9], 0 }
   0xc   :  { %24 = vsyncpa [#allocation12], 0 }
   0xd   :  { %25 = vsyncpa [#allocation4], 0 }
   0xe   :  { %27 = vsyncpa [#allocation4 + $0x1], 0  ;;  %s2716_s29 = smov 0   ;;  %s2718_s30 = smov 0  }
   0xf   :  { %s2720_s15 = smov 0   ;;  %s2722_s16 = smov 0  }
  0x10 LB: > { %s2630_s17 = smov [#allocation5]   ;;  %s2737_s19 = sadd.s32 4294967295, %s2628_s16   ;;  %s2628_s16 = sphi %s2722_s16, %s3248_s16   ;;  %s2624_s15 = sphi %s2720_s15, %s3247_s15   ;;  %s2620_s30 = sphi %s2718_s30, %s3246_s30   ;;  %s2616_s29 = sphi %s2716_s29, %s3245_s29  }
  0x11   : > { %s380_s18 = sshll.u32 %s2630_s17, 4  ;;  %p1834_p0 = scmp.ge.s32.totalorder %s2628_s16, 1  ;;  %s2742_s18 = int_to_ptr.vmem [resolvable:$true] %s380_s18 }
  0x12   : > { %p3208_p1 = scmp.eq.s32.totalorder %s2737_s19, 0  ;;  %p368_p2 = scmp.lt.s32.totalorder %s2628_s16, 3 }
  0x13   : > { %s2631_s21 = smov [#allocation8]   ;;  %s2632_s24 = smov [#allocation7]  }
  0x14   : > { %p2744_p3 = pnand %p1834_p0, %p368_p2  ;;  %s412_s22 = sshll.u32 %s2631_s21, 4  ;;  %s2757_s22 = int_to_ptr.vmem [resolvable:$true] %s412_s22 }
  0x15   : > { %s396_s25 = sshll.u32 %s2632_s24, 4  ;;  %s3221_s2 = sld [smem:[#allocation19_spill]]  ;;  %s2759_s25 = int_to_ptr.vmem [resolvable:$true] %s396_s25 }
  0x16   : > { %s3219_s20 = scalar_select %p2744_p3, 1, 0 }
  0x17   : > { %p2224_p5 = pneg %p2744_p3 }
  0x19   : > { %p2753_p6 = pnand %p2224_p5, %p3208_p1 }
  0x1b   : > { %s2380_s28 = scalar_lea.hbm %s3221_s2, 3072  ;;  %p2769_p8 = pneg %p2753_p6 }
  0x1c   : > { %p2381_p7 = scmp.ne.s32.totalorder %s3221_s2, %s2380_s28  ;;  %p2387_p11 = scmp.lt.u32.totalorder %s2380_s28, %s3221_s2 }
  0x1e   : > { %p2383_p9 = pnand %p2769_p8, %p2381_p7 }
  0x20   : > { %p2384_p10 = pneg %p2383_p9 }
  0x22   : > { %p2389_p12 = pnand %p2387_p11, %p2384_p10 }
  0x24   : > { %2392 = shalt.err (!%p2389_p12)
}
  0x25   : > { %s2393_s14 = scalar_lea.vmem %s2742_s18, 3072  ;;  %p2401_p5 = scmp.lt.s32.totalorder %s2742_s18, %s2742_s18 }
  0x26   : > { %p2394_p13 = scmp.ne.s32.totalorder %s2742_s18, %s2393_s14  ;;  %p2402_p4 = scmp.lt.s32.totalorder %s2393_s14, %s2393_s14 }
  0x28   : > { %p2396_p0 = pnand %p2394_p13, %p2769_p8  ;;  %p2403_p7 = por %p2402_p4, %p2401_p5 }
  0x2a   : > { %p2397_p2 = pneg %p2396_p0 }
  0x2c   : > { %p2404_p9 = pnand %p2403_p7, %p2397_p2 }
  0x2e   : > { %2407 = shalt.err (!%p2404_p9)
}
  0x2f   : > { %s3210_s26 = smov 64   ;;  %s2634_s13 = smov 4  }
  0x30   : > { %2227 = dma.hbm_to_vmem [thread:$0]  (!%p2753_p6), %s3221_s2, 3072, %s2742_s18, [#allocation6], %s3210_s26, %s3210_s26, %s2634_s13  }
  0x31   : > { %s2408_s14 = scalar_lea.hbm %s3198_s6, 1024 }
  0x32   : > { %p2409_p4 = scmp.ne.s32.totalorder %s3198_s6, %s2408_s14  ;;  %p2415_p12 = scmp.lt.u32.totalorder %s2408_s14, %s3198_s6 }
  0x34   : > { %p2411_p10 = pnand %p2409_p4, %p2769_p8 }
  0x36   : > { %p2412_p11 = pneg %p2411_p10 }
  0x38   : > { %p2417_p13 = pnand %p2415_p12, %p2412_p11 }
  0x3a   : > { %2420 = shalt.err (!%p2417_p13)
}
  0x3b   : > { %s2421_s18 = scalar_lea.vmem %s2757_s22, 1024  ;;  %p2429_p7 = scmp.lt.s32.totalorder %s2757_s22, %s2757_s22 }
  0x3c   : > { %p2422_p0 = scmp.ne.s32.totalorder %s2757_s22, %s2421_s18  ;;  %p2430_p9 = scmp.lt.s32.totalorder %s2421_s18, %s2421_s18 }
  0x3e   : > { %p2424_p2 = pnand %p2422_p0, %p2769_p8  ;;  %p2431_p4 = por %p2430_p9, %p2429_p7 }
  0x40   : > { %p2425_p5 = pneg %p2424_p2 }
  0x42   : > { %p2432_p10 = pnand %p2431_p4, %p2425_p5 }
  0x44   : > { %2435 = shalt.err (!%p2432_p10)
}
  0x45   : > { %2233 = dma.hbm_to_vmem [thread:$0]  (!%p2753_p6), %s3198_s6, 1024, %s2757_s22, [#allocation9], %s3210_s26, %s3210_s26, %s2634_s13  }
  0x46   : > { %s2436_s27 = scalar_lea.hbm %s3196_s4, 3072 }
  0x47   : > { %p2437_p11 = scmp.ne.s32.totalorder %s3196_s4, %s2436_s27  ;;  %p2443_p0 = scmp.lt.u32.totalorder %s2436_s27, %s3196_s4 }
  0x49   : > { %p2439_p12 = pnand %p2437_p11, %p2769_p8 }
  0x4b   : > { %p2440_p13 = pneg %p2439_p12 }
  0x4d   : > { %p2445_p2 = pnand %p2443_p0, %p2440_p13 }
  0x4f   : > { %2448 = shalt.err (!%p2445_p2)
}
  0x50   : > { %s2449_s22 = scalar_lea.vmem %s2759_s25, 3072  ;;  %p2457_p4 = scmp.lt.s32.totalorder %s2759_s25, %s2759_s25 }
  0x51   : > { %p2450_p5 = scmp.ne.s32.totalorder %s2759_s25, %s2449_s22  ;;  %p2458_p10 = scmp.lt.s32.totalorder %s2449_s22, %s2449_s22 }
  0x53   : > { %p2452_p7 = pnand %p2450_p5, %p2769_p8  ;;  %p2459_p11 = por %p2458_p10, %p2457_p4 }
  0x55   : > { %p2453_p9 = pneg %p2452_p7 }
  0x57   : > { %p2460_p12 = pnand %p2459_p11, %p2453_p9 }
  0x59   : > { %2463 = shalt.err (!%p2460_p12)
}
  0x5a   : > { %2230 = dma.hbm_to_vmem [thread:$0]  (!%p2753_p6), %s3196_s4, 3072, %s2759_s25, [#allocation6], %s3210_s26, %s3210_s26, %s2634_s13  }
  0x5b   : > { %s2635_s9 = smov [#allocation10]   ;;  %s2636_s11 = smov [#allocation11]  }
  0x5c   : > { %s428_s10 = sshll.u32 %s2635_s9, 4  ;;  %s450_s27 = sshll.u32 %s2636_s11, 4  ;;  %s429_s10 = int_to_ptr.vmem [resolvable:$true] %s428_s10  ;;  %s451_s27 = int_to_ptr.vmem [resolvable:$true] %s450_s27 }
  0x5d   : > { %s2464_s24 = scalar_lea.hbm %s3200_s8, 1024 }
  0x5e   : > { %p2465_p13 = scmp.ne.s32.totalorder %s3200_s8, %s2464_s24  ;;  %p2471_p5 = scmp.lt.u32.totalorder %s2464_s24, %s3200_s8 }
  0x60   : > { %p2467_p0 = pnand %p2465_p13, %p2769_p8 }
  0x62   : > { %p2468_p2 = pneg %p2467_p0 }
  0x64   : > { %p2473_p7 = pnand %p2471_p5, %p2468_p2 }
  0x66   : > { %2476 = shalt.err (!%p2473_p7)
}
  0x67   : > { %s2477_s25 = scalar_lea.vmem %s429_s10, 1024  ;;  %p2485_p11 = scmp.lt.s32.totalorder %s429_s10, %s429_s10 }
  0x68   : > { %p2478_p9 = scmp.ne.s32.totalorder %s429_s10, %s2477_s25  ;;  %p2486_p12 = scmp.lt.s32.totalorder %s2477_s25, %s2477_s25 }
  0x6a   : > { %p2480_p4 = pnand %p2478_p9, %p2769_p8  ;;  %p2487_p1 = por %p2486_p12, %p2485_p11 }
  0x6c   : > { %p2481_p10 = pneg %p2480_p4 }
  0x6e   : > { %p2488_p3 = pnand %p2487_p1, %p2481_p10 }
  0x70   : > { %2491 = shalt.err (!%p2488_p3)
}
  0x71   : > { %2236 = dma.hbm_to_vmem [thread:$0]  (!%p2753_p6), %s3200_s8, 1024, %s429_s10, [#allocation9], %s3210_s26, %s3210_s26, %s2634_s13  }
  0x72   : > { %s2492_s28 = scalar_lea.hbm %s3204_s12, 1024 }
  0x73   : > { %p2493_p1 = scmp.ne.s32.totalorder %s3204_s12, %s2492_s28  ;;  %p2499_p0 = scmp.lt.u32.totalorder %s2492_s28, %s3204_s12 }
  0x75   : > { %p2495_p3 = pnand %p2493_p1, %p2769_p8 }
  0x77   : > { %p2496_p13 = pneg %p2495_p3 }
  0x79   : > { %p2501_p2 = pnand %p2499_p0, %p2496_p13 }
  0x7b   : > { %2504 = shalt.err (!%p2501_p2)
}
  0x7c   : > { %s2505_s18 = scalar_lea.vmem %s451_s27, 1024  ;;  %p2513_p4 = scmp.lt.s32.totalorder %s451_s27, %s451_s27 }
  0x7d   : > { %p2506_p5 = scmp.ne.s32.totalorder %s451_s27, %s2505_s18  ;;  %p2514_p10 = scmp.lt.s32.totalorder %s2505_s18, %s2505_s18 }
  0x7f   : > { %p2508_p7 = pnand %p2506_p5, %p2769_p8  ;;  %p2515_p11 = por %p2514_p10, %p2513_p4 }
  0x81   : > { %p2509_p9 = pneg %p2508_p7 }
  0x83   : > { %p2516_p12 = pnand %p2515_p11, %p2509_p9 }
  0x85   : > { %2519 = shalt.err (!%p2516_p12)
}
  0x86   : > { %2239 = dma.hbm_to_vmem [thread:$0]  (!%p2753_p6), %s3204_s12, 1024, %s451_s27, [#allocation12], %s3210_s26, %s3210_s26, %s2634_s13  }
  0x87   : > { %s1833_s23 = sadd.s32 4294967294, %s2628_s16   ;;  %s2889_s21 = sadd.s32 1, %s2628_s16  }
  0x88   : > { %s40_s2 = sadd.s32 1, %s2624_s15  ;;  %s37_s7 = ssub.s32 %s2628_s16, %s2889_s21 }
  0x89   : > { %p47_p8 = scmp.ne.s32.totalorder %s2624_s15, %s2620_s30  ;;  %p38_p1 = scmp.eq.s32.totalorder %s37_s7, 0 }
  0x8a   : > { %p48_p3 = scmp.eq.s32.totalorder %s2628_s16, 0  ;;  %p53_p13 = scmp.ne.s32.totalorder %s2620_s30, %s2616_s29 }
  0x8b   : > { %p355_p0 = scmp.eq.s32.totalorder %s2737_s19, 1  ;;  %p3223_p5 = scmp.eq.s32.totalorder %s2737_s19, 0 }
  0x8c   : > { %s2901_s9 = scalar_select %p38_p1, %s2624_s15, %s40_s2  }
  0x8d   : > { %p49_p2 = por %p48_p3, %p47_p8  ;;  %p2905_p7 = por %p3223_p5, %p53_p13 }
  0x8e   : > { %p2909_p6 = por %p355_p0, %p47_p8  ;;  %p361_p9 = scmp.eq.s32.totalorder %s1833_s23, 1 }
  0x8f   : > { %p2253_p4 = scmp.lt.s32.totalorder %s2628_s16, 2  ;;  %s467_s28 = sand.u32 1, %s2624_s15  }
  0x90   : > { %s3225_s27 = scalar_select %p2909_p6, 1, 0 }
  0x91   : > { %p2915_p10 = por %p361_p9, %p53_p13  ;;  %s1841_s24 = sshll.u32 %s467_s28, 3 }
  0x92   : > { %s1930_s14 = sshll.u32 %s2628_s16, 7  ;;  %s471_s25 = scalar_lea.vmem [#allocation2], %s1841_s24 }
  0x93   : > { %s3226_s17 = scalar_select %p2915_p10, 1, 0 }
  0x94   : > { %s2923_s10 = scalar_lea.hbm %s3192_s0, %s1930_s14  ;;  %s478_s2 = sshll.u32 %s471_s25, 4  ;;  %s2929_s2 = int_to_ptr.vmem [resolvable:$true] %s478_s2 }
  0x95   : > { %p2925_p11 = pnand %p2253_p4, %p49_p2  ;;  %s2931_s7 = scalar_lea.sflag [#allocation3], %s467_s28 }
  0x96   : > { %s2520_s26 = scalar_lea.hbm %s2923_s10, 128  ;;  %s2525_s22 = scalar_lea.hbm %s3192_s0, 256 }
  0x97   : > { %p2521_p12 = scmp.ne.s32.totalorder %s2923_s10, %s2520_s26  ;;  %p2522_p8 = pneg %p2925_p11 }
  0x98   : > { %p2526_p13 = scmp.lt.u32.totalorder %s2923_s10, %s3192_s0  ;;  %p2527_p0 = scmp.lt.u32.totalorder %s2525_s22, %s2520_s26 }
  0x99   : > { %p2523_p1 = pnand %p2522_p8, %p2521_p12  ;;  %p2529_p5 = scmp.lt.u32.totalorder %s2520_s26, %s2923_s10 }
  0x9a   : > { %p2528_p2 = por %p2527_p0, %p2526_p13 }
  0x9b   : > { %p2524_p3 = pneg %p2523_p1 }
  0x9c   : > { %p2530_p9 = por %p2529_p5, %p2528_p2 }
  0x9e   : > { %p2531_p4 = pnand %p2530_p9, %p2524_p3 }
  0xa0   : > { %2534 = shalt.err (!%p2531_p4)
}
  0xa1   : > { %s2535_s28 = scalar_lea.vmem %s2929_s2, 128  ;;  %s2637_s24 = smov [#allocation2]  }
  0xa2   : > { %p2536_p12 = scmp.ne.s32.totalorder %s2929_s2, %s2535_s28  ;;  %s2540_s14 = sshll.u32 %s2637_s24, 4  ;;  %s2541_s14 = int_to_ptr.vmem [resolvable:$false] %s2540_s14 }
  0xa3   : > { %s2542_s18 = scalar_lea.vmem %s2541_s14, 256  ;;  %p2543_p6 = scmp.lt.s32.totalorder %s2929_s2, %s2541_s14 }
  0xa4   : > { %p2538_p1 = pnand %p2536_p12, %p2522_p8  ;;  %p2544_p13 = scmp.lt.s32.totalorder %s2542_s18, %s2535_s28 }
  0xa6   : > { %p2539_p10 = pneg %p2538_p1  ;;  %p2545_p0 = por %p2544_p13, %p2543_p6 }
  0xa8   : > { %p2546_p2 = pnand %p2545_p0, %p2539_p10 }
  0xaa   : > { %2549 = shalt.err (!%p2546_p2)
}
  0xab   : > { %s3228_s26 = smov 64   ;;  %p3229_p8 = scmp.ne.s32.totalorder %s3219_s20, 0 }
  0xac   : > { %2243 = dma.hbm_to_vmem [thread:$0]  (!%p2925_p11), %s2923_s10, 128, %s2929_s2, %s2931_s7, %s3228_s26, %s3228_s26, %s2634_s13  }
  0xad   : > { %496 = sbr.rel (%p3229_p8) target bundleno = 1960 (0x7a8), region = 76  ;;  %s2965_s22 = sand.u32 (!%p3229_p8), 1, %s2620_s30  }
  0xae   : > { %s1845_s25 = sshll.u32 (!%p3229_p8), %s2965_s22, 3  ;;  %s499_s28 = scalar_lea.sflag (!%p3229_p8), [#allocation3], %s2965_s22 }
  0xaf   : > { %s2969_s24 = scalar_lea.vmem (!%p3229_p8), [#allocation2], %s1845_s25 }
  0xb4   : > { %2595 = dma.done.wait (%p2905_p7), %s499_s28, 128  }
  0xb5   : > { %2597 = vsyncadd (%p2905_p7), %s499_s28, 4294967168  ;;  %p3230_p6 = scmp.eq.s32.totalorder %s2737_s19, 0 }
  0xb7   : > { %2599 = dma.done.wait (%p3230_p6), [#allocation6], 6144   ;;  %p3231_p10 = pmov %p3230_p6 }
  0xb8   : > { %p3232_p11 = pmov %p3230_p6 }
  0xb9   : > { %2601 = vsyncadd (%p3231_p10), [#allocation6], 4294961152 }
  0xba   : > { %2603 = dma.done.wait (%p3232_p11), [#allocation9], 2048   ;;  %p3233_p3 = pmov %p3230_p6 }
  0xbc   : > { %2605 = vsyncadd (%p3233_p3), [#allocation9], 4294965248  ;;  %p3234_p5 = pmov %p3233_p3 }
  0xbd   : > { %p3235_p9 = pmov %p3233_p3 }
  0xbe   : > { %2607 = dma.done.wait (%p3234_p5), [#allocation12], 1024  }
  0xbf   : > { %2609 = vsyncadd (%p3235_p9), [#allocation12], 4294966272  ;;  %v2638_v0 = vmov 0.0   ;;  %vm2639_vm0 = vmmov 0   ;;  %v2301_v1 = vld [vmem:[#allocation5 + $0x40] sm:$0xff]   ;;  %v2303_v3 = vld [vmem:[#allocation5 + $0x48] sm:$0xff]   ;;  %v573_v42 = vlaneseq }
  0xc0   : > { %2014 = vmatprep.subr.bf16.mxu0 %v2638_v0  ;;  %2034 = vmatprep.subr.bf16.mxu1 %v2638_v0  ;;  %v2302_v2 = vld [vmem:[#allocation5] sm:$0xff]   ;;  %v2304_v4 = vld [vmem:[#allocation5 + $0x8] sm:$0xff]   ;;  %v2305_v5 = vld [vmem:[#allocation5 + $0x50] sm:$0xff]   ;;  %p569_p7 = scmp.lt.s32.totalorder %s2737_s19, 1  ;;  %vm1289_vm5 = vcmask 122880   ;;  %vm1303_vm9 = vcmask 130048  }
  0xc1   : > { %2030 = vmatprep.mubr.msk.bf16.mxu0 %vm2639_vm0, %v2638_v0  ;;  %2050 = vmatprep.mubr.msk.bf16.mxu1 %vm2639_vm0, %v2638_v0  ;;  %v2306_v6 = vld [vmem:[#allocation5 + $0x10] sm:$0xff]   ;;  %v2307_v7 = vld [vmem:[#allocation5 + $0x58] sm:$0xff]   ;;  %v2309_v9 = vld [vmem:[#allocation5 + $0x60] sm:$0xff]   ;;  %v3041_v43 = vshrl.u32 %v573_v42, 7  ;;  %s3236_s25 = sld [smem:[#allocation20_spill]]  ;;  %s3237_s20 = sld [smem:[#allocation21_spill]] }
  0xc2   : > { %2015 = vmatpush3.bf16.msra.mxu0 %v2301_v1  ;;  %2035 = vmatpush3.bf16.msra.mxu1 %v2302_v2  ;;  %v2308_v8 = vld [vmem:[#allocation5 + $0x18] sm:$0xff]   ;;  %v2310_v10 = vld [vmem:[#allocation5 + $0x20] sm:$0xff]   ;;  %v2311_v11 = vld [vmem:[#allocation5 + $0x68] sm:$0xff]   ;;  %s570_s11 = scalar_select %p569_p7, %s2737_s19, 1  ;;  %vm1571_vm10 = vcmask 1040384  }
  0xc3   : > { %2016 = vmatprep.subr.bf16.mxu0 %v2638_v0  ;;  %2036 = vmatprep.subr.bf16.mxu1 %v2638_v0  ;;  %v2312_v12 = vld [vmem:[#allocation5 + $0x28] sm:$0xff]   ;;  %v2313_v13 = vld [vmem:[#allocation5 + $0x70] sm:$0xff]   ;;  %v2315_v15 = vld [vmem:[#allocation5 + $0x78] sm:$0xff]   ;;  %vm801_vm1 = vcmp.lt.s32.totalorder %v3041_v43, 1  ;;  %vm576_vm2 = vcmp.ne.s32.totalorder %v3041_v43, 0  ;;  %v3052_v59 = vadd.s32 8, %v3041_v43 }
  0xc4   : > { %v2314_v14 = vld [vmem:[#allocation5 + $0x30] sm:$0xff]   ;;  %v2316_v16 = vld [vmem:[#allocation5 + $0x38] sm:$0xff]   ;;  %v2318_v18 = vld [vmem:[#allocation5 + $0x80] sm:$0xff]   ;;  %vm920_vm3 = vcmp.lt.s32.totalorder %v3041_v43, 7  ;;  %s571_s23 = scalar_lea.vmem %s3193_s1, %s570_s11  ;;  %s3238_s10 = sld [smem:[#allocation22_spill]] }
  0xc5   : > { %v2317_v17 = vld [vmem:[%s2969_s24] sm:$0xff]   ;;  %v2319_v19 = vld [vmem:[#allocation5 + $0x88] sm:$0xff]   ;;  %v2322_v22 = vld [vmem:[#allocation5 + $0xa0] sm:$0xff]   ;;  %vm579_vm4 = vcmp.ne.s32.totalorder %v3052_v59, 15  ;;  %s3239_s7 = sld [smem:[#allocation23_spill]]  ;;  %s3240_s26 = sld [smem:[#allocation24_spill]] }
  0xc6   : > { %2017 = vmatpush3.bf16.msra.mxu0 %v2303_v3  ;;  %2037 = vmatpush3.bf16.msra.mxu1 %v2304_v4  ;;  %v2320_v20 = vld [vmem:[#allocation5 + $0x90] sm:$0xff]   ;;  %v2321_v21 = vld [vmem:[#allocation5 + $0x98] sm:$0xff]   ;;  %v2323_v23 = vld [vmem:[#allocation5 + $0xa8] sm:$0xff]   ;;  %s568_s28 = scalar_lea.vmem [#allocation13], %s2965_s22  ;;  %s3241_s11 = sld [smem:[#allocation25_spill]] }
  0xc7   : > { %2018 = vmatprep.subr.bf16.mxu0 %v2638_v0  ;;  %2038 = vmatprep.subr.bf16.mxu1 %v2638_v0  ;;  %v2324_v24 = vld [vmem:[#allocation5 + $0xb0] sm:$0xff]   ;;  %v2325_v25 = vld [vmem:[#allocation5 + $0xb8] sm:$0xff]   ;;  %v2326_v26 = vld [vmem:[#allocation7 + $0x40] sm:$0xff]   ;;  %s1710_s24 = sshll.u32 %s568_s28, 4  ;;  %s1698_s2 = scalar_lea.sflag [#allocation4], %s2965_s22  ;;  %s3150_s24 = int_to_ptr.vmem [resolvable:$true] %s1710_s24 }
  0xc8   : > { %v2327_v27 = vld [vmem:[#allocation7] sm:$0xff]   ;;  %v2328_v28 = vld [vmem:[#allocation7 + $0x48] sm:$0xff]   ;;  %v2330_v30 = vld [vmem:[#allocation7 + $0x50] sm:$0xff]   ;;  %p3242_p12 = scmp.ne.s32.totalorder %s3225_s27, 0 }
  0xc9   : > { %v2329_v29 = vld [vmem:[#allocation7 + $0x8] sm:$0xff]   ;;  %v2331_v31 = vld [vmem:[#allocation7 + $0x10] sm:$0xff]   ;;  %v2332_v32 = vld [vmem:[#allocation7 + $0x58] sm:$0xff]  }
  0xca   : > { %2019 = vmatpush3.bf16.msra.mxu0 %v2305_v5  ;;  %2039 = vmatpush3.bf16.msra.mxu1 %v2306_v6  ;;  %v2333_v33 = vld [vmem:[#allocation7 + $0x18] sm:$0xff]   ;;  %v2334_v34 = vld [vmem:[#allocation7 + $0x60] sm:$0xff]   ;;  %v2336_v36 = vld [vmem:[#allocation7 + $0x68] sm:$0xff]  }
  0xcb   : > { %2020 = vmatprep.subr.bf16.mxu0 %v2638_v0  ;;  %2040 = vmatprep.subr.bf16.mxu1 %v2638_v0  ;;  %v2335_v35 = vld [vmem:[#allocation7 + $0x20] sm:$0xff]   ;;  %v2337_v37 = vld [vmem:[#allocation7 + $0x28] sm:$0xff]   ;;  %v2338_v38 = vld [vmem:[#allocation7 + $0x70] sm:$0xff]  }
  0xcc   : > { %v2339_v39 = vld [vmem:[#allocation7 + $0x30] sm:$0xff]   ;;  %v2340_v40 = vld [vmem:[#allocation7 + $0x78] sm:$0xff]  }
  0xcd   : > { %v2341_v41 = vld [vmem:[#allocation7 + $0x38] sm:$0xff]   ;;  %v1876_v5 = vld [vmem:[%s3195_s3] ss:$0 sm:$0xff] }
  0xce   : > { %2021 = vmatpush3.bf16.msra.mxu0 %v2307_v7  ;;  %2041 = vmatpush3.bf16.msra.mxu1 %v2308_v8  ;;  %v2357_v59 = vld [vmem:[#allocation8 + $0x38] sm:$0xff]  }
  0xcf   : > { %2022 = vmatprep.subr.bf16.mxu0 %v2638_v0  ;;  %2042 = vmatprep.subr.bf16.mxu1 %v2638_v0 }
  0xd2   : > { %2023 = vmatpush3.bf16.msra.mxu0 %v2309_v9  ;;  %2043 = vmatpush3.bf16.msra.mxu1 %v2310_v10 }
  0xd3   : > { %2024 = vmatprep.subr.bf16.mxu0 %v2638_v0  ;;  %2044 = vmatprep.subr.bf16.mxu1 %v2638_v0 }
  0xd6   : > { %2025 = vmatpush3.bf16.msra.mxu0 %v2311_v11  ;;  %2045 = vmatpush3.bf16.msra.mxu1 %v2312_v12 }
  0xd7   : > { %2026 = vmatprep.subr.bf16.mxu0 %v2638_v0  ;;  %2046 = vmatprep.subr.bf16.mxu1 %v2638_v0 }
  0xda   : > { %2027 = vmatpush3.bf16.msra.mxu0 %v2313_v13  ;;  %2047 = vmatpush3.bf16.msra.mxu1 %v2314_v14  ;;  %v2342_v13 = vld [vmem:[#allocation7 + $0x80] sm:$0xff]  }
  0xdb   : > { %2028 = vmatprep.subr.bf16.mxu0 %v2638_v0  ;;  %2048 = vmatprep.subr.bf16.mxu1 %v2638_v0 }
  0xde   : > { %2029 = vmatpush3.bf16.msra.mxu0 %v2315_v15  ;;  %2049 = vmatpush3.bf16.msra.mxu1 %v2316_v16  ;;  %v2343_v15 = vld [vmem:[#allocation7 + $0x88] sm:$0xff]   ;;  %v2344_v16 = vld [vmem:[#allocation7 + $0x90] sm:$0xff]  }
  0xdf   : > { %2054 = vmatprep.subr.bf16.mxu0 %v2638_v0  ;;  %2074 = vmatprep.subr.bf16.mxu1 %v2638_v0 }
  0xe1   : > { %2031 = vmatmul.mubr.bf16.vlgmr.msra.gmra.mrb[0].mxu0 %v2317_v17  ;;  %2051 = vmatmul.mubr.bf16.vlgmr.msra.gmra.mrb[0].mxu1 %v2317_v17 }
  0xe2   : > { %2055 = vmatpush3.bf16.msra.mxu0 %v2318_v18  ;;  %2070 = vmatprep.mubr.msk.bf16.mxu0 %vm2639_vm0, %v2638_v0  ;;  %v2346_v18 = vld [vmem:[#allocation7 + $0xa0] sm:$0xff]  }
  0xe3   : > { %2056 = vmatprep.subr.bf16.mxu0 %v2638_v0  ;;  %2090 = vmatprep.mubr.msk.bf16.mxu1 %vm2639_vm0, %v2638_v0 }
  0xe4   : > { %2075 = vmatpush3.bf16.msra.mxu1 %v2326_v26  ;;  %v2352_v26 = vld [vmem:[#allocation8 + $0x10] sm:$0xff]  }
  0xe5   : > { %2076 = vmatprep.subr.bf16.mxu1 %v2638_v0 }
  0xe6   : > { %2057 = vmatpush3.bf16.msra.mxu0 %v2319_v19  ;;  %v2347_v19 = vld [vmem:[#allocation7 + $0xa8] sm:$0xff]  }
  0xe7   : > { %2058 = vmatprep.subr.bf16.mxu0 %v2638_v0 }
  0xe8   : > { %2077 = vmatpush3.bf16.msra.mxu1 %v2328_v28  ;;  %v2354_v28 = vld [vmem:[#allocation8 + $0x20] sm:$0xff]  }
  0xe9   : > { %2078 = vmatprep.subr.bf16.mxu1 %v2638_v0 }
  0xea   : > { %2059 = vmatpush3.bf16.msra.mxu0 %v2320_v20  ;;  %v2348_v20 = vld [vmem:[#allocation7 + $0xb0] sm:$0xff]  }
  0xeb   : > { %2060 = vmatprep.subr.bf16.mxu0 %v2638_v0 }
  0xec   : > { %2079 = vmatpush3.bf16.msra.mxu1 %v2330_v30  ;;  %v2356_v30 = vld [vmem:[#allocation8 + $0x30] sm:$0xff]  }
  0xed   : > { %2080 = vmatprep.subr.bf16.mxu1 %v2638_v0 }
  0xee   : > { %2061 = vmatpush3.bf16.msra.mxu0 %v2321_v21  ;;  %v2349_v21 = vld [vmem:[#allocation7 + $0xb8] sm:$0xff]  }
  0xef   : > { %2062 = vmatprep.subr.bf16.mxu0 %v2638_v0 }
  0xf0   : > { %2081 = vmatpush3.bf16.msra.mxu1 %v2332_v32 }
  0xf1   : > { %2082 = vmatprep.subr.bf16.mxu1 %v2638_v0 }
  0xf2   : > { %2063 = vmatpush3.bf16.msra.mxu0 %v2322_v22  ;;  %v1288_v22 = vld [vmem:[%s571_s23] sm:$0x1]  ;;  %s2640_s23 = smov [#allocation13]  }
  0xf3   : > { %2064 = vmatprep.subr.bf16.mxu0 %v2638_v0 }
  0xf4   : > { %2083 = vmatpush3.bf16.msra.mxu1 %v2334_v34 }
  0xf5   : > { %2084 = vmatprep.subr.bf16.mxu1 %v2638_v0 }
  0xf6   : > { %2065 = vmatpush3.bf16.msra.mxu0 %v2323_v23  ;;  %v2350_v23 = vld [vmem:[#allocation8] sm:$0xff]  }
  0xf7   : > { %2066 = vmatprep.subr.bf16.mxu0 %v2638_v0 }
  0xf8   : > { %2085 = vmatpush3.bf16.msra.mxu1 %v2336_v36 }
  0xf9   : > { %2086 = vmatprep.subr.bf16.mxu1 %v2638_v0 }
  0xfa   : > { %2067 = vmatpush3.bf16.msra.mxu0 %v2324_v24  ;;  %v1290_v24 = vsel %vm1289_vm5, %v1288_v22, 0.0 }
  0xfb   : > { %2068 = vmatprep.subr.bf16.mxu0 %v2638_v0  ;;  %1291 = vadd.xlane.f32.xlu0 %v1290_v24 }
  0xfc   : > { %2087 = vmatpush3.bf16.msra.mxu1 %v2338_v38 }
  0xfd   : > { %2088 = vmatprep.subr.bf16.mxu1 %v2638_v0 }
  0xfe   : > { %2069 = vmatpush3.bf16.msra.mxu0 %v2325_v25  ;;  %v2351_v25 = vld [vmem:[#allocation8 + $0x8] sm:$0xff]  }
  0xff   : > { %2094 = vmatprep.subr.bf16.mxu0 %v2638_v0 }
 0x100   : > { %2089 = vmatpush3.bf16.msra.mxu1 %v2340_v40 }
 0x101   : > { %2071 = vmatmul.mubr.bf16.vlgmr.msra.gmra.mrb[4].mxu0 %v2317_v17  ;;  %2114 = vmatprep.subr.bf16.mxu1 %v2638_v0  ;;  %v2345_v17 = vld [vmem:[#allocation7 + $0x98] sm:$0xff]  }
 0x102   : > { %2110 = vmatprep.mubr.msk.bf16.mxu0 %vm2639_vm0, %v2638_v0  ;;  %2095 = vmatpush3.bf16.msra.mxu0 %v2327_v27  ;;  %v2353_v27 = vld [vmem:[#allocation8 + $0x18] sm:$0xff]  }
 0x103   : > { %2096 = vmatprep.subr.bf16.mxu0 %v2638_v0 }
 0x106   : > { %2097 = vmatpush3.bf16.msra.mxu0 %v2329_v29  ;;  %v2355_v29 = vld [vmem:[#allocation8 + $0x28] sm:$0xff]  }
 0x107   : > { %2098 = vmatprep.subr.bf16.mxu0 %v2638_v0 }
 0x10a   : > { %2099 = vmatpush3.bf16.msra.mxu0 %v2331_v31 }
 0x10b   : > { %2100 = vmatprep.subr.bf16.mxu0 %v2638_v0 }
 0x10e   : > { %2101 = vmatpush3.bf16.msra.mxu0 %v2333_v33 }
 0x10f   : > { %2102 = vmatprep.subr.bf16.mxu0 %v2638_v0 }
 0x112   : > { %2103 = vmatpush3.bf16.msra.mxu0 %v2335_v35 }
 0x113   : > { %2104 = vmatprep.subr.bf16.mxu0 %v2638_v0 }
 0x116   : > { %2105 = vmatpush3.bf16.msra.mxu0 %v2337_v37 }
 0x117   : > { %2106 = vmatprep.subr.bf16.mxu0 %v2638_v0 }
 0x11a   : > { %2107 = vmatpush3.bf16.msra.mxu0 %v2339_v39 }
 0x11b   : > { %2108 = vmatprep.subr.bf16.mxu0 %v2638_v0 }
 0x11e   : > { %2109 = vmatpush3.bf16.msra.mxu0 %v2341_v41 }
 0x11f   : > { %2134 = vmatprep.subr.bf16.mxu0 %v2638_v0 }
 0x1b4   : > { %v687_v44 = vpop.f32.mrb[0].mxu0  ;;  %v792_v45 = vpop.f32.mrb[0].mxu1 }
 0x1b5   : > { %v2032_v46 = vpop.f32.mrb[1].mxu0  ;;  %v799_v47 = vrot.slane %v792_v45, 7  ;;  %v2052_v48 = vpop.f32.mrb[1].mxu1 }
 0x1b6   : > { %v690_v49 = vpop.f32.mrb[2].mxu0  ;;  %v795_v50 = vpop.f32.mrb[2].mxu1  ;;  %v1296_v48 = vmul.u32 16, %v3041_v43 }
 0x1b7   : > { %v2033_v51 = vpop.f32.mrb[3].mxu0  ;;  %v800_v52 = vrot.slane %v795_v50, 7  ;;  %v2053_v53 = vpop.f32.mrb[3].mxu1 }
 0x1b8   : > { %v1295_v51 = vand.u32 127, %v573_v42 }
 0x1b9   : > { %v802_v54 = vsel %vm801_vm1, %v799_v47, %v800_v52  ;;  %v803_v55 = vsel %vm801_vm1, %v800_v52, %v799_v47  ;;  %v1298_v52 = vadd.s32 16, %v1296_v48 }
 0x1ba   : > { %v808_v56 = vsel %vm576_vm2, %v803_v55, 0.0  ;;  %v811_v57 = vadd.f32 %v802_v54, %v690_v49  ;;  %vm1297_vm6 = vcmp.ge.s32.totalorder %v1295_v51, %v1296_v48 }
 0x1bb   : > { %v810_v58 = vadd.f32 %v808_v56, %v687_v44  ;;  %vm1299_vm7 = vcmp.lt.s32.totalorder %v1295_v51, %v1298_v52 }
 0x1bc   : > { %vm1300_vm8 = vmand %vm1297_vm6, %vm1299_vm7 }
 0x1d4   : > { %v911_v60 = vpop.f32.mrb[4].mxu0 }
 0x1d5   : > { %v2072_v61 = vpop.f32.mrb[5].mxu0  ;;  %v918_v63 = vrot.slane %v911_v60, 1  ;;  %v1901_v60 = vld [vmem:[%s3197_s5] ss:$0 sm:$0xff] }
 0x1d6   : > { %v914_v62 = vpop.f32.mrb[6].mxu0 }
 0x1d7   : > { %v919_v1 = vrot.slane %v914_v62, 1  ;;  %v2073_v2 = vpop.f32.mrb[7].mxu0 }
 0x1d9   : > { %v921_v3 = vsel %vm920_vm3, %v918_v63, %v919_v1  ;;  %v922_v4 = vsel %vm920_vm3, %v919_v1, %v918_v63 }
 0x1da   : > { %v928_v6 = vsel %vm579_vm4, %v922_v4, 0.0  ;;  %v929_v7 = vadd.f32 %v921_v3, %v810_v58  ;;  %v1301_v4 = vsel %vm1300_vm8, %v1288_v22, 0.0  ;;  %v2365_v22 = vld [vmem:[#allocation10 + $0x38] sm:$0xff]  }
 0x1db   : > { %v930_v8 = vadd.f32 %v928_v6, %v811_v57  ;;  %v1302_v43 = vpack.c.bf16 %v1301_v4, %v1301_v4  ;;  %v2358_v6 = vld [vmem:[#allocation10] sm:$0xff]  }
 0x1dc   : > { %v938_v9 = vadd.f32 %v1876_v5, %v929_v7  ;;  %v1292_v7 = vpop.xlane.xlu0 %1291 }
 0x1dd   : > { %v939_v10 = vadd.f32 %v1876_v5, %v930_v8  ;;  %v1293_v8 = vmax.f32 %v1292_v7, 1e-09 }
 0x1de   : > { %v940_v11 = vmax.f32 %v938_v9, 0.0 }
 0x1df   : > { %v941_v12 = vmax.f32 %v939_v10, 0.0  ;;  %2374 = vrcp.f32 %v1293_v8 }
 0x1e1   : > { %v942_v14 = vpack.c.bf16 %v941_v12, %v940_v11 }
 0x1e3   : > { %2091 = vmatmul.mubr.bf16.vlgmr.msra.gmra.mrb[4].mxu1 %v942_v14  ;;  %2111 = vmatmul.mubr.bf16.vlgmr.msra.gmra.mrb[8].mxu0 %v942_v14 }
 0x1e4   : > { %2115 = vmatpush3.bf16.msra.mxu1 %v2342_v13  ;;  %2130 = vmatprep.mubr.msk.bf16.mxu1 %vm2639_vm0, %v2638_v0 }
 0x1e5   : > { %2116 = vmatprep.subr.bf16.mxu1 %v2638_v0  ;;  %2136 = vmatprep.mubr.msk.bf16.mxu0 %vm2639_vm0, %v2638_v0 }
 0x1e8   : > { %2117 = vmatpush3.bf16.msra.mxu1 %v2343_v15 }
 0x1e9   : > { %2118 = vmatprep.subr.bf16.mxu1 %v2638_v0  ;;  %v2375_v9 = vpop.eup %2374 }
 0x1ec   : > { %2119 = vmatpush3.bf16.msra.mxu1 %v2344_v16  ;;  %v2359_v16 = vld [vmem:[#allocation10 + $0x8] sm:$0xff]  }
 0x1ed   : > { %2120 = vmatprep.subr.bf16.mxu1 %v2638_v0 }
 0x1f0   : > { %2121 = vmatpush3.bf16.msra.mxu1 %v2345_v17  ;;  %v2360_v17 = vld [vmem:[#allocation10 + $0x10] sm:$0xff]  }
 0x1f1   : > { %2122 = vmatprep.subr.bf16.mxu1 %v2638_v0 }
 0x1f4   : > { %2123 = vmatpush3.bf16.msra.mxu1 %v2346_v18  ;;  %v2361_v18 = vld [vmem:[#allocation10 + $0x18] sm:$0xff]  }
 0x1f5   : > { %2124 = vmatprep.subr.bf16.mxu1 %v2638_v0 }
 0x1f8   : > { %2125 = vmatpush3.bf16.msra.mxu1 %v2347_v19  ;;  %v2362_v19 = vld [vmem:[#allocation10 + $0x20] sm:$0xff]  }
 0x1f9   : > { %2126 = vmatprep.subr.bf16.mxu1 %v2638_v0 }
 0x1fc   : > { %2127 = vmatpush3.bf16.msra.mxu1 %v2348_v20  ;;  %v2363_v20 = vld [vmem:[#allocation10 + $0x28] sm:$0xff]  }
 0x1fd   : > { %2128 = vmatprep.subr.bf16.mxu1 %v2638_v0 }
 0x200   : > { %2129 = vmatpush3.bf16.msra.mxu1 %v2349_v21  ;;  %v2364_v21 = vld [vmem:[#allocation10 + $0x30] sm:$0xff]  }
 0x201   : > { %2140 = vmatprep.subr.bf16.mxu1 %v2638_v0 }
 0x203   : > { %2131 = vmatmul.mubr.bf16.vlgmr.msra.gmra.mrb[8].mxu1 %v942_v14 }
 0x204   : > { %2156 = vmatprep.mubr.msk.bf16.mxu1 %vm2639_vm0, %v2638_v0  ;;  %2141 = vmatpush3.bf16.msra.mxu1 %v2350_v23  ;;  %v1366_v23 = vld [vmem:[%s3236_s25] sm:$0x1]  ;;  %s1927_s25 = sshll.u32 %s2737_s19, 4  ;;  %s2550_s19 = scalar_lea.vmem %s3150_s24, 16 }
 0x205   : > { %2142 = vmatprep.subr.bf16.mxu1 %v2638_v0  ;;  %p2551_p4 = scmp.ne.s32.totalorder %s3150_s24, %s2550_s19 }
 0x207   : > { %p2552_p1 = pnand %p2551_p4, %p3242_p12 }
 0x208   : > { %2143 = vmatpush3.bf16.msra.mxu1 %v2351_v25 }
 0x209   : > { %2144 = vmatprep.subr.bf16.mxu1 %v2638_v0  ;;  %p2553_p13 = pneg %p2552_p1 }
 0x20c   : > { %2145 = vmatpush3.bf16.msra.mxu1 %v2352_v26 }
 0x20d   : > { %2146 = vmatprep.subr.bf16.mxu1 %v2638_v0 }
 0x210   : > { %2147 = vmatpush3.bf16.msra.mxu1 %v2353_v27 }
 0x211   : > { %2148 = vmatprep.subr.bf16.mxu1 %v2638_v0 }
 0x214   : > { %2149 = vmatpush3.bf16.msra.mxu1 %v2354_v28 }
 0x215   : > { %2150 = vmatprep.subr.bf16.mxu1 %v2638_v0 }
 0x218   : > { %2151 = vmatpush3.bf16.msra.mxu1 %v2355_v29 }
 0x219   : > { %2152 = vmatprep.subr.bf16.mxu1 %v2638_v0 }
 0x21c   : > { %2153 = vmatpush3.bf16.msra.mxu1 %v2356_v30 }
 0x21d   : > { %2154 = vmatprep.subr.bf16.mxu1 %v2638_v0 }
 0x220   : > { %2155 = vmatpush3.bf16.msra.mxu1 %v2357_v59 }
 0x221   : > { %2180 = vmatprep.subr.bf16.mxu1 %v2638_v0 }
 0x2b6   : > { %v1042_v31 = vpop.f32.mrb[4].mxu1  ;;  %v1147_v32 = vpop.f32.mrb[8].mxu0 }
 0x2b7   : > { %v2092_v33 = vpop.f32.mrb[5].mxu1  ;;  %v2112_v34 = vpop.f32.mrb[9].mxu0  ;;  %v1154_v37 = vrot.slane %v1147_v32, 7 }
 0x2b8   : > { %v1045_v35 = vpop.f32.mrb[6].mxu1  ;;  %v1150_v36 = vpop.f32.mrb[10].mxu0 }
 0x2b9   : > { %v1155_v38 = vrot.slane %v1150_v36, 7  ;;  %v2093_v39 = vpop.f32.mrb[7].mxu1  ;;  %v2113_v40 = vpop.f32.mrb[11].mxu0 }
 0x2ba   : > { %v1481_v39 = vld [vmem:[%s3237_s20] sm:$0x1] }
 0x2bb   : > { %v1156_v41 = vsel %vm801_vm1, %v1154_v37, %v1155_v38  ;;  %v1157_v44 = vsel %vm801_vm1, %v1155_v38, %v1154_v37 }
 0x2bc   : > { %v1158_v45 = vsel %vm576_vm2, %v1157_v44, 0.0  ;;  %v1161_v46 = vadd.f32 %v1156_v41, %v1045_v35 }
 0x2bd   : > { %v1160_v47 = vadd.f32 %v1158_v45, %v1042_v31 }
 0x2d6   : > { %v1261_v49 = vpop.f32.mrb[8].mxu1 }
 0x2d7   : > { %v2132_v50 = vpop.f32.mrb[9].mxu1  ;;  %v1268_v54 = vrot.slane %v1261_v49, 1  ;;  %v2366_v49 = vld [vmem:[#allocation11] sm:$0xff]  }
 0x2d8   : > { %v1264_v53 = vpop.f32.mrb[10].mxu1  ;;  %v2367_v50 = vld [vmem:[#allocation11 + $0x8] sm:$0xff]  }
 0x2d9   : > { %v1269_v55 = vrot.slane %v1264_v53, 1  ;;  %v2133_v56 = vpop.f32.mrb[11].mxu1 }
 0x2da   : > { %v2368_v56 = vld [vmem:[#allocation11 + $0x10] sm:$0xff]  }
 0x2db   : > { %v1270_v57 = vsel %vm920_vm3, %v1268_v54, %v1269_v55  ;;  %v1271_v58 = vsel %vm920_vm3, %v1269_v55, %v1268_v54 }
 0x2dc   : > { %v1273_v42 = vsel %vm579_vm4, %v1271_v58, 0.0  ;;  %v1274_v61 = vadd.f32 %v1270_v57, %v1160_v47  ;;  %v2369_v57 = vld [vmem:[#allocation11 + $0x18] sm:$0xff]   ;;  %v2370_v58 = vld [vmem:[#allocation11 + $0x20] sm:$0xff]  }
 0x2dd   : > { %v1275_v62 = vadd.f32 %v1273_v42, %v1161_v46  ;;  %v2372_v42 = vld [vmem:[#allocation11 + $0x30] sm:$0xff]  }
 0x2de   : > { %v1283_v63 = vadd.f32 %v1901_v60, %v1274_v61  ;;  %v2373_v61 = vld [vmem:[#allocation11 + $0x38] sm:$0xff]  }
 0x2df   : > { %v1284_v1 = vadd.f32 %v1901_v60, %v1275_v62  ;;  %v2371_v60 = vld [vmem:[#allocation11 + $0x28] sm:$0xff]  }
 0x2e0   : > { %v1285_v2 = vmax.f32 %v1283_v63, 0.0 }
 0x2e1   : > { %v1286_v3 = vmax.f32 %v1284_v1, 0.0 }
 0x2e3   : > { %v1287_v5 = vpack.c.bf16 %v1286_v3, %v1285_v2  ;;  %v1586_v3 = vld [vmem:[%s3238_s10] sm:$0x1]  ;;  %s3148_s10 = scalar_lea.hbm %s3241_s11, %s1927_s25 }
 0x2e5   : > { %2135 = vmatpush3.bf16.msra.mxu0 %v1287_v5  ;;  %v1588_v5 = vld [vmem:[%s3239_s7] sm:$0x1]  ;;  %s2554_s7 = sshll.u32 %s2640_s23, 4  ;;  %s2555_s7 = int_to_ptr.vmem [resolvable:$false] %s2554_s7 }
 0x2e6   : > { %2160 = vmatprep.subr.bf16.mxu0 %v2638_v0  ;;  %s2556_s14 = scalar_lea.vmem %s2555_s7, 32  ;;  %p2557_p0 = scmp.lt.s32.totalorder %s3150_s24, %s2555_s7 }
 0x2e7   : > { %p2558_p2 = scmp.lt.s32.totalorder %s2556_s14, %s2550_s19 }
 0x2e8   : > { %2137 = vmatmul.mubr.msk.bf16.vlgmr.msra.gmra.mrb[12].mxu0 %vm1303_vm9, %v1302_v43 }
 0x2e9   : > { %2176 = vmatprep.mubr.msk.bf16.mxu0 %vm2639_vm0, %v2638_v0  ;;  %2161 = vmatpush3.bf16.msra.mxu0 %v2358_v6  ;;  %v1607_v6 = vld [vmem:[%s3240_s26] sm:$0x1]  ;;  %p2559_p8 = por %p2558_p2, %p2557_p0 }
 0x2ea   : > { %2162 = vmatprep.subr.bf16.mxu0 %v2638_v0 }
 0x2eb   : > { %p2560_p6 = pnand %p2559_p8, %p2553_p13 }
 0x2ed   : > { %2163 = vmatpush3.bf16.msra.mxu0 %v2359_v16 }
 0x2ee   : > { %2164 = vmatprep.subr.bf16.mxu0 %v2638_v0 }
 0x2f1   : > { %2165 = vmatpush3.bf16.msra.mxu0 %v2360_v17 }
 0x2f2   : > { %2166 = vmatprep.subr.bf16.mxu0 %v2638_v0 }
 0x2f5   : > { %2167 = vmatpush3.bf16.msra.mxu0 %v2361_v18 }
 0x2f6   : > { %2168 = vmatprep.subr.bf16.mxu0 %v2638_v0 }
 0x2f9   : > { %2169 = vmatpush3.bf16.msra.mxu0 %v2362_v19 }
 0x2fa   : > { %2170 = vmatprep.subr.bf16.mxu0 %v2638_v0 }
 0x2fd   : > { %2171 = vmatpush3.bf16.msra.mxu0 %v2363_v20 }
 0x2fe   : > { %2172 = vmatprep.subr.bf16.mxu0 %v2638_v0 }
 0x301   : > { %2173 = vmatpush3.bf16.msra.mxu0 %v2364_v21 }
 0x302   : > { %2174 = vmatprep.subr.bf16.mxu0 %v2638_v0 }
 0x305   : > { %2175 = vmatpush3.bf16.msra.mxu0 %v2365_v22 }
 0x3bb   : > { %v1341_v10 = vpop.f32.mrb[12].mxu0 }
 0x3bc   : > { %v1348_v11 = vmul.f32 %v2375_v9, %v1341_v10  ;;  %v2138_v12 = vpop.f32.mrb[13].mxu0 }
 0x3bd   : > { %v1344_v13 = vpop.f32.mrb[14].mxu0 }
 0x3be   : > { %v1349_v14 = vpack.c.bf16 %v1348_v11, %v1348_v11  ;;  %v2139_v15 = vpop.f32.mrb[15].mxu0 }
 0x3c0   : > { %2157 = vmatmul.mubr.bf16.vlgmr.msra.gmra.mrb[12].mxu1 %v1349_v14 }
 0x3c1   : > { %2196 = vmatprep.mubr.msk.bf16.mxu1 %vm2639_vm0, %v2638_v0  ;;  %2181 = vmatpush3.bf16.msra.mxu1 %v2366_v49 }
 0x3c2   : > { %2182 = vmatprep.subr.bf16.mxu1 %v2638_v0 }
 0x3c5   : > { %2183 = vmatpush3.bf16.msra.mxu1 %v2367_v50 }
 0x3c6   : > { %2184 = vmatprep.subr.bf16.mxu1 %v2638_v0 }
 0x3c9   : > { %2185 = vmatpush3.bf16.msra.mxu1 %v2368_v56 }
 0x3ca   : > { %2186 = vmatprep.subr.bf16.mxu1 %v2638_v0 }
 0x3cd   : > { %2187 = vmatpush3.bf16.msra.mxu1 %v2369_v57 }
 0x3ce   : > { %2188 = vmatprep.subr.bf16.mxu1 %v2638_v0 }
 0x3d1   : > { %2189 = vmatpush3.bf16.msra.mxu1 %v2370_v58 }
 0x3d2   : > { %2190 = vmatprep.subr.bf16.mxu1 %v2638_v0 }
 0x3d5   : > { %2191 = vmatpush3.bf16.msra.mxu1 %v2371_v60 }
 0x3d6   : > { %2192 = vmatprep.subr.bf16.mxu1 %v2638_v0 }
 0x3d9   : > { %2193 = vmatpush3.bf16.msra.mxu1 %v2372_v42 }
 0x3da   : > { %2194 = vmatprep.subr.bf16.mxu1 %v2638_v0 }
 0x3dd   : > { %2195 = vmatpush3.bf16.msra.mxu1 %v2373_v61 }
 0x493   : > { %v1449_v24 = vpop.f32.mrb[12].mxu1 }
 0x494   : > { %v1450_v25 = vadd.f32 %v1449_v24, %v1366_v23  ;;  %v2158_v26 = vpop.f32.mrb[13].mxu1 }
 0x495   : > { %v1452_v27 = vpop.f32.mrb[14].mxu1 }
 0x496   : > { %v1456_v28 = vmul.f32 0.044715, %v1450_v25  ;;  %v2159_v29 = vpop.f32.mrb[15].mxu1  ;;  %v1455_v35 = vmul.f32 0.5, %v1450_v25 }
 0x498   : > { %v1457_v30 = vmul.f32 %v1456_v28, %v1450_v25 }
 0x49a   : > { %v1458_v31 = vmul.f32 %v1457_v30, %v1450_v25 }
 0x49c   : > { %v1459_v32 = vadd.f32 %v1458_v31, %v1450_v25 }
 0x49e   : > { %v1460_v33 = vmul.f32 0.7978846, %v1459_v32 }
 0x4a0   : > { %2376 = vtanh.f32 %v1460_v33 }
 0x4aa   : > { %v2377_v34 = vpop.eup %2376 }
 0x4ab   : > { %v1462_v36 = vadd.f32 1.0, %v2377_v34 }
 0x4ad   : > { %v1463_v37 = vmul.f32 %v1462_v36, %v1455_v35 }
 0x4af   : > { %v1464_v38 = vpack.c.bf16 %v1463_v37, %v1463_v37 }
 0x4b1   : > { %2177 = vmatmul.mubr.bf16.vlgmr.msra.gmra.mrb[16].mxu0 %v1464_v38 }
 0x584   : > { %v1564_v40 = vpop.f32.mrb[16].mxu0 }
 0x585   : > { %v1565_v41 = vadd.f32 %v1564_v40, %v1481_v39  ;;  %v2178_v44 = vpop.f32.mrb[17].mxu0 }
 0x586   : > { %v1567_v45 = vpop.f32.mrb[18].mxu0 }
 0x587   : > { %v2179_v46 = vpop.f32.mrb[19].mxu0  ;;  %v1570_v47 = vadd.f32 %v1565_v41, %v1450_v25 }
 0x589   : > { %v1572_v48 = vsel %vm1571_vm10, %v1570_v47, 0.0 }
 0x58a   : > { %1573 = vadd.xlane.f32.xlu0 %v1572_v48 }
 0x617   : > { %v1574_v51 = vpop.xlane.xlu0 %1573 }
 0x618   : > { %v1576_v52 = vmul.f32 0.0078125, %v1574_v51 }
 0x61a   : > { %v1577_v53 = vsub.f32 %v1570_v47, %v1576_v52 }
 0x61c   : > { %v1578_v54 = vmul.f32 %v1577_v53, %v1577_v53 }
 0x61e   : > { %v1579_v55 = vsel %vm1571_vm10, %v1578_v54, 0.0 }
 0x61f   : > { %1580 = vadd.xlane.f32.xlu1 %v1579_v55 }
 0x6ac   : > { %v1581_v62 = vpop.xlane.xlu1 %1580 }
 0x6ad   : > { %v1582_v63 = vmul.f32 0.0078125, %v1581_v62 }
 0x6af   : > { %v1583_v1 = vadd.f32 1e-05, %v1582_v63 }
 0x6b1   : > { %2378 = vrsqrt.f32 %v1583_v1 }
 0x6bb   : > { %v2379_v2 = vpop.eup %2378 }
 0x6bc   : > { %v1585_v4 = vmul.f32 %v2379_v2, %v1577_v53 }
 0x6be   : > { %v1587_v43 = vmul.f32 %v1586_v3, %v1585_v4 }
 0x6c0   : > { %v1589_v59 = vadd.f32 %v1588_v5, %v1587_v43 }
 0x6c2   : > { %v1590_v0 = vpack.c.bf16 %v1589_v59, %v1589_v59 }
 0x6c4   : > { %2197 = vmatmul.mubr.bf16.vlgmr.msra.gmra.mrb[16].mxu1 %v1590_v0 }
 0x797   : > { %v1690_v7 = vpop.f32.mrb[16].mxu1 }
 0x798   : > { %v1691_v8 = vadd.f32 %v1690_v7, %v1607_v6  ;;  %v2198_v9 = vpop.f32.mrb[17].mxu1 }
 0x799   : > { %v1693_v10 = vpop.f32.mrb[18].mxu1 }
 0x79a   : > { %1696 = vst [vmem:[%s568_s28] sm:$0x1] %v1691_v8  ;;  %v2199_v11 = vpop.f32.mrb[19].mxu1 }
 0x79b   : > { %2563 = shalt.err (!%p2560_p6)
}
 0x79c   : > { %s2564_s22 = scalar_lea.hbm %s3148_s10, 16  ;;  %s2568_s25 = scalar_lea.hbm %s3241_s11, 32 }
 0x79d   : > { %p2565_p10 = scmp.ne.s32.totalorder %s3148_s10, %s2564_s22  ;;  %p2569_p5 = scmp.lt.u32.totalorder %s3148_s10, %s3241_s11 }
 0x79e   : > { %p2570_p9 = scmp.lt.u32.totalorder %s2568_s25, %s2564_s22  ;;  %p2572_p4 = scmp.lt.u32.totalorder %s2564_s22, %s3148_s10 }
 0x79f   : > { %p2566_p11 = pnand %p2565_p10, %p3242_p12 }
 0x7a0   : > { %p2571_p7 = por %p2570_p9, %p2569_p5 }
 0x7a1   : > { %p2567_p3 = pneg %p2566_p11 }
 0x7a2   : > { %p2573_p1 = por %p2572_p4, %p2571_p7 }
 0x7a4   : > { %p2574_p13 = pnand %p2573_p1, %p2567_p3 }
 0x7a6   : > { %2577 = shalt.err (!%p2574_p13)
}
 0x7a7   : > { %2222 = dma.vmem_to_hbm [thread:$0]  (%p3242_p12), %s3150_s24, 16, %s3148_s10, %s1698_s2  }
 0x7a8 PF: > { %s1722_s13 = sand.u32 1, %s2616_s29   ;;  %p3243_p0 = scmp.ne.s32.totalorder %s3226_s17, 0 }
 0x7a9   : > { %p3244_p2 = scmp.ge.s32.totalorder %s2628_s16, 2  ;;  %s1723_s19 = scalar_lea.sflag [#allocation4], %s1722_s13 }
 0x7ab   : > { %p2245_p8 = pnand %p3244_p2, %p3243_p0 }
 0x7ad   : > { %2611 = dma.done.wait (!%p2245_p8), %s1723_s19, 16  }
 0x7ae   : > { %2613 = vsyncadd (!%p2245_p8), %s1723_s19, 4294967280  ;;  %p30_p6 = scmp.ge.s32.totalorder %s2889_s21, 4   ;;  %s3245_s29 = smov %s2620_s30 }
 0x7af   : > { %s3246_s30 = smov %s2624_s15  ;;  %s3247_s15 = smov %s2901_s9 }
 0x7b0   : > { %s3248_s16 = smov %s2889_s21  ;;  %32 = sbr.rel (!%p30_p6) target bundleno = 16 (0x10), region = 148 }
 0x7b7   :  { %1727 = vsyncpa [#allocation3], 1 }
 0x7b8   :  { %1729 = vsyncpa [#allocation3 + $0x1], 1 }
 0x7b9   :  { %1730 = vsyncpa [#allocation6], 1 }
 0x7ba   :  { %1731 = vsyncpa [#allocation9], 1 }
 0x7bb   :  { %1732 = vsyncpa [#allocation12], 1 }
 0x7bc   :  { %1733 = vsyncpa [#allocation4], 1 }
 0x7bd   :  { %1735 = vsyncpa [#allocation4 + $0x1], 1 }

</bundles_post_ra>
